<compile_context>
chip_gen: v5e
topology: v5e:2x2
jax: 0.10.0
libtpu: 0.0.40
codegen_flags: <defaults>
</compile_context>

<pallas_src>
import jax
import jax.numpy as jnp
from jax import lax
from jax.experimental import pallas as pl
from jax.experimental.pallas import tpu as pltpu


# ----------------------------- in-kernel helpers ----------------------------

def _silu_fast(y):
    """SiLU via EUP exp + approximate EUP reciprocal (keeps the VPU slot free)."""
    return y * pl.reciprocal(1.0 + jnp.exp(-y), approx=True)


# ------------------------------- fused kernel --------------------------------

def _make_fused_kernel(*, K, S, H, W, Hp, Wc, Ho, Wo, pad,
                       has_expand, use_se, use_res):
    """Builds the fused MBConv kernel; one batch element per grid step."""

    def kernel(*refs):
        refs = list(refs)
        x_ref = refs.pop(0)                       # (1, Hp, Wc, Cin), zero-padded
        if has_expand:
            exp_w_ref = refs.pop(0)               # (Cin, Cexp)
            exp_b_ref = refs.pop(0)               # (1, Cexp)
        dw_w_ref = refs.pop(0)                    # (K, K, Cexp)
        dw_b_ref = refs.pop(0)                    # (1, Cexp)
        if use_se:
            se_w1_ref = refs.pop(0)               # (Cexp, Csq)
            se_b1_ref = refs.pop(0)               # (1, Csq)
            se_w2_ref = refs.pop(0)               # (Csq, Cexp)
            se_b2_ref = refs.pop(0)               # (1, Cexp)
        proj_w_ref = refs.pop(0)                  # (Cexp, Cout)
        proj_b_ref = refs.pop(0)                  # (1, Cout)
        o_ref = refs.pop(0)                       # (1, Ho, Wo, Cout)
        assert not refs

        xpad = x_ref[0].astype(jnp.float32)       # (Hp, Wc, Cin)
        Cin = xpad.shape[-1]

        # ---- expand 1x1 conv (+folded BN) + SiLU, computed on padded canvas --
        if has_expand:
            h = jnp.dot(xpad.reshape(Hp * Wc, Cin), exp_w_ref[...],
                        preferred_element_type=jnp.float32)
            h = _silu_fast(h + exp_b_ref[...])
            Cexp = h.shape[-1]
            h = h.reshape(Hp, Wc, Cexp)
            # A 1x1 conv + bias + SiLU maps the zero halo to silu(bias) != 0;
            # re-zero it so the depthwise conv sees true zero padding.
            row = lax.broadcasted_iota(jnp.int32, (Hp, Wc, Cexp), 0)
            col = lax.broadcasted_iota(jnp.int32, (Hp, Wc, Cexp), 1)
            interior = ((row >= pad) & (row < pad + H) &
                        (col >= pad) & (col < pad + W))
            h = jnp.where(interior, h, 0.0)
        else:
            h = xpad
            Cexp = Cin

        # ---- depthwise KxK conv (stride S) + folded BN + SiLU, all in VMEM ---
        acc = jnp.zeros((Ho, Wo, Cexp), jnp.float32)
        for kh in range(K):
            for kw in range(K):
                win = h[kh:kh + (Ho - 1) * S + 1:S,
                        kw:kw + (Wo - 1) * S + 1:S, :]
                acc = acc + win * dw_w_ref[kh, kw, :]
        d2 = _silu_fast(acc + dw_b_ref[0]).reshape(Ho * Wo, Cexp)

        # ---- squeeze-excitation (tiny matmuls; gate applied in VMEM) ---------
        if use_se:
            pooled = jnp.mean(d2, axis=0, keepdims=True)             # (1, Cexp)
            s = jnp.dot(pooled, se_w1_ref[...],
                        preferred_element_type=jnp.float32) + se_b1_ref[...]
            s = s * jax.nn.sigmoid(s)                                # SiLU
            s = jnp.dot(s, se_w2_ref[...],
                        preferred_element_type=jnp.float32) + se_b2_ref[...]
            gate = jax.nn.sigmoid(s)                                 # (1, Cexp)
            d2 = d2 * gate

        # ---- project 1x1 conv (+folded BN), residual fused in ----------------
        y = jnp.dot(d2, proj_w_ref[...], preferred_element_type=jnp.float32)
        y = y + proj_b_ref[...]
        Cout = y.shape[-1]
        y3 = y.reshape(Ho, Wo, Cout)
        if use_res:
            # stride == 1 and Cin == Cout here, so Ho == H and Wo == W.
            y3 = y3 + xpad[pad:pad + H, pad:pad + W, :]
        # TODO(synk): DropPath (stochastic depth) is training-only; identity at inference.
        o_ref[0] = y3.astype(o_ref.dtype)

    return kernel


# --------------------------------- wrapper -----------------------------------

def _round_up(x, m):
    return ((x + m - 1) // m) * m


def inverted_residual_forward(x_nhwc, p, cfg):
    """Full InvertedResidual forward (inference). x: (N, H, W, Cin) NHWC."""
    N, H, W, Cin = x_nhwc.shape
    Cexp, Cout = cfg["expanded_c"], cfg["out_c"]
    K, S = cfg["kernel"], cfg["stride"]
    has_expand = (Cexp != Cin)
    use_se = bool(cfg["use_se"])
    use_res = (S == 1 and cfg["input_c"] == Cout)

    pad = (K - 1) // 2
    Hp = H + 2 * pad
    Wp = W + 2 * pad
    # Canvas width rounded to a sublane multiple so in-kernel reshapes between
    # (Hp, Wc, C) and (Hp*Wc, C) stay tile-aligned. Extra columns are zeros the
    # depthwise windows never read.
    Wc = _round_up(Wp, 8)
    Ho = (Hp - K) // S + 1
    Wo = (Wp - K) // S + 1

    # Pad the small un-expanded input once in HBM; the 4x-expanded activation
    # is padded / kept entirely in VMEM inside the fused kernel.
    xp = jnp.pad(x_nhwc, ((0, 0), (pad, pad), (pad, Wc - W - pad), (0, 0)))

    Csq = p["se_w1"].shape[1] if use_se else 0

    def const_spec(shape):
        return pl.BlockSpec(shape, lambda n, _nd=len(shape): (0,) * _nd)

    args = [xp]
    in_specs = [pl.BlockSpec((1, Hp, Wc, Cin), lambda n: (n, 0, 0, 0))]
    if has_expand:
        args += [p["exp_w"], p["exp_b"].reshape(1, Cexp)]
        in_specs += [const_spec((Cin, Cexp)), const_spec((1, Cexp))]
    args += [p["dw_w"], p["dw_b"].reshape(1, Cexp)]
    in_specs += [const_spec((K, K, Cexp)), const_spec((1, Cexp))]
    if use_se:
        args += [p["se_w1"], p["se_b1"].reshape(1, Csq),
                 p["se_w2"], p["se_b2"].reshape(1, Cexp)]
        in_specs += [const_spec((Cexp, Csq)), const_spec((1, Csq)),
                     const_spec((Csq, Cexp)), const_spec((1, Cexp))]
    args += [p["proj_w"], p["proj_b"].reshape(1, Cout)]
    in_specs += [const_spec((Cexp, Cout)), const_spec((1, Cout))]

    kernel = _make_fused_kernel(K=K, S=S, H=H, W=W, Hp=Hp, Wc=Wc, Ho=Ho, Wo=Wo,
                                pad=pad, has_expand=has_expand,
                                use_se=use_se, use_res=use_res)

    # Advisory cost estimate so XLA schedules sensibly around the custom call.
    flops = 2 * N * (int(has_expand) * Hp * Wc * Cin * Cexp
                     + Ho * Wo * K * K * Cexp
                     + int(use_se) * 2 * Cexp * Csq
                     + Ho * Wo * Cexp * Cout)
    transcendentals = N * (int(has_expand) * Hp * Wc * Cexp
                           + Ho * Wo * Cexp
                           + int(use_se) * (Csq + Cexp))
    bytes_accessed = 4 * (int(xp.size) + sum(int(a.size) for a in args[1:])
                          + N * Ho * Wo * Cout)

    # NOTE: per-step VMEM footprint here is ~1 MiB (well under the 16/32 MiB
    # scoped defaults on v5e/v6e/v7x). Larger EfficientNet stages would need
    # spatial tiling of the grid, not just batch tiling.
    return pl.pallas_call(
        kernel,
        out_shape=jax.ShapeDtypeStruct((N, Ho, Wo, Cout), x_nhwc.dtype),
        grid_spec=pltpu.PrefetchScalarGridSpec(
            num_scalar_prefetch=0,
            grid=(N,),                    # batch axis; N >= 2 keeps both v7x TCs busy
            in_specs=in_specs,
            out_specs=pl.BlockSpec((1, Ho, Wo, Cout), lambda n: (n, 0, 0, 0)),
        ),
        compiler_params=pltpu.CompilerParams(
            dimension_semantics=("parallel",)),
        cost_estimate=pl.CostEstimate(flops=flops,
                                      transcendentals=transcendentals,
                                      bytes_accessed=bytes_accessed),
    )(*args)


# --------------------------- parameters / reference --------------------------

def _fold_bn(w, gamma, beta, mean, var, eps=1e-5):
    scale = gamma / jnp.sqrt(var + eps)
    if w.ndim == 2:        # (Cin, Cout), scale per Cout
        wf = w * scale[None, :]
    else:                  # (K, K, C), scale per channel
        wf = w * scale[None, None, :]
    bf = beta - mean * scale
    return wf, bf


def init_params(key, cfg):
    Cin, Cexp, Cout, K = cfg["input_c"], cfg["expanded_c"], cfg["out_c"], cfg["kernel"]
    Csq = Cin // 4
    ks = jax.random.split(key, 24)
    n = lambda k, s, std=0.1: std * jax.random.normal(k, s, jnp.float32)
    u = lambda k, s: jax.random.uniform(k, s, jnp.float32, 0.5, 1.5)

    # expand conv (1x1, no bias) + BN
    exp_w = n(ks[0], (Cin, Cexp))
    exp_g, exp_be, exp_m, exp_v = u(ks[1], (Cexp,)), n(ks[2], (Cexp,)), n(ks[3], (Cexp,)), u(ks[4], (Cexp,))
    exp_wf, exp_bf = _fold_bn(exp_w, exp_g, exp_be, exp_m, exp_v)

    # depthwise conv (K,K,Cexp, no bias) + BN
    dw_w = n(ks[5], (K, K, Cexp))
    dw_g, dw_be, dw_m, dw_v = u(ks[6], (Cexp,)), n(ks[7], (Cexp,)), n(ks[8], (Cexp,)), u(ks[9], (Cexp,))
    dw_wf, dw_bf = _fold_bn(dw_w, dw_g, dw_be, dw_m, dw_v)

    # SE fc1 / fc2 (1x1 convs with bias, no BN)
    se_w1, se_b1 = n(ks[10], (Cexp, Csq)), n(ks[11], (Csq,))
    se_w2, se_b2 = n(ks[12], (Csq, Cexp)), n(ks[13], (Cexp,))

    # project conv (1x1, no bias) + BN
    pr_w = n(ks[14], (Cexp, Cout))
    pr_g, pr_be, pr_m, pr_v = u(ks[15], (Cout,)), n(ks[16], (Cout,)), n(ks[17], (Cout,)), u(ks[18], (Cout,))
    pr_wf, pr_bf = _fold_bn(pr_w, pr_g, pr_be, pr_m, pr_v)

    return dict(exp_w=exp_wf, exp_b=exp_bf, dw_w=dw_wf, dw_b=dw_bf,
                se_w1=se_w1, se_b1=se_b1, se_w2=se_w2, se_b2=se_b2,
                proj_w=pr_wf, proj_b=pr_bf)


def reference_forward(x, p, cfg):
    """Pure-jnp NHWC reference (same math as the PyTorch module in eval mode)."""
    N, H, W, Cin = x.shape
    Cexp, Cout, K, S = cfg["expanded_c"], cfg["out_c"], cfg["kernel"], cfg["stride"]
    h = x
    if Cexp != Cin:
        h = jnp.einsum("nhwc,cd->nhwd", h, p["exp_w"]) + p["exp_b"]
        h = h * jax.nn.sigmoid(h)
    pad = (K - 1) // 2
    hp = jnp.pad(h, ((0, 0), (pad, pad), (pad, pad), (0, 0)))
    Ho = (H + 2 * pad - K) // S + 1
    Wo = (W + 2 * pad - K) // S + 1
    acc = jnp.zeros((N, Ho, Wo, Cexp), jnp.float32)
    for kh in range(K):
        for kw in range(K):
            acc = acc + hp[:, kh:kh + (Ho - 1) * S + 1:S,
                           kw:kw + (Wo - 1) * S + 1:S, :] * p["dw_w"][kh, kw]
    h = acc + p["dw_b"]
    h = h * jax.nn.sigmoid(h)
    if cfg["use_se"]:
        s = jnp.mean(h, axis=(1, 2))
        s = s @ p["se_w1"] + p["se_b1"]
        s = s * jax.nn.sigmoid(s)
        s = s @ p["se_w2"] + p["se_b2"]
        s = jax.nn.sigmoid(s)
        h = h * s[:, None, None, :]
    out = jnp.einsum("nhwc,cd->nhwd", h, p["proj_w"]) + p["proj_b"]
    if S == 1 and cfg["input_c"] == Cout:
        out = out + x
    return out


# ----------------------------------- main -------------------------------------

if __name__ == "__main__":
    # InvertedResidualConfig(kernel=3, input_c=32, out_c=32, expanded_ratio=4,
    #                        stride=1, use_se=True, drop_rate=0.1, width_coefficient=1.0)
    cfg = dict(kernel=3, input_c=32, expanded_c=128, out_c=32, stride=1, use_se=True)
    N, H, W = 2, 16, 16

    key = jax.random.PRNGKey(0)
    kx, kp = jax.random.split(key)
    x_nchw = jax.random.normal(kx, (N, cfg["input_c"], H, W), jnp.float32)  # PyTorch NCHW
    x = jnp.transpose(x_nchw, (0, 2, 3, 1))                                 # kernel NHWC

    params = init_params(kp, cfg)

    out = inverted_residual_forward(x, params, cfg)
    out = jax.block_until_ready(out)

    ref = reference_forward(x, params, cfg)
    err = float(jnp.max(jnp.abs(out - ref)))
    # Tolerance accounts for the EUP approximate-reciprocal SiLU in the kernel
    # (the reference uses an exact sigmoid); real bugs show up as O(0.1+) errors.
    if not bool(jnp.allclose(out, ref, rtol=2e-2, atol=2e-2)):
        raise AssertionError(f"Pallas output mismatch vs reference, max|diff|={err}")

    print("KERNEL_OK")
</pallas_src>

<mosaic_0001>
module attributes {stable_mosaic.version = 11 : i64} {
  func.func @kernel(%arg0: i32, %arg1: memref<1x18x24x32xf32, #tpu.memory_space<vmem>>, %arg2: memref<32x128xf32, #tpu.memory_space<vmem>>, %arg3: memref<1x128xf32, #tpu.memory_space<vmem>>, %arg4: memref<3x3x128xf32, #tpu.memory_space<vmem>>, %arg5: memref<1x128xf32, #tpu.memory_space<vmem>>, %arg6: memref<128x8xf32, #tpu.memory_space<vmem>>, %arg7: memref<1x8xf32, #tpu.memory_space<vmem>>, %arg8: memref<8x128xf32, #tpu.memory_space<vmem>>, %arg9: memref<1x128xf32, #tpu.memory_space<vmem>>, %arg10: memref<128x32xf32, #tpu.memory_space<vmem>>, %arg11: memref<1x32xf32, #tpu.memory_space<vmem>>, %arg12: memref<1x16x16x32xf32, #tpu.memory_space<vmem>>) attributes {dimension_semantics = [#tpu.dimension_semantics<parallel>], iteration_bounds = array<i64: 2>, scalar_prefetch = 0 : i64, scratch_operands = 0 : i64, tpu.core_type = #tpu.core_type<tc>, window_params = [{transform_indices = @transform_0, window_bounds = array<i64: 1, 18, 24, 32>}, {pipeline_mode = #tpu.pipeline_mode<synchronous>, transform_indices = @transform_1, window_bounds = array<i64: 32, 128>}, {pipeline_mode = #tpu.pipeline_mode<synchronous>, transform_indices = @transform_2, window_bounds = array<i64: 1, 128>}, {pipeline_mode = #tpu.pipeline_mode<synchronous>, transform_indices = @transform_3, window_bounds = array<i64: 3, 3, 128>}, {pipeline_mode = #tpu.pipeline_mode<synchronous>, transform_indices = @transform_4, window_bounds = array<i64: 1, 128>}, {pipeline_mode = #tpu.pipeline_mode<synchronous>, transform_indices = @transform_5, window_bounds = array<i64: 128, 8>}, {pipeline_mode = #tpu.pipeline_mode<synchronous>, transform_indices = @transform_6, window_bounds = array<i64: 1, 8>}, {pipeline_mode = #tpu.pipeline_mode<synchronous>, transform_indices = @transform_7, window_bounds = array<i64: 8, 128>}, {pipeline_mode = #tpu.pipeline_mode<synchronous>, transform_indices = @transform_8, window_bounds = array<i64: 1, 128>}, {pipeline_mode = #tpu.pipeline_mode<synchronous>, transform_indices = @transform_9, window_bounds = array<i64: 128, 32>}, {pipeline_mode = #tpu.pipeline_mode<synchronous>, transform_indices = @transform_10, window_bounds = array<i64: 1, 32>}, {transform_indices = @transform_11, window_bounds = array<i64: 1, 16, 16, 32>}]} {
    %c0 = arith.constant 0 : index
    %c0_0 = arith.constant 0 : index
    %c0_1 = arith.constant 0 : index
    %c0_2 = arith.constant 0 : index
    %0 = vector.load %arg1[%c0, %c0_0, %c0_1, %c0_2] : memref<1x18x24x32xf32, #tpu.memory_space<vmem>>, vector<1x18x24x32xf32>
    %1 = vector.shape_cast %0 : vector<1x18x24x32xf32> to vector<18x24x32xf32>
    %2 = vector.shape_cast %1 : vector<18x24x32xf32> to vector<432x32xf32>
    %c0_3 = arith.constant 0 : index
    %c0_4 = arith.constant 0 : index
    %3 = vector.load %arg2[%c0_3, %c0_4] : memref<32x128xf32, #tpu.memory_space<vmem>>, vector<32x128xf32>
    %cst = arith.constant dense<0.000000e+00> : vector<432x128xf32>
    %4 = tpu.matmul %2, %3, %cst {dimension_numbers = #tpu.dot_dimension_numbers<[1], [0], [0], [1], [0, 0, 1, 1], [], []>} : vector<432x32xf32>, vector<32x128xf32>, vector<432x128xf32> -> vector<432x128xf32>
    %c0_5 = arith.constant 0 : index
    %c0_6 = arith.constant 0 : index
    %5 = vector.load %arg3[%c0_5, %c0_6] : memref<1x128xf32, #tpu.memory_space<vmem>>, vector<1x128xf32>
    %6 = vector.broadcast %5 : vector<1x128xf32> to vector<432x128xf32>
    %7 = arith.addf %4, %6 : vector<432x128xf32>
    %cst_7 = arith.constant 0.000000e+00 : f32
    %8 = vector.broadcast %cst_7 : f32 to vector<432x128xf32>
    %9 = arith.subf %8, %7 : vector<432x128xf32>
    %10 = math.exp %9 : vector<432x128xf32>
    %cst_8 = arith.constant 1.000000e+00 : f32
    %11 = vector.broadcast %cst_8 : f32 to vector<432x128xf32>
    %12 = arith.addf %11, %10 : vector<432x128xf32>
    %13 = tpu.reciprocal %12 {approx = true} : vector<432x128xf32> -> vector<432x128xf32>
    %14 = arith.mulf %7, %13 : vector<432x128xf32>
    %15 = vector.shape_cast %14 : vector<432x128xf32> to vector<18x24x128xf32>
    %16 = tpu.iota {dimensions = array<i32: 0>} : vector<18x24x128xi32>
    %17 = tpu.iota {dimensions = array<i32: 1>} : vector<18x24x128xi32>
    %c1_i32 = arith.constant 1 : i32
    %18 = vector.broadcast %c1_i32 : i32 to vector<18x24x128xi32>
    %19 = arith.cmpi sge, %16, %18 : vector<18x24x128xi32>
    %c17_i32 = arith.constant 17 : i32
    %20 = vector.broadcast %c17_i32 : i32 to vector<18x24x128xi32>
    %21 = arith.cmpi slt, %16, %20 : vector<18x24x128xi32>
    %22 = arith.andi %19, %21 : vector<18x24x128xi1>
    %c1_i32_9 = arith.constant 1 : i32
    %23 = vector.broadcast %c1_i32_9 : i32 to vector<18x24x128xi32>
    %24 = arith.cmpi sge, %17, %23 : vector<18x24x128xi32>
    %25 = arith.andi %22, %24 : vector<18x24x128xi1>
    %c17_i32_10 = arith.constant 17 : i32
    %26 = vector.broadcast %c17_i32_10 : i32 to vector<18x24x128xi32>
    %27 = arith.cmpi slt, %17, %26 : vector<18x24x128xi32>
    %28 = arith.andi %25, %27 : vector<18x24x128xi1>
    %cst_11 = arith.constant 0.000000e+00 : f32
    %29 = vector.broadcast %cst_11 : f32 to vector<18x24x128xf32>
    %30 = arith.select %28, %15, %29 : vector<18x24x128xi1>, vector<18x24x128xf32>
    %cst_12 = arith.constant 0.000000e+00 : f32
    %31 = vector.broadcast %cst_12 : f32 to vector<16x16x128xf32>
    %32 = vector.extract_strided_slice %30 {offsets = [0, 0, 0], sizes = [16, 16, 128], strides = [1, 1, 1]} : vector<18x24x128xf32> to vector<16x16x128xf32>
    %c0_13 = arith.constant 0 : index
    %c0_14 = arith.constant 0 : index
    %c0_15 = arith.constant 0 : index
    %33 = vector.load %arg4[%c0_13, %c0_14, %c0_15] : memref<3x3x128xf32, #tpu.memory_space<vmem>>, vector<1x1x128xf32>
    %34 = vector.shape_cast %33 : vector<1x1x128xf32> to vector<128xf32>
    %35 = vector.shape_cast %34 : vector<128xf32> to vector<1x1x128xf32>
    %36 = vector.broadcast %35 : vector<1x1x128xf32> to vector<16x16x128xf32>
    %37 = arith.mulf %32, %36 : vector<16x16x128xf32>
    %38 = arith.addf %31, %37 : vector<16x16x128xf32>
    %39 = vector.extract_strided_slice %30 {offsets = [0, 1, 0], sizes = [16, 16, 128], strides = [1, 1, 1]} : vector<18x24x128xf32> to vector<16x16x128xf32>
    %c0_16 = arith.constant 0 : index
    %c1 = arith.constant 1 : index
    %c0_17 = arith.constant 0 : index
    %40 = vector.load %arg4[%c0_16, %c1, %c0_17] : memref<3x3x128xf32, #tpu.memory_space<vmem>>, vector<1x1x128xf32>
    %41 = vector.shape_cast %40 : vector<1x1x128xf32> to vector<128xf32>
    %42 = vector.shape_cast %41 : vector<128xf32> to vector<1x1x128xf32>
    %43 = vector.broadcast %42 : vector<1x1x128xf32> to vector<16x16x128xf32>
    %44 = arith.mulf %39, %43 : vector<16x16x128xf32>
    %45 = arith.addf %38, %44 : vector<16x16x128xf32>
    %46 = vector.extract_strided_slice %30 {offsets = [0, 2, 0], sizes = [16, 16, 128], strides = [1, 1, 1]} : vector<18x24x128xf32> to vector<16x16x128xf32>
    %c0_18 = arith.constant 0 : index
    %c2 = arith.constant 2 : index
    %c0_19 = arith.constant 0 : index
    %47 = vector.load %arg4[%c0_18, %c2, %c0_19] : memref<3x3x128xf32, #tpu.memory_space<vmem>>, vector<1x1x128xf32>
    %48 = vector.shape_cast %47 : vector<1x1x128xf32> to vector<128xf32>
    %49 = vector.shape_cast %48 : vector<128xf32> to vector<1x1x128xf32>
    %50 = vector.broadcast %49 : vector<1x1x128xf32> to vector<16x16x128xf32>
    %51 = arith.mulf %46, %50 : vector<16x16x128xf32>
    %52 = arith.addf %45, %51 : vector<16x16x128xf32>
    %53 = vector.extract_strided_slice %30 {offsets = [1, 0, 0], sizes = [16, 16, 128], strides = [1, 1, 1]} : vector<18x24x128xf32> to vector<16x16x128xf32>
    %c1_20 = arith.constant 1 : index
    %c0_21 = arith.constant 0 : index
    %c0_22 = arith.constant 0 : index
    %54 = vector.load %arg4[%c1_20, %c0_21, %c0_22] : memref<3x3x128xf32, #tpu.memory_space<vmem>>, vector<1x1x128xf32>
    %55 = vector.shape_cast %54 : vector<1x1x128xf32> to vector<128xf32>
    %56 = vector.shape_cast %55 : vector<128xf32> to vector<1x1x128xf32>
    %57 = vector.broadcast %56 : vector<1x1x128xf32> to vector<16x16x128xf32>
    %58 = arith.mulf %53, %57 : vector<16x16x128xf32>
    %59 = arith.addf %52, %58 : vector<16x16x128xf32>
    %60 = vector.extract_strided_slice %30 {offsets = [1, 1, 0], sizes = [16, 16, 128], strides = [1, 1, 1]} : vector<18x24x128xf32> to vector<16x16x128xf32>
    %c1_23 = arith.constant 1 : index
    %c1_24 = arith.constant 1 : index
    %c0_25 = arith.constant 0 : index
    %61 = vector.load %arg4[%c1_23, %c1_24, %c0_25] : memref<3x3x128xf32, #tpu.memory_space<vmem>>, vector<1x1x128xf32>
    %62 = vector.shape_cast %61 : vector<1x1x128xf32> to vector<128xf32>
    %63 = vector.shape_cast %62 : vector<128xf32> to vector<1x1x128xf32>
    %64 = vector.broadcast %63 : vector<1x1x128xf32> to vector<16x16x128xf32>
    %65 = arith.mulf %60, %64 : vector<16x16x128xf32>
    %66 = arith.addf %59, %65 : vector<16x16x128xf32>
    %67 = vector.extract_strided_slice %30 {offsets = [1, 2, 0], sizes = [16, 16, 128], strides = [1, 1, 1]} : vector<18x24x128xf32> to vector<16x16x128xf32>
    %c1_26 = arith.constant 1 : index
    %c2_27 = arith.constant 2 : index
    %c0_28 = arith.constant 0 : index
    %68 = vector.load %arg4[%c1_26, %c2_27, %c0_28] : memref<3x3x128xf32, #tpu.memory_space<vmem>>, vector<1x1x128xf32>
    %69 = vector.shape_cast %68 : vector<1x1x128xf32> to vector<128xf32>
    %70 = vector.shape_cast %69 : vector<128xf32> to vector<1x1x128xf32>
    %71 = vector.broadcast %70 : vector<1x1x128xf32> to vector<16x16x128xf32>
    %72 = arith.mulf %67, %71 : vector<16x16x128xf32>
    %73 = arith.addf %66, %72 : vector<16x16x128xf32>
    %74 = vector.extract_strided_slice %30 {offsets = [2, 0, 0], sizes = [16, 16, 128], strides = [1, 1, 1]} : vector<18x24x128xf32> to vector<16x16x128xf32>
    %c2_29 = arith.constant 2 : index
    %c0_30 = arith.constant 0 : index
    %c0_31 = arith.constant 0 : index
    %75 = vector.load %arg4[%c2_29, %c0_30, %c0_31] : memref<3x3x128xf32, #tpu.memory_space<vmem>>, vector<1x1x128xf32>
    %76 = vector.shape_cast %75 : vector<1x1x128xf32> to vector<128xf32>
    %77 = vector.shape_cast %76 : vector<128xf32> to vector<1x1x128xf32>
    %78 = vector.broadcast %77 : vector<1x1x128xf32> to vector<16x16x128xf32>
    %79 = arith.mulf %74, %78 : vector<16x16x128xf32>
    %80 = arith.addf %73, %79 : vector<16x16x128xf32>
    %81 = vector.extract_strided_slice %30 {offsets = [2, 1, 0], sizes = [16, 16, 128], strides = [1, 1, 1]} : vector<18x24x128xf32> to vector<16x16x128xf32>
    %c2_32 = arith.constant 2 : index
    %c1_33 = arith.constant 1 : index
    %c0_34 = arith.constant 0 : index
    %82 = vector.load %arg4[%c2_32, %c1_33, %c0_34] : memref<3x3x128xf32, #tpu.memory_space<vmem>>, vector<1x1x128xf32>
    %83 = vector.shape_cast %82 : vector<1x1x128xf32> to vector<128xf32>
    %84 = vector.shape_cast %83 : vector<128xf32> to vector<1x1x128xf32>
    %85 = vector.broadcast %84 : vector<1x1x128xf32> to vector<16x16x128xf32>
    %86 = arith.mulf %81, %85 : vector<16x16x128xf32>
    %87 = arith.addf %80, %86 : vector<16x16x128xf32>
    %88 = vector.extract_strided_slice %30 {offsets = [2, 2, 0], sizes = [16, 16, 128], strides = [1, 1, 1]} : vector<18x24x128xf32> to vector<16x16x128xf32>
    %c2_35 = arith.constant 2 : index
    %c2_36 = arith.constant 2 : index
    %c0_37 = arith.constant 0 : index
    %89 = vector.load %arg4[%c2_35, %c2_36, %c0_37] : memref<3x3x128xf32, #tpu.memory_space<vmem>>, vector<1x1x128xf32>
    %90 = vector.shape_cast %89 : vector<1x1x128xf32> to vector<128xf32>
    %91 = vector.shape_cast %90 : vector<128xf32> to vector<1x1x128xf32>
    %92 = vector.broadcast %91 : vector<1x1x128xf32> to vector<16x16x128xf32>
    %93 = arith.mulf %88, %92 : vector<16x16x128xf32>
    %94 = arith.addf %87, %93 : vector<16x16x128xf32>
    %c0_38 = arith.constant 0 : index
    %c0_39 = arith.constant 0 : index
    %95 = vector.load %arg5[%c0_38, %c0_39] : memref<1x128xf32, #tpu.memory_space<vmem>>, vector<1x128xf32>
    %96 = vector.shape_cast %95 : vector<1x128xf32> to vector<128xf32>
    %97 = vector.shape_cast %96 : vector<128xf32> to vector<1x1x128xf32>
    %98 = vector.broadcast %97 : vector<1x1x128xf32> to vector<16x16x128xf32>
    %99 = arith.addf %94, %98 : vector<16x16x128xf32>
    %cst_40 = arith.constant 0.000000e+00 : f32
    %100 = vector.broadcast %cst_40 : f32 to vector<16x16x128xf32>
    %101 = arith.subf %100, %99 : vector<16x16x128xf32>
    %102 = math.exp %101 : vector<16x16x128xf32>
    %cst_41 = arith.constant 1.000000e+00 : f32
    %103 = vector.broadcast %cst_41 : f32 to vector<16x16x128xf32>
    %104 = arith.addf %103, %102 : vector<16x16x128xf32>
    %105 = tpu.reciprocal %104 {approx = true} : vector<16x16x128xf32> -> vector<16x16x128xf32>
    %106 = arith.mulf %99, %105 : vector<16x16x128xf32>
    %107 = vector.shape_cast %106 : vector<16x16x128xf32> to vector<256x128xf32>
    %cst_42 = arith.constant dense<0.000000e+00> : vector<128xf32>
    %108 = vector.multi_reduction <add>, %107, %cst_42 [0] : vector<256x128xf32> to vector<128xf32>
    %109 = vector.shape_cast %108 : vector<128xf32> to vector<1x128xf32>
    %cst_43 = arith.constant 2.560000e+02 : f32
    %110 = vector.broadcast %cst_43 : f32 to vector<1x128xf32>
    %111 = arith.divf %109, %110 : vector<1x128xf32>
    %c0_44 = arith.constant 0 : index
    %c0_45 = arith.constant 0 : index
    %112 = vector.load %arg6[%c0_44, %c0_45] : memref<128x8xf32, #tpu.memory_space<vmem>>, vector<128x8xf32>
    %cst_46 = arith.constant dense<0.000000e+00> : vector<1x8xf32>
    %113 = tpu.matmul %111, %112, %cst_46 {dimension_numbers = #tpu.dot_dimension_numbers<[1], [0], [0], [1], [0, 0, 1, 1], [], []>} : vector<1x128xf32>, vector<128x8xf32>, vector<1x8xf32> -> vector<1x8xf32>
    %c0_47 = arith.constant 0 : index
    %c0_48 = arith.constant 0 : index
    %114 = vector.load %arg7[%c0_47, %c0_48] : memref<1x8xf32, #tpu.memory_space<vmem>>, vector<1x8xf32>
    %115 = arith.addf %113, %114 : vector<1x8xf32>
    %116 = arith.negf %115 : vector<1x8xf32>
    %117 = math.exp %116 : vector<1x8xf32>
    %cst_49 = arith.constant 1.000000e+00 : f32
    %118 = vector.broadcast %cst_49 : f32 to vector<1x8xf32>
    %119 = arith.addf %118, %117 : vector<1x8xf32>
    %120 = arith.divf %118, %119 : vector<1x8xf32>
    %121 = arith.mulf %115, %120 : vector<1x8xf32>
    %c0_50 = arith.constant 0 : index
    %c0_51 = arith.constant 0 : index
    %122 = vector.load %arg8[%c0_50, %c0_51] : memref<8x128xf32, #tpu.memory_space<vmem>>, vector<8x128xf32>
    %cst_52 = arith.constant dense<0.000000e+00> : vector<1x128xf32>
    %123 = tpu.matmul %121, %122, %cst_52 {dimension_numbers = #tpu.dot_dimension_numbers<[1], [0], [0], [1], [0, 0, 1, 1], [], []>} : vector<1x8xf32>, vector<8x128xf32>, vector<1x128xf32> -> vector<1x128xf32>
    %c0_53 = arith.constant 0 : index
    %c0_54 = arith.constant 0 : index
    %124 = vector.load %arg9[%c0_53, %c0_54] : memref<1x128xf32, #tpu.memory_space<vmem>>, vector<1x128xf32>
    %125 = arith.addf %123, %124 : vector<1x128xf32>
    %126 = arith.negf %125 : vector<1x128xf32>
    %127 = math.exp %126 : vector<1x128xf32>
    %cst_55 = arith.constant 1.000000e+00 : f32
    %128 = vector.broadcast %cst_55 : f32 to vector<1x128xf32>
    %129 = arith.addf %128, %127 : vector<1x128xf32>
    %130 = arith.divf %128, %129 : vector<1x128xf32>
    %131 = vector.broadcast %130 : vector<1x128xf32> to vector<256x128xf32>
    %132 = arith.mulf %107, %131 : vector<256x128xf32>
    %c0_56 = arith.constant 0 : index
    %c0_57 = arith.constant 0 : index
    %133 = vector.load %arg10[%c0_56, %c0_57] : memref<128x32xf32, #tpu.memory_space<vmem>>, vector<128x32xf32>
    %cst_58 = arith.constant dense<0.000000e+00> : vector<256x32xf32>
    %134 = tpu.matmul %132, %133, %cst_58 {dimension_numbers = #tpu.dot_dimension_numbers<[1], [0], [0], [1], [0, 0, 1, 1], [], []>} : vector<256x128xf32>, vector<128x32xf32>, vector<256x32xf32> -> vector<256x32xf32>
    %c0_59 = arith.constant 0 : index
    %c0_60 = arith.constant 0 : index
    %135 = vector.load %arg11[%c0_59, %c0_60] : memref<1x32xf32, #tpu.memory_space<vmem>>, vector<1x32xf32>
    %136 = vector.broadcast %135 : vector<1x32xf32> to vector<256x32xf32>
    %137 = arith.addf %134, %136 : vector<256x32xf32>
    %138 = vector.shape_cast %137 : vector<256x32xf32> to vector<16x16x32xf32>
    %139 = vector.extract_strided_slice %1 {offsets = [1, 1, 0], sizes = [16, 16, 32], strides = [1, 1, 1]} : vector<18x24x32xf32> to vector<16x16x32xf32>
    %140 = arith.addf %138, %139 : vector<16x16x32xf32>
    %c0_61 = arith.constant 0 : index
    %c0_62 = arith.constant 0 : index
    %c0_63 = arith.constant 0 : index
    %c0_64 = arith.constant 0 : index
    %141 = vector.load %arg12[%c0_61, %c0_62, %c0_63, %c0_64] : memref<1x16x16x32xf32, #tpu.memory_space<vmem>>, vector<1x16x16x32xf32>
    %142 = vector.shape_cast %141 : vector<1x16x16x32xf32> to vector<16x16x32xf32>
    %143 = vector.shape_cast %140 : vector<16x16x32xf32> to vector<1x16x16x32xf32>
    tpu.vector_store %arg12[%c0_61, %c0_62, %c0_63, %c0_64], %143 {strides = array<i32>} : memref<1x16x16x32xf32, #tpu.memory_space<vmem>>, vector<1x16x16x32xf32>,
    return
  }
  func.func @transform_0(%arg0: i32) -> (i32, i32, i32, i32) {
    %c0_i32 = arith.constant 0 : i32
    %c0_i32_0 = arith.constant 0 : i32
    %c0_i32_1 = arith.constant 0 : i32
    %c0_i32_2 = arith.constant 0 : i32
    return %arg0, %c0_i32, %c0_i32_0, %c0_i32_1 : i32, i32, i32, i32
  }
  func.func @transform_1(%arg0: i32) -> (i32, i32) {
    %c0_i32 = arith.constant 0 : i32
    %c0_i32_0 = arith.constant 0 : i32
    %c0_i32_1 = arith.constant 0 : i32
    return %c0_i32, %c0_i32_0 : i32, i32
  }
  func.func @transform_2(%arg0: i32) -> (i32, i32) {
    %c0_i32 = arith.constant 0 : i32
    %c0_i32_0 = arith.constant 0 : i32
    %c0_i32_1 = arith.constant 0 : i32
    return %c0_i32, %c0_i32_0 : i32, i32
  }
  func.func @transform_3(%arg0: i32) -> (i32, i32, i32) {
    %c0_i32 = arith.constant 0 : i32
    %c0_i32_0 = arith.constant 0 : i32
    %c0_i32_1 = arith.constant 0 : i32
    %c0_i32_2 = arith.constant 0 : i32
    return %c0_i32, %c0_i32_0, %c0_i32_1 : i32, i32, i32
  }
  func.func @transform_4(%arg0: i32) -> (i32, i32) {
    %c0_i32 = arith.constant 0 : i32
    %c0_i32_0 = arith.constant 0 : i32
    %c0_i32_1 = arith.constant 0 : i32
    return %c0_i32, %c0_i32_0 : i32, i32
  }
  func.func @transform_5(%arg0: i32) -> (i32, i32) {
    %c0_i32 = arith.constant 0 : i32
    %c0_i32_0 = arith.constant 0 : i32
    %c0_i32_1 = arith.constant 0 : i32
    return %c0_i32, %c0_i32_0 : i32, i32
  }
  func.func @transform_6(%arg0: i32) -> (i32, i32) {
    %c0_i32 = arith.constant 0 : i32
    %c0_i32_0 = arith.constant 0 : i32
    %c0_i32_1 = arith.constant 0 : i32
    return %c0_i32, %c0_i32_0 : i32, i32
  }
  func.func @transform_7(%arg0: i32) -> (i32, i32) {
    %c0_i32 = arith.constant 0 : i32
    %c0_i32_0 = arith.constant 0 : i32
    %c0_i32_1 = arith.constant 0 : i32
    return %c0_i32, %c0_i32_0 : i32, i32
  }
  func.func @transform_8(%arg0: i32) -> (i32, i32) {
    %c0_i32 = arith.constant 0 : i32
    %c0_i32_0 = arith.constant 0 : i32
    %c0_i32_1 = arith.constant 0 : i32
    return %c0_i32, %c0_i32_0 : i32, i32
  }
  func.func @transform_9(%arg0: i32) -> (i32, i32) {
    %c0_i32 = arith.constant 0 : i32
    %c0_i32_0 = arith.constant 0 : i32
    %c0_i32_1 = arith.constant 0 : i32
    return %c0_i32, %c0_i32_0 : i32, i32
  }
  func.func @transform_10(%arg0: i32) -> (i32, i32) {
    %c0_i32 = arith.constant 0 : i32
    %c0_i32_0 = arith.constant 0 : i32
    %c0_i32_1 = arith.constant 0 : i32
    return %c0_i32, %c0_i32_0 : i32, i32
  }
  func.func @transform_11(%arg0: i32) -> (i32, i32, i32, i32) {
    %c0_i32 = arith.constant 0 : i32
    %c0_i32_0 = arith.constant 0 : i32
    %c0_i32_1 = arith.constant 0 : i32
    %c0_i32_2 = arith.constant 0 : i32
    return %arg0, %c0_i32, %c0_i32_0, %c0_i32_1 : i32, i32, i32, i32
  }
}

</mosaic_0001>

<bundles_post_ra>
// kernel: tpu_custom_call.1
= control target key start
LH: loop header
LB: loop body
LE: loop exit
PB: predicated region body
PF: predicated region fallthrough
CT: control target
= control target key end

     0   :  { %16 = vsyncpa [#allocation3], 0  ;;  %s7460_s0 = inlined_call_operand.hbm [shape: f32[2,18,24,32], index: 0, kind: input, shape index: {}]   ;;  %s7461_s1 = inlined_call_operand.vmem [shape: f32[32,128], index: 1, kind: input, shape index: {}]   ;;  %s7462_s2 = inlined_call_operand.vmem [shape: f32[1,128], index: 2, kind: input, shape index: {}]   ;;  %s7463_s3 = inlined_call_operand.vmem [shape: f32[3,3,128], index: 3, kind: input, shape index: {}]   ;;  %s7464_s4 = inlined_call_operand.vmem [shape: f32[1,128], index: 4, kind: input, shape index: {}]   ;;  %s7465_s5 = inlined_call_operand.vmem [shape: f32[128,8], index: 5, kind: input, shape index: {}]   ;;  %s7466_s6 = inlined_call_operand.vmem [shape: f32[1,8], index: 6, kind: input, shape index: {}]   ;;  %s7467_s7 = inlined_call_operand.vmem [shape: f32[8,128], index: 7, kind: input, shape index: {}]   ;;  %s7468_s8 = inlined_call_operand.vmem [shape: f32[1,128], index: 8, kind: input, shape index: {}]   ;;  %s7469_s9 = inlined_call_operand.vmem [shape: f32[128,32], index: 9, kind: input, shape index: {}]   ;;  %s7470_s10 = inlined_call_operand.vmem [shape: f32[1,32], index: 10, kind: input, shape index: {}]   ;;  %s7471_s11 = inlined_call_operand.hbm [shape: f32[2,16,16,32], index: 11, kind: output, shape index: {}]  }
   0x1   :  { %18 = vsyncpa [#allocation3 + $0x1], 0 }
   0x2   :  { %19 = vsyncpa [#allocation4], 0 }
   0x3   :  { %21 = vsyncpa [#allocation4 + $0x1], 0  ;;  %s4405_s17 = smov 0   ;;  %s4407_s18 = smov 0  }
   0x4   :  { %s4409_s19 = smov 0   ;;  %s4411_s20 = smov 0  }
   0x5 LB: > { %7559 = sst [smem:[#allocation8_spill]] %s4326_s17  ;;  %s4426_s21 = sadd.s32 4294967295, %s4338_s20   ;;  %s4338_s20 = sphi %s4411_s20, %s7827_s20   ;;  %s4334_s19 = sphi %s4409_s19, %s7829_s19   ;;  %s4330_s18 = sphi %s4407_s18, %s7831_s18   ;;  %s4326_s17 = sphi %s4405_s17, %s7830_s17  }
   0x6   : > { %7560 = sst [smem:[#allocation9_spill]] %s4334_s19  ;;  %s3671_s22 = sadd.s32 4294967294, %s4338_s20  }
   0x7   : > { %s4430_s23 = sadd.s32 1, %s4338_s20   ;;  %s34_s24 = sadd.s32 1, %s4334_s19 }
   0x8   : > { %7561 = sst [smem:[#allocation10_spill]] %s4430_s23  ;;  %s31_s25 = ssub.s32 %s4338_s20, %s4430_s23 }
   0x9   : > { %p41_p0 = scmp.ne.s32.totalorder %s4334_s19, %s4330_s18  ;;  %p32_p1 = scmp.eq.s32.totalorder %s31_s25, 0 }
   0xa   : > { %p42_p2 = scmp.eq.s32.totalorder %s4338_s20, 0  ;;  %p47_p3 = scmp.ne.s32.totalorder %s4330_s18, %s4326_s17 }
   0xb   : > { %p48_p4 = scmp.eq.s32.totalorder %s4426_s21, 0  ;;  %p281_p7 = scmp.eq.s32.totalorder %s4426_s21, 1 }
   0xc   : > { %s4442_s26 = scalar_select %p32_p1, %s4334_s19, %s34_s24  }
   0xd   : > { %p43_p5 = por %p42_p2, %p41_p0  ;;  %p4444_p6 = por %p48_p4, %p47_p3 }
   0xe   : > { %7562 = sst [smem:[#allocation11_spill]] %s4442_s26  ;;  %p287_p8 = scmp.eq.s32.totalorder %s3671_s22, 1 }
   0xf   : > { %p3673_p9 = scmp.ge.s32.totalorder %s4338_s20, 2  ;;  %p3785_p10 = scmp.lt.s32.totalorder %s4338_s20, 2 }
  0x10   : > { %p4451_p11 = por %p281_p7, %p41_p0  ;;  %p4455_p12 = por %p287_p8, %p47_p3 }
  0x11   : > { %s337_s30 = sand.u32 1, %s4334_s19   ;;  %s3771_s12 = smul.u32 432, %s4338_s20 }
  0x12   : > { %s7564_s28 = scalar_select %p4451_p11, 1, 0 }
  0x13   : > { %s7566_s29 = scalar_select %p4455_p12, 1, 0 }
  0x14   : > { %7565 = sst [smem:[#allocation12_spill]] %s7564_s28  ;;  %s3770_s13 = smul.u32 432, %s337_s30 }
  0x15   : > { %7567 = sst [smem:[#allocation13_spill]] %s7566_s29  ;;  %s346_s16 = scalar_lea.hbm %s7460_s0, %s3771_s12 }
  0x16   : > { %p4464_p13 = pnand %p3785_p10, %p43_p5  ;;  %s347_s22 = sshll.u32 %s346_s16, 4  ;;  %s348_s22 = int_to_ptr.hbm [resolvable:$true] %s347_s22 }
  0x17   : > { %s341_s25 = scalar_lea.vmem [#allocation2], %s3770_s13  ;;  %s338_s23 = scalar_lea.sflag [#allocation3], %s337_s30 }
  0x18   : > { %s349_s26 = sshll.u32 %s341_s25, 4  ;;  %s4242_s17 = sshra.s32 %s348_s22, 4  ;;  %s350_s26 = int_to_ptr.vmem [resolvable:$true] %s349_s26  ;;  %s4243_s17 = int_to_ptr.hbm [resolvable:$true] %s4242_s17 }
  0x19   : > { %s4244_s19 = scalar_lea.hbm %s4243_s17, 432  ;;  %p4246_p1 = pneg %p4464_p13 }
  0x1a   : > { %p4245_p0 = scmp.ne.s32.totalorder %s4243_s17, %s4244_s19  ;;  %s4249_s15 = scalar_lea.hbm %s7460_s0, 864 }
  0x1b   : > { %p4250_p4 = scmp.lt.s32.totalorder %s4243_s17, %s7460_s0  ;;  %p4251_p5 = scmp.lt.s32.totalorder %s4249_s15, %s4244_s19 }
  0x1c   : > { %p4247_p2 = pnand %p4246_p1, %p4245_p0 }
  0x1d   : > { %p4252_p7 = por %p4251_p5, %p4250_p4 }
  0x1e   : > { %p4248_p3 = pneg %p4247_p2 }
  0x20   : > { %p4253_p8 = pnand %p4252_p7, %p4248_p3 }
  0x22   : > { %4256 = shalt.err (!%p4253_p8)
}
  0x23   : > { %s4340_s30 = smov 128   ;;  %s4341_s13 = smov 8  }
  0x24   : > { %3780 = dma.hbm_to_vmem [thread:$0]  (!%p4464_p13), %s348_s22, 6912, %s350_s26, %s338_s23, %s4340_s30, %s4340_s30, %s4341_s13  }
  0x25   : > { %p3675_p10 = scmp.ge.s32.totalorder %s4338_s20, 1  ;;  %p357_p0 = scmp.lt.s32.totalorder %s4338_s20, 3 }
  0x27   : > { %p358_p1 = pnand %p3675_p10, %p357_p0 }
  0x29   : > { %361 = sbr.rel (%p358_p1) target bundleno = 1326 (0x52e), region = 64 }
  0x2e   : > { %s4481_s16 = sand.u32 1, %s4330_s18  }
  0x2f   : > { %s3772_s17 = smul.u32 432, %s4481_s16  ;;  %s364_s19 = scalar_lea.sflag [#allocation3], %s4481_s16 }
  0x31   : > { %s4485_s28 = scalar_lea.vmem [#allocation2], %s3772_s17 }
  0x32   : > { %4317 = dma.done.wait (%p4444_p6), %s364_s19, 6912  }
  0x33   : > { %4319 = vsyncadd (%p4444_p6), %s364_s19, 4294960384  ;;  %v464_v0 = vld [vmem:[%s7461_s1 + $0x18] sm:$0xff]  ;;  %v463_v1 = vld [vmem:[%s7461_s1 + $0x10] sm:$0xff]  ;;  %vm469_vm0 = vcmask 261120   ;;  %vm1375_vm2 = vcmask 1046528   ;;  %vm1618_vm3 = vcmask 1045504  }
  0x34   : > { %644 = vmatpush.msra.mxu0 %v464_v0  ;;  %3746 = vmatpush.msra.mxu1 %v464_v0  ;;  %v462_v2 = vld [vmem:[%s7461_s1 + $0x8] sm:$0xff]  ;;  %v461_v3 = vld [vmem:[%s7461_s1] sm:$0xff]  ;;  %vm3197_vm10 = vcmask 64512   ;;  %s3676_s22 = sshll.u32 %s4481_s16, 8  ;;  %s3583_s17 = scalar_lea.sflag [#allocation4], %s4481_s16 }
  0x35   : > { %3747 = vmatpush.msra.mxu2 %v464_v0  ;;  %v407_v4 = vld [vmem:[%s4485_s28] sm:$0xff]  ;;  %v438_v6 = vld [vmem:[%s4485_s28 + $0xf8] sm:$0xff]  ;;  %v408_v7 = vld [vmem:[%s4485_s28 + $0x8] sm:$0xff]  ;;  %s7239_s25 = scalar_lea.vmem [#allocation5], %s3676_s22  ;;  %s4292_s29 = scalar_lea.hbm %s7471_s11, 512 }
  0x36   : > { %645 = vmatpush.msra.mxu0 %v463_v1  ;;  %3748 = vmatpush.msra.mxu1 %v463_v1  ;;  %v431_v5 = vld [vmem:[%s4485_s28 + $0xc0] sm:$0xff]  ;;  %v432_v8 = vld [vmem:[%s4485_s28 + $0xc8] sm:$0xff]  ;;  %v409_v10 = vld [vmem:[%s4485_s28 + $0x10] sm:$0xff]  ;;  %s3595_s30 = sshll.u32 %s7239_s25, 4  ;;  %s3596_s30 = int_to_ptr.vmem [resolvable:$true] %s3595_s30 }
  0x37   : > { %3749 = vmatpush.msra.mxu2 %v463_v1  ;;  %v439_v9 = vld [vmem:[%s4485_s28 + $0x100] sm:$0xff]  ;;  %v433_v11 = vld [vmem:[%s4485_s28 + $0xd0] sm:$0xff]  ;;  %v440_v12 = vld [vmem:[%s4485_s28 + $0x108] sm:$0xff] }
  0x38   : > { %646 = vmatpush.msra.mxu0 %v462_v2  ;;  %3750 = vmatpush.msra.mxu1 %v462_v2  ;;  %v410_v13 = vld [vmem:[%s4485_s28 + $0x18] sm:$0xff]  ;;  %v441_v15 = vld [vmem:[%s4485_s28 + $0x110] sm:$0xff]  ;;  %v411_v16 = vld [vmem:[%s4485_s28 + $0x20] sm:$0xff] }
  0x39   : > { %3751 = vmatpush.msra.mxu2 %v462_v2  ;;  %v434_v14 = vld [vmem:[%s4485_s28 + $0xd8] sm:$0xff]  ;;  %v435_v17 = vld [vmem:[%s4485_s28 + $0xe0] sm:$0xff]  ;;  %v412_v19 = vld [vmem:[%s4485_s28 + $0x28] sm:$0xff] }
  0x3a   : > { %647 = vmatpush.msra.mxu0 %v461_v3  ;;  %3752 = vmatpush.msra.mxu1 %v461_v3  ;;  %v442_v18 = vld [vmem:[%s4485_s28 + $0x118] sm:$0xff]  ;;  %v436_v20 = vld [vmem:[%s4485_s28 + $0xe8] sm:$0xff]  ;;  %v443_v21 = vld [vmem:[%s4485_s28 + $0x120] sm:$0xff] }
  0x3b   : > { %3753 = vmatpush.msra.mxu2 %v461_v3  ;;  %3677 = vmatmul.msk.f32.vlgmr.msra.gmra.mxu0 %vm469_vm0, %v407_v4  ;;  %v413_v22 = vld [vmem:[%s4485_s28 + $0x30] sm:$0xff]  ;;  %v444_v24 = vld [vmem:[%s4485_s28 + $0x128] sm:$0xff]  ;;  %v414_v25 = vld [vmem:[%s4485_s28 + $0x38] sm:$0xff] }
  0x3c   : > { %3701 = vmatmul.msk.f32.vlgmr.msra.gmra.mxu1 %vm469_vm0, %v431_v5  ;;  %3708 = vmatmul.msk.f32.vlgmr.msra.gmra.mxu2 %vm469_vm0, %v438_v6  ;;  %v437_v23 = vld [vmem:[%s4485_s28 + $0xf0] sm:$0xff]  ;;  %v415_v27 = vld [vmem:[%s4485_s28 + $0x40] sm:$0xff]  ;;  %v446_v28 = vld [vmem:[%s4485_s28 + $0x138] sm:$0xff] }
  0x3d   : > { %v445_v26 = vld [vmem:[%s4485_s28 + $0x130] sm:$0xff]  ;;  %v416_v29 = vld [vmem:[%s4485_s28 + $0x48] sm:$0xff]  ;;  %v447_v30 = vld [vmem:[%s4485_s28 + $0x140] sm:$0xff] }
  0x3e   : > { %v417_v31 = vld [vmem:[%s4485_s28 + $0x50] sm:$0xff]  ;;  %v448_v32 = vld [vmem:[%s4485_s28 + $0x148] sm:$0xff]  ;;  %v418_v33 = vld [vmem:[%s4485_s28 + $0x58] sm:$0xff] }
  0x3f   : > { %v449_v34 = vld [vmem:[%s4485_s28 + $0x150] sm:$0xff]  ;;  %v419_v35 = vld [vmem:[%s4485_s28 + $0x60] sm:$0xff]  ;;  %v450_v36 = vld [vmem:[%s4485_s28 + $0x158] sm:$0xff] }
  0x40   : > { %v420_v37 = vld [vmem:[%s4485_s28 + $0x68] sm:$0xff]  ;;  %v451_v38 = vld [vmem:[%s4485_s28 + $0x160] sm:$0xff]  ;;  %v421_v39 = vld [vmem:[%s4485_s28 + $0x70] sm:$0xff] }
  0x41   : > { %v452_v40 = vld [vmem:[%s4485_s28 + $0x168] sm:$0xff]  ;;  %v422_v41 = vld [vmem:[%s4485_s28 + $0x78] sm:$0xff]  ;;  %v453_v42 = vld [vmem:[%s4485_s28 + $0x170] sm:$0xff] }
  0x42   : > { %v423_v44 = vld [vmem:[%s4485_s28 + $0x80] sm:$0xff]  ;;  %v454_v46 = vld [vmem:[%s4485_s28 + $0x178] sm:$0xff]  ;;  %v424_v51 = vld [vmem:[%s4485_s28 + $0x88] sm:$0xff] }
  0x43   : > { %3678 = vmatmul.msk.f32.gmra.mxu0 %vm469_vm0, %v408_v7  ;;  %v4590_v47 = vld [vmem:[%s7462_s2] ss:$0 sm:$0xff]  ;;  %v456_v61 = vld [vmem:[%s4485_s28 + $0x188] sm:$0xff]  ;;  %v426_v5 = vld [vmem:[%s4485_s28 + $0x98] sm:$0xff]  ;;  %v1135_v7 = vlaneseq }
  0x44   : > { %3702 = vmatmul.msk.f32.gmra.mxu1 %vm469_vm0, %v432_v8  ;;  %3709 = vmatmul.msk.f32.gmra.mxu2 %vm469_vm0, %v439_v9  ;;  %v455_v53 = vld [vmem:[%s4485_s28 + $0x180] sm:$0xff]  ;;  %v425_v59 = vld [vmem:[%s4485_s28 + $0x90] sm:$0xff] }
  0x45   : > { %v457_v6 = vld [vmem:[%s4485_s28 + $0x190] sm:$0xff] }
  0x4b   : > { %3679 = vmatmul.msk.f32.gmra.mxu0 %vm469_vm0, %v409_v10 }
  0x4c   : > { %3703 = vmatmul.msk.f32.gmra.mxu1 %vm469_vm0, %v433_v11  ;;  %3710 = vmatmul.msk.f32.gmra.mxu2 %vm469_vm0, %v440_v12 }
  0x53   : > { %3680 = vmatmul.msk.f32.gmra.mxu0 %vm469_vm0, %v410_v13  ;;  %v4614_v13 = vshrl.u32 %v1135_v7, 7 }
  0x54   : > { %3704 = vmatmul.msk.f32.gmra.mxu1 %vm469_vm0, %v434_v14  ;;  %3711 = vmatmul.msk.f32.gmra.mxu2 %vm469_vm0, %v441_v15 }
  0x55   : > { %7569 = vst [vmem:[#allocation14_spill] sm:$0xff] %v4614_v13  ;;  %vm1139_vm4 = vcmp.ge.s32.totalorder %v4614_v13, 1 }
  0x5b   : > { %3681 = vmatmul.msk.f32.gmra.mxu0 %vm469_vm0, %v411_v16 }
  0x5c   : > { %3705 = vmatmul.msk.f32.gmra.mxu1 %vm469_vm0, %v435_v17  ;;  %3712 = vmatmul.msk.f32.gmra.mxu2 %vm469_vm0, %v442_v18  ;;  %v4624_v18 = vld [vmem:[%s7463_s3 + $0x1] ss:$0 sm:$0xff] }
  0x63   : > { %3682 = vmatmul.msk.f32.gmra.mxu0 %vm469_vm0, %v412_v19  ;;  %v427_v19 = vld [vmem:[%s4485_s28 + $0xa0] sm:$0xff] }
  0x64   : > { %3706 = vmatmul.msk.f32.gmra.mxu1 %vm469_vm0, %v436_v20  ;;  %3713 = vmatmul.msk.f32.gmra.mxu2 %vm469_vm0, %v443_v21  ;;  %v4630_v20 = vld [vmem:[%s7463_s3 + $0x2] ss:$0 sm:$0xff]  ;;  %v4635_v21 = vld [vmem:[%s7463_s3 + $0x5] ss:$0 sm:$0xff] }
  0x6b   : > { %3683 = vmatmul.msk.f32.gmra.mxu0 %vm469_vm0, %v413_v22  ;;  %v4638_v22 = vadd.s32 16, %v4614_v13 }
  0x6c   : > { %3707 = vmatmul.msk.f32.gmra.mxu1 %vm469_vm0, %v437_v23  ;;  %3714 = vmatmul.msk.f32.gmra.mxu2 %vm469_vm0, %v444_v24  ;;  %v4643_v23 = vld [vmem:[%s7463_s3 + $0x6] ss:$0 sm:$0xff]  ;;  %v4648_v24 = vld [vmem:[%s7463_s3 + $0x9] ss:$0 sm:$0xff] }
  0x6d   : > { %7570 = vst [vmem:[#allocation15_spill] sm:$0xff] %v4638_v22  ;;  %vm1150_vm1 = vcmp.lt.s32.totalorder %v4638_v22, 17 }
  0x6e   : > { %7571 = vst [vmem:[#allocation16_spill] sm:$0xff] %v4648_v24 }
  0x73   : > { %3684 = vmatmul.msk.f32.gmra.mxu0 %vm469_vm0, %v414_v25  ;;  %v4653_v25 = vld [vmem:[%s7463_s3 + $0xa] ss:$0 sm:$0xff] }
  0x74   : > { %3715 = vmatmul.msk.f32.gmra.mxu2 %vm469_vm0, %v445_v26 }
  0x7b   : > { %3685 = vmatmul.msk.f32.gmra.mxu0 %vm469_vm0, %v415_v27 }
  0x7c   : > { %3716 = vmatmul.msk.f32.gmra.mxu2 %vm469_vm0, %v446_v28 }
  0x83   : > { %3686 = vmatmul.msk.f32.gmra.mxu0 %vm469_vm0, %v416_v29 }
  0x84   : > { %3717 = vmatmul.msk.f32.gmra.mxu2 %vm469_vm0, %v447_v30 }
  0x8b   : > { %3687 = vmatmul.msk.f32.gmra.mxu0 %vm469_vm0, %v417_v31 }
  0x8c   : > { %3718 = vmatmul.msk.f32.gmra.mxu2 %vm469_vm0, %v448_v32 }
  0x93   : > { %3688 = vmatmul.msk.f32.gmra.mxu0 %vm469_vm0, %v418_v33 }
  0x94   : > { %3719 = vmatmul.msk.f32.gmra.mxu2 %vm469_vm0, %v449_v34  ;;  %v4676_v34 = vld [vmem:[%s7463_s3] ss:$0 sm:$0xff] }
  0x9b   : > { %3689 = vmatmul.msk.f32.gmra.mxu0 %vm469_vm0, %v419_v35 }
  0x9c   : > { %3720 = vmatmul.msk.f32.gmra.mxu2 %vm469_vm0, %v450_v36 }
  0xa3   : > { %3690 = vmatmul.msk.f32.gmra.mxu0 %vm469_vm0, %v420_v37 }
  0xa4   : > { %3721 = vmatmul.msk.f32.gmra.mxu2 %vm469_vm0, %v451_v38 }
  0xab   : > { %3691 = vmatmul.msk.f32.gmra.mxu0 %vm469_vm0, %v421_v39 }
  0xac   : > { %3722 = vmatmul.msk.f32.gmra.mxu2 %vm469_vm0, %v452_v40 }
  0xb3   : > { %3692 = vmatmul.msk.f32.gmra.mxu0 %vm469_vm0, %v422_v41 }
  0xb4   : > { %3723 = vmatmul.msk.f32.gmra.mxu2 %vm469_vm0, %v453_v42 }
  0xb8   : > { %v649_v43 = vpop.f32.mrf.mxu0 }
  0xb9   : > { %v4582_v45 = vpop.f32.mrf.mxu1 }
  0xbb   : > { %3693 = vmatmul.msk.f32.gmra.mxu0 %vm469_vm0, %v423_v44 }
  0xbc   : > { %3724 = vmatmul.msk.f32.gmra.mxu2 %vm469_vm0, %v454_v46 }
  0xbf   : > { %v742_v48 = vpop.f32.mrf.mxu2 }
  0xc0   : > { %v743_v49 = vadd.f32 %v4590_v47, %v742_v48  ;;  %v652_v50 = vpop.f32.mrf.mxu0 }
  0xc1   : > { %v724_v52 = vpop.f32.mrf.mxu1 }
  0xc2   : > { %v842_v54 = vsub.f32 0.0, %v743_v49  ;;  %v4607_v4 = vadd.f32 %v4590_v47, %v724_v52 }
  0xc3   : > { %3694 = vmatmul.msk.f32.gmra.mxu0 %vm469_vm0, %v424_v51 }
  0xc4   : > { %v927_v55 = vmul.f32 1.442695, %v842_v54  ;;  %3725 = vmatmul.msk.f32.gmra.mxu2 %vm469_vm0, %v455_v53  ;;  %v836_v9 = vsub.f32 0.0, %v4607_v4 }
  0xc6   : > { %3836 = vpow2.f32 %v927_v55  ;;  %v915_v16 = vmul.f32 1.442695, %v836_v9 }
  0xc7   : > { %v745_v56 = vpop.f32.mrf.mxu2 }
  0xc8   : > { %v746_v57 = vadd.f32 %v4590_v47, %v745_v56  ;;  %v655_v58 = vpop.f32.mrf.mxu0 }
  0xc9   : > { %v727_v60 = vpop.f32.mrf.mxu1 }
  0xca   : > { %v843_v62 = vsub.f32 0.0, %v746_v57  ;;  %v4601_v63 = vadd.f32 %v4590_v47, %v727_v60 }
  0xcb   : > { %3695 = vmatmul.msk.f32.gmra.mxu0 %vm469_vm0, %v425_v59 }
  0xcc   : > { %v3837_v0 = vpop.eup %3836  ;;  %v929_v1 = vmul.f32 1.442695, %v843_v62  ;;  %3726 = vmatmul.msk.f32.gmra.mxu2 %vm469_vm0, %v456_v61  ;;  %v837_v3 = vsub.f32 0.0, %v4601_v63 }
  0xcd   : > { %v1004_v2 = vadd.f32 1.0, %v3837_v0 }
  0xce   : > { %3838 = vpow2.f32 %v929_v1  ;;  %v917_v8 = vmul.f32 1.442695, %v837_v3 }
  0xcf   : > { %3840 = vrcp.f32 %v1004_v2  ;;  %v748_v14 = vpop.f32.mrf.mxu2 }
  0xd0   : > { %3842 = vpow2.f32 %v917_v8  ;;  %v4619_v17 = vadd.f32 %v4590_v47, %v748_v14  ;;  %v658_v28 = vpop.f32.mrf.mxu0 }
  0xd1   : > { %v4688_v38 = vadd.f32 %v4590_v47, %v658_v28  ;;  %v4693_v43 = vpop.f32.mrf.mxu1 }
  0xd2   : > { %v844_v27 = vsub.f32 0.0, %v4619_v17 }
  0xd3   : > { %3696 = vmatmul.msk.f32.gmra.mxu0 %vm469_vm0, %v426_v5  ;;  %v814_v3 = vsub.f32 0.0, %v4688_v38 }
  0xd4   : > { %v3839_v10 = vpop.eup %3838  ;;  %3727 = vmatmul.msk.f32.gmra.mxu2 %vm469_vm0, %v457_v6  ;;  %v931_v42 = vmul.f32 1.442695, %v844_v27 }
  0xd5   : > { %v3841_v11 = vpop.eup %3840  ;;  %v1005_v12 = vadd.f32 1.0, %v3839_v10 }
  0xd6   : > { %v4616_v15 = vmul.f32 %v3841_v11, %v743_v49  ;;  %v3843_v29 = vpop.eup %3842 }
  0xd7   : > { %3844 = vrcp.f32 %v1005_v12  ;;  %v999_v41 = vadd.f32 1.0, %v3843_v29  ;;  %v751_v9 = vpop.f32.mrf.mxu2 }
  0xd8   : > { %3846 = vpow2.f32 %v915_v16  ;;  %v4657_v26 = vmul.f32 %v4624_v18, %v4616_v15  ;;  %v4663_v30 = vmul.f32 %v4630_v20, %v4616_v15  ;;  %v4667_v31 = vmul.f32 %v4635_v21, %v4616_v15  ;;  %v661_v16 = vpop.f32.mrf.mxu0 }
  0xd9   : > { %v4671_v32 = vmul.f32 %v4643_v23, %v4616_v15  ;;  %v4681_v36 = vmul.f32 %v4648_v24, %v4616_v15  ;;  %v4685_v37 = vmul.f32 %v4653_v25, %v4616_v15  ;;  %v1234_v39 = vmul.f32 %v4676_v34, %v4616_v15  ;;  %v733_v27 = vpop.f32.mrf.mxu1 }
  0xda   : > { %7572 = vst [vmem:[#allocation17_spill] sm:$0xff] %v4657_v26  ;;  %v7485_v40 = vrot.slane %v4657_v26, 1  ;;  %v7484_v46 = vrot.slane %v4663_v30, 2  ;;  %v7483_v48 = vrot.slane %v4667_v31, 1  ;;  %3848 = vpow2.f32 %v931_v42 }
  0xdb   : > { %3697 = vmatmul.msk.f32.gmra.mxu0 %vm469_vm0, %v427_v19  ;;  %7573 = vst [vmem:[#allocation18_spill] sm:$0xff] %v4663_v30  ;;  %v7482_v49 = vrot.slane %v4671_v32, 2  ;;  %v7480_v56 = vrot.slane %v4681_v36, 1  ;;  %v7479_v58 = vrot.slane %v4685_v37, 2  ;;  %3850 = vrcp.f32 %v999_v41 }
  0xdc   : > { %7574 = vst [vmem:[#allocation19_spill] sm:$0xff] %v4667_v31  ;;  %v871_v19 = vmul.f32 1.442695, %v814_v3 }
  0xdd   : > { %7575 = vst [vmem:[#allocation20_spill] sm:$0xff] %v4671_v32  ;;  %v3845_v33 = vpop.eup %3844 }
  0xde   : > { %v1113_v35 = vmul.f32 %v3845_v33, %v746_v57  ;;  %7576 = vst [vmem:[#allocation21_spill] sm:$0xff] %v4681_v36  ;;  %v3847_v50 = vpop.eup %3846  ;;  %v428_v33 = vld [vmem:[%s4485_s28 + $0xa8] sm:$0xff] }
  0xdf   : > { %7577 = vst [vmem:[#allocation22_spill] sm:$0xff] %v4685_v37  ;;  %v998_v0 = vadd.f32 1.0, %v3847_v50  ;;  %v754_v50 = vpop.f32.mrf.mxu2 }
  0xe0   : > { %v1189_v44 = vsel %vm1150_vm1, %v1113_v35, 0.0  ;;  %v3849_v28 = vpop.eup %3848 }
  0xe1   : > { %v1311_v51 = vmul.f32 %v4624_v18, %v1189_v44  ;;  %v1554_v52 = vmul.f32 %v4630_v20, %v1189_v44  ;;  %v1861_v53 = vmul.f32 %v4635_v21, %v1189_v44  ;;  %v2103_v54 = vmul.f32 %v4643_v23, %v1189_v44  ;;  %v3851_v29 = vpop.eup %3850 }
  0xe2   : > { %v2409_v55 = vmul.f32 %v4648_v24, %v1189_v44  ;;  %v2651_v57 = vmul.f32 %v4653_v25, %v1189_v44  ;;  %3852 = vrcp.f32 %v998_v0  ;;  %v1006_v35 = vadd.f32 1.0, %v3849_v28 }
  0xe3   : > { %v1429_v59 = vrot.slane %v1311_v51, 1  ;;  %v1672_v60 = vrot.slane %v1554_v52, 2  ;;  %v1976_v61 = vrot.slane %v1861_v53, 1  ;;  %v2218_v62 = vrot.slane %v2103_v54, 2  ;;  %3698 = vmatmul.msk.f32.gmra.mxu0 %vm469_vm0, %v428_v33 }
  0xe4   : > { %v2522_v1 = vrot.slane %v2409_v55, 1  ;;  %v2764_v2 = vrot.slane %v2651_v57, 2  ;;  %3854 = vpow2.f32 %v871_v19  ;;  %v4742_v44 = vadd.f32 %v4590_v47, %v661_v16  ;;  %v664_v55 = vpop.f32.mrf.mxu0 }
  0xe5   : > { %v1430_v5 = vsel %vm1375_vm2, %v7485_v40, %v1429_v59  ;;  %v1673_v6 = vsel %vm1618_vm3, %v7484_v46, %v1672_v60  ;;  %v4718_v7 = vsel %vm1375_vm2, %v7483_v48, %v1976_v61  ;;  %v4723_v8 = vsel %vm1618_vm3, %v7482_v49, %v2218_v62 }
  0xe6   : > { %v1509_v10 = vadd.f32 %v1430_v5, %v1234_v39  ;;  %v4728_v11 = vsel %vm1375_vm2, %v7480_v56, %v2522_v1  ;;  %v4733_v12 = vsel %vm1618_vm3, %v7479_v58, %v2764_v2  ;;  %v4739_v39 = vadd.f32 %v4590_v47, %v751_v9 }
  0xe7   : > { %v1107_v42 = vmul.f32 %v3851_v29, %v4601_v63  ;;  %v4747_v51 = vadd.f32 %v4590_v47, %v754_v50  ;;  %v815_v53 = vsub.f32 0.0, %v4742_v44  ;;  %v4752_v54 = vadd.f32 %v4590_v47, %v733_v27  ;;  %v736_v63 = vpop.f32.mrf.mxu1 }
  0xe8   : > { %v4735_v14 = vadd.f32 %v1673_v6, %v1509_v10  ;;  %v3853_v41 = vpop.eup %3852  ;;  %v845_v52 = vsub.f32 0.0, %v4739_v39  ;;  %3856 = vrcp.f32 %v1006_v35  ;;  %v4764_v3 = vadd.f32 %v4590_v47, %v664_v55 }
  0xe9   : > { %v4755_v59 = vmul.f32 %v3853_v41, %v4607_v4  ;;  %v846_v61 = vsub.f32 0.0, %v4747_v51  ;;  %v4760_v62 = vsel %vm1150_vm1, %v1107_v42, 0.0  ;;  %v873_v1 = vmul.f32 1.442695, %v815_v53 }
  0xea   : > { %v3855_v57 = vpop.eup %3854  ;;  %v933_v60 = vmul.f32 1.442695, %v845_v52  ;;  %7579 = vst [vmem:[#allocation24_spill] sm:$0xff] %v4760_v62  ;;  %v839_v2 = vsub.f32 0.0, %v4752_v54  ;;  %v4767_v4 = vadd.f32 %v4590_v47, %v736_v63  ;;  %v1305_v9 = vmul.f32 %v4624_v18, %v4760_v62 }
  0xeb   : > { %7578 = vst [vmem:[#allocation23_spill] sm:$0xff] %v4755_v59  ;;  %v976_v0 = vadd.f32 1.0, %v3855_v57  ;;  %v4771_v5 = vmul.f32 %v4624_v18, %v4755_v59  ;;  %v935_v6 = vmul.f32 1.442695, %v846_v61  ;;  %v816_v19 = vsub.f32 0.0, %v4764_v3 }
  0xec   : > { %3858 = vpow2.f32 %v933_v60  ;;  %v921_v16 = vmul.f32 1.442695, %v839_v2  ;;  %v1279_v27 = vmul.f32 0.0, %v4624_v18  ;;  %v840_v28 = vsub.f32 0.0, %v4767_v4 }
  0xed   : > { %7580 = vst [vmem:[#allocation25_spill] sm:$0xff] %v4771_v5  ;;  %3860 = vrcp.f32 %v976_v0  ;;  %v7481_v33 = vrot.slane %v4771_v5, 1  ;;  %v4781_v35 = vmul.f32 %v4630_v20, %v4755_v59  ;;  %v1419_v50 = vrot.slane %v1305_v9, 1 }
  0xee   : > { %v3857_v10 = vpop.eup %3856  ;;  %3862 = vpow2.f32 %v873_v1  ;;  %v1548_v41 = vmul.f32 %v4630_v20, %v4760_v62  ;;  %v1522_v53 = vmul.f32 0.0, %v4630_v20  ;;  %v4789_v55 = vadd.f32 %v4590_v47, %v4693_v43 }
  0xef   : > { %7581 = vst [vmem:[#allocation26_spill] sm:$0xff] %v4781_v35  ;;  %3864 = vpow2.f32 %v935_v6  ;;  %v1114_v42 = vmul.f32 %v3857_v10, %v4619_v17  ;;  %v875_v57 = vmul.f32 1.442695, %v816_v19  ;;  %v1213_v61 = vmul.f32 0.0, %v4676_v34 }
  0xf0   : > { %7582 = vst [vmem:[#allocation27_spill] sm:$0xff] %v4789_v55  ;;  %3866 = vpow2.f32 %v921_v16  ;;  %v1376_v63 = vrot.slane %v1279_v27, 1  ;;  %v923_v0 = vmul.f32 1.442695, %v840_v28  ;;  %v1230_v17 = vmul.f32 %v4676_v34, %v4755_v59 }
  0xf1   : > { %v7486_v2 = vrot.slane %v4781_v35, 2  ;;  %v1662_v6 = vrot.slane %v1548_v41, 2  ;;  %v4798_v43 = vsel %vm1139_vm4, %v1114_v42, 0.0  ;;  %v1420_v16 = vsel %vm1375_vm2, %v7481_v33, %v1419_v50 }
  0xf2   : > { %v3859_v29 = vpop.eup %3858  ;;  %7583 = vst [vmem:[#allocation28_spill] sm:$0xff] %v4798_v43  ;;  %v1619_v19 = vrot.slane %v1522_v53, 2  ;;  %v838_v27 = vsub.f32 0.0, %v4789_v55  ;;  %v1312_v28 = vmul.f32 %v4624_v18, %v4798_v43  ;;  %v1488_v41 = vadd.f32 %v1376_v63, %v1213_v61  ;;  %v4824_v61 = vld [vmem:[%s7463_s3 + $0x4] ss:$0 sm:$0xff] }
  0xf3   : > { %v1007_v52 = vadd.f32 1.0, %v3859_v29  ;;  %v3861_v60 = vpop.eup %3860  ;;  %v1555_v42 = vmul.f32 %v4630_v20, %v4798_v43  ;;  %v2104_v53 = vmul.f32 %v4643_v23, %v4798_v43  ;;  %v4826_v63 = vadd.f32 %v1420_v16, %v1230_v17 }
  0xf4   : > { %v3863_v1 = vpop.eup %3862  ;;  %v1084_v29 = vmul.f32 %v3861_v60, %v4688_v38  ;;  %v4819_v38 = vmul.f32 %v4653_v25, %v4798_v43  ;;  %v4837_v58 = vadd.f32 %v1619_v19, %v1488_v41  ;;  %v1235_v49 = vmul.f32 %v4676_v34, %v4798_v43 }
  0xf5   : > { %3868 = vrcp.f32 %v1007_v52  ;;  %v977_v9 = vadd.f32 1.0, %v3863_v1  ;;  %v3865_v10 = vpop.eup %3864  ;;  %v1862_v1 = vmul.f32 %v4635_v21, %v4798_v43  ;;  %v1431_v17 = vrot.slane %v1312_v28, 1 }
  0xf6   : > { %3870 = vpow2.f32 %v875_v57  ;;  %v3867_v52 = vpop.eup %3866  ;;  %v1008_v50 = vadd.f32 1.0, %v3865_v10  ;;  %v4815_v57 = vmul.f32 %v4648_v24, %v4798_v43  ;;  %v1160_v10 = vsel %vm1139_vm4, %v1084_v29, 0.0 }
  0xf7   : > { %3872 = vpow2.f32 %v923_v0  ;;  %v4831_v0 = vsel %vm1618_vm3, %v7486_v2, %v1662_v6  ;;  %v1001_v56 = vadd.f32 1.0, %v3867_v52  ;;  %v1674_v16 = vrot.slane %v1555_v42, 2 }
  0xf8   : > { %3874 = vrcp.f32 %v977_v9  ;;  %v4833_v9 = vmul.f32 1.442695, %v838_v27  ;;  %v1978_v48 = vrot.slane %v1862_v1, 1  ;;  %v2220_v40 = vrot.slane %v2104_v53, 2 }
  0xf9   : > { %3876 = vrcp.f32 %v1008_v50  ;;  %v2524_v6 = vrot.slane %v4815_v57, 1  ;;  %v2766_v27 = vrot.slane %v4819_v38, 2  ;;  %v4847_v29 = vmul.f32 %v4676_v34, %v1160_v10 }
  0xfa   : > { %v4850_v41 = vmul.f32 %v4624_v18, %v1160_v10  ;;  %v4853_v28 = vmul.f32 %v4630_v20, %v1160_v10  ;;  %v4856_v52 = vmul.f32 %v4824_v61, %v1160_v10  ;;  %v4859_v42 = vmul.f32 %v4635_v21, %v1160_v10 }
  0xfb   : > { %v3869_v60 = vpop.eup %3868  ;;  %v4862_v1 = vmul.f32 %v4643_v23, %v1160_v10  ;;  %3878 = vrcp.f32 %v1001_v56 }
  0xfc   : > { %v3871_v33 = vpop.eup %3870  ;;  %v4844_v2 = vmul.f32 %v3869_v60, %v4739_v39 }
  0xfd   : > { %v3873_v46 = vpop.eup %3872  ;;  %v978_v39 = vadd.f32 1.0, %v3871_v33 }
  0xfe   : > { %v3875_v19 = vpop.eup %3874  ;;  %v1313_v53 = vmul.f32 %v4624_v18, %v4844_v2  ;;  %v1556_v57 = vmul.f32 %v4630_v20, %v4844_v2  ;;  %v1002_v38 = vadd.f32 1.0, %v3873_v46  ;;  %v1236_v62 = vmul.f32 %v4676_v34, %v4844_v2 }
  0xff   : > { %v4865_v50 = vmul.f32 %v3875_v19, %v4742_v44  ;;  %v3877_v60 = vpop.eup %3876  ;;  %v1787_v10 = vmul.f32 %v4824_v61, %v4844_v2  ;;  %v1863_v56 = vmul.f32 %v4635_v21, %v4844_v2  ;;  %v2105_v44 = vmul.f32 %v4643_v23, %v4844_v2 }
 0x100   : > { %v1116_v33 = vmul.f32 %v3877_v60, %v4747_v51  ;;  %v1432_v19 = vrot.slane %v1313_v53, 1  ;;  %v1675_v59 = vrot.slane %v1556_v57, 2  ;;  %v2411_v46 = vmul.f32 %v4648_v24, %v4844_v2 }
 0x101   : > { %v1819_v37 = vadd.f32 %v1787_v10, %v4735_v14  ;;  %v1979_v36 = vrot.slane %v1863_v56, 1  ;;  %v2221_v35 = vrot.slane %v2105_v44, 2  ;;  %v2653_v5 = vmul.f32 %v4653_v25, %v4844_v2  ;;  %v3879_v53 = vpop.eup %3878 }
 0x102   : > { %v1192_v32 = vsel %vm1150_vm1, %v1116_v33, 0.0  ;;  %v1433_v31 = vsel %vm1375_vm2, %v1431_v17, %v1432_v19  ;;  %v1676_v30 = vsel %vm1618_vm3, %v1674_v16, %v1675_v59  ;;  %v2525_v51 = vrot.slane %v2411_v46, 1 }
 0x103   : > { %v1314_v57 = vmul.f32 %v4624_v18, %v1192_v32  ;;  %v1510_v60 = vadd.f32 %v1433_v31, %v1235_v49  ;;  %v1557_v26 = vmul.f32 %v4630_v20, %v1192_v32  ;;  %v1864_v14 = vmul.f32 %v4635_v21, %v1192_v32 }
 0x104   : > { %v4893_v10 = vsel %vm1375_vm2, %v1978_v48, %v1979_v36  ;;  %v2106_v56 = vmul.f32 %v4643_v23, %v1192_v32  ;;  %v4897_v44 = vsel %vm1618_vm3, %v2220_v40, %v2221_v35  ;;  %v2412_v17 = vmul.f32 %v4648_v24, %v1192_v32 }
 0x105   : > { %7584 = vst [vmem:[#allocation29_spill] sm:$0xff] %v4893_v10  ;;  %v1434_v16 = vrot.slane %v1314_v57, 1  ;;  %v1677_v33 = vrot.slane %v1557_v26, 2  ;;  %v4900_v46 = vadd.f32 %v1676_v30, %v1510_v60  ;;  %v1981_v43 = vrot.slane %v1864_v14, 1 }
 0x106   : > { %7585 = vst [vmem:[#allocation30_spill] sm:$0xff] %v4897_v44  ;;  %v2223_v31 = vrot.slane %v2106_v56, 2  ;;  %v4903_v49 = vsel %vm1375_vm2, %v2524_v6, %v2525_v51  ;;  %v2527_v13 = vrot.slane %v2412_v17, 1  ;;  %v2654_v48 = vmul.f32 %v4653_v25, %v1192_v32  ;;  %v757_v56 = vpop.f32.mrf.mxu2 }
 0x107   : > { %v1435_v10 = vsel %vm1375_vm2, %v1432_v19, %v1434_v16  ;;  %v1678_v55 = vsel %vm1618_vm3, %v1675_v59, %v1677_v33  ;;  %v1982_v40 = vsel %vm1375_vm2, %v1979_v36, %v1981_v43  ;;  %v2767_v44 = vrot.slane %v2653_v5, 2 }
 0x108   : > { %v1511_v24 = vadd.f32 %v1435_v10, %v1236_v62  ;;  %v2061_v57 = vadd.f32 %v1982_v40, %v1819_v37  ;;  %v2224_v26 = vsel %vm1618_vm3, %v2221_v35, %v2223_v31  ;;  %v4911_v30 = vsel %vm1375_vm2, %v2525_v51, %v2527_v13 }
 0x109   : > { %v1381_v6 = vrot.slane %v4850_v41, 1  ;;  %v4915_v60 = vsel %vm1618_vm3, %v2766_v27, %v2767_v44  ;;  %v2769_v32 = vrot.slane %v2654_v48, 2  ;;  %3880 = vrcp.f32 %v978_v39  ;;  %v429_v27 = vld [vmem:[%s4485_s28 + $0xb0] sm:$0xff] }
 0x10a   : > { %v4917_v19 = vadd.f32 %v1678_v55, %v1511_v24  ;;  %v4919_v59 = vadd.f32 %v2224_v26, %v2061_v57  ;;  %v1283_v36 = vmul.f32 %v4624_v18, %v4865_v50  ;;  %v1526_v37 = vmul.f32 %v4630_v20, %v4865_v50  ;;  %3699 = vmatmul.msk.f32.gmra.mxu0 %vm469_vm0, %v429_v27 }
 0x10b   : > { %v1624_v13 = vrot.slane %v4853_v28, 2  ;;  %v4927_v62 = vsel %vm1618_vm3, %v2767_v44, %v2769_v32  ;;  %v1833_v5 = vmul.f32 %v4635_v21, %v4865_v50  ;;  %v2075_v24 = vmul.f32 %v4643_v23, %v4865_v50 }
 0x10c   : > { %v1928_v35 = vrot.slane %v4859_v42, 1  ;;  %v1382_v55 = vrot.slane %v1283_v36, 1  ;;  %v1625_v43 = vrot.slane %v1526_v37, 2  ;;  %3882 = vrcp.f32 %v1002_v38 }
 0x10d   : > { %v2170_v41 = vrot.slane %v4862_v1, 2  ;;  %v4937_v39 = vmul.f32 %v3879_v53, %v4752_v54  ;;  %v1929_v28 = vrot.slane %v1833_v5, 1  ;;  %v2171_v51 = vrot.slane %v2075_v24, 2  ;;  %v430_v5 = vld [vmem:[%s4485_s28 + $0xb8] sm:$0xff] }
 0x10e   : > { %v1798_v14 = vadd.f32 %v4856_v52, %v4837_v58  ;;  %v1383_v10 = vsel %vm1375_vm2, %v1381_v6, %v1382_v55  ;;  %v1626_v42 = vsel %vm1618_vm3, %v1624_v13, %v1625_v43  ;;  %v1748_v38 = vadd.f32 %v4831_v0, %v4826_v63 }
 0x10f   : > { %7586 = vst [vmem:[#allocation31_spill] sm:$0xff] %v4937_v39  ;;  %v3881_v44 = vpop.eup %3880  ;;  %v1490_v1 = vadd.f32 %v1383_v10, %v4847_v29  ;;  %v1930_v54 = vsel %vm1375_vm2, %v1928_v35, %v1929_v28  ;;  %v2172_v53 = vsel %vm1618_vm3, %v2170_v41, %v2171_v51  ;;  %3884 = vpow2.f32 %v4833_v9 }
 0x110   : > { %v1086_v17 = vmul.f32 %v3881_v44, %v4764_v3  ;;  %v1767_v52 = vmul.f32 %v4824_v61, %v4865_v50  ;;  %v2040_v16 = vadd.f32 %v1930_v54, %v1798_v14  ;;  %v1216_v33 = vmul.f32 %v4676_v34, %v4865_v50 }
 0x111   : > { %v4955_v31 = vadd.f32 %v1626_v42, %v1490_v1  ;;  %v1232_v63 = vmul.f32 %v4676_v34, %v4937_v39  ;;  %v4961_v0 = vmul.f32 %v4624_v18, %v4937_v39  ;;  %v4969_v48 = vmul.f32 %v4630_v20, %v4937_v39 }
 0x112   : > { %v3883_v9 = vpop.eup %3882  ;;  %v1162_v3 = vsel %vm1150_vm1, %v1086_v17, 0.0  ;;  %v4965_v29 = vadd.f32 %v2172_v53, %v2040_v16  ;;  %v1783_v50 = vmul.f32 %v4824_v61, %v4937_v39  ;;  %v1799_v32 = vadd.f32 %v1767_v52, %v4837_v58  ;;  %3700 = vmatmul.msk.f32.gmra.mxu0 %vm469_vm0, %v430_v5 }
 0x113   : > { %v1284_v40 = vmul.f32 %v4624_v18, %v1162_v3  ;;  %v1527_v57 = vmul.f32 %v4630_v20, %v1162_v3  ;;  %v1834_v26 = vmul.f32 %v4635_v21, %v1162_v3  ;;  %v2076_v6 = vmul.f32 %v4643_v23, %v1162_v3  ;;  %v667_v3 = vpop.f32.mrf.mxu0 }
 0x114   : > { %v1110_v36 = vmul.f32 %v3883_v9, %v4767_v4  ;;  %v4981_v37 = vmul.f32 %v4635_v21, %v4937_v39  ;;  %v4985_v13 = vmul.f32 %v4643_v23, %v4937_v39  ;;  %v1422_v4 = vrot.slane %v4961_v0, 1 }
 0x115   : > { %v1384_v24 = vrot.slane %v1284_v40, 1  ;;  %v1627_v35 = vrot.slane %v1527_v57, 2  ;;  %v1931_v27 = vrot.slane %v1834_v26, 1  ;;  %v2173_v41 = vrot.slane %v2076_v6, 2  ;;  %v3885_v14 = vpop.eup %3884  ;;  %v760_v40 = vpop.f32.mrf.mxu2 }
 0x116   : > { %v4991_v58 = vsel %vm1150_vm1, %v1110_v36, 0.0  ;;  %v1665_v10 = vrot.slane %v4969_v48, 2  ;;  %v1815_v42 = vadd.f32 %v1783_v50, %v1748_v38  ;;  %v5019_v36 = vadd.f32 %v4590_v47, %v757_v56 }
 0x117   : > { %7587 = vst [vmem:[#allocation32_spill] sm:$0xff] %v4991_v58  ;;  %v1385_v44 = vsel %vm1375_vm2, %v1382_v55, %v1384_v24  ;;  %v1628_v1 = vsel %vm1618_vm3, %v1625_v43, %v1627_v35  ;;  %v1932_v54 = vsel %vm1375_vm2, %v1929_v28, %v1931_v27  ;;  %v2174_v53 = vsel %vm1618_vm3, %v2171_v51, %v2173_v41  ;;  %v5012_v51 = vld [vmem:[%s7463_s3 + $0x8] ss:$0 sm:$0xff] }
 0x118   : > { %v1491_v17 = vadd.f32 %v1385_v44, %v1216_v33  ;;  %v2041_v52 = vadd.f32 %v1932_v54, %v1799_v32  ;;  %v1308_v16 = vmul.f32 %v4624_v18, %v4991_v58  ;;  %v1551_v9 = vmul.f32 %v4630_v20, %v4991_v58 }
 0x119   : > { %v1858_v38 = vmul.f32 %v4635_v21, %v4991_v58  ;;  %v7507_v55 = vrot.slane %v4981_v37, 1  ;;  %v2100_v43 = vmul.f32 %v4643_v23, %v4991_v58  ;;  %v7506_v28 = vrot.slane %v4985_v13, 2 }
 0x11a   : > { %v5014_v33 = vadd.f32 %v1628_v1, %v1491_v17  ;;  %v5016_v50 = vadd.f32 %v2174_v53, %v2041_v52  ;;  %v1424_v57 = vrot.slane %v1308_v16, 1  ;;  %v1667_v26 = vrot.slane %v1551_v9, 2  ;;  %v739_v52 = vpop.f32.mrf.mxu1 }
 0x11b   : > { %v1971_v6 = vrot.slane %v1858_v38, 1  ;;  %v2213_v32 = vrot.slane %v2100_v43, 2  ;;  %v5022_v5 = vadd.f32 %v4590_v47, %v667_v3  ;;  %v1000_v24 = vadd.f32 1.0, %v3885_v14 }
 0x11c   : > { %v1425_v35 = vsel %vm1375_vm2, %v1422_v4, %v1424_v57  ;;  %v1668_v27 = vsel %vm1618_vm3, %v1665_v10, %v1667_v26  ;;  %v1785_v44 = vmul.f32 %v4824_v61, %v4616_v15  ;;  %v2334_v54 = vmul.f32 %v5012_v51, %v4616_v15 }
 0x11d   : > { %v1507_v41 = vadd.f32 %v1425_v35, %v1232_v63  ;;  %v1972_v56 = vsel %vm1375_vm2, %v7507_v55, %v1971_v6  ;;  %v2214_v14 = vsel %vm1618_vm3, %v7506_v28, %v2213_v32  ;;  %v847_v17 = vsub.f32 0.0, %v5019_v36  ;;  %v763_v26 = vpop.f32.mrf.mxu2  ;;  %v670_v35 = vpop.f32.mrf.mxu0  ;;  %v7593_v55 = vld [vmem:[#allocation17_spill] sm:$0xff] }
 0x11e   : > { %v2057_v1 = vadd.f32 %v1972_v56, %v1815_v42  ;;  %v817_v63 = vsub.f32 0.0, %v5022_v5  ;;  %3886 = vrcp.f32 %v1000_v24  ;;  %v5043_v57 = vadd.f32 %v4590_v47, %v739_v52 }
 0x11f   : > { %v1750_v53 = vadd.f32 %v1668_v27, %v1507_v41  ;;  %v937_v3 = vmul.f32 1.442695, %v847_v17  ;;  %v5046_v42 = vadd.f32 %v4590_v47, %v760_v40  ;;  %v2336_v6 = vmul.f32 %v5012_v51, %v4844_v2 }
 0x120   : > { %v2299_v16 = vadd.f32 %v2214_v14, %v2057_v1  ;;  %v877_v38 = vmul.f32 1.442695, %v817_v63  ;;  %v841_v24 = vsub.f32 0.0, %v5043_v57  ;;  %v5055_v41 = vadd.f32 %v4590_v47, %v763_v26 }
 0x121   : > { %v1817_v9 = vadd.f32 %v1785_v44, %v1750_v53  ;;  %3888 = vpow2.f32 %v937_v3  ;;  %v5062_v14 = vadd.f32 %v4590_v47, %v670_v35  ;;  %v5067_v1 = vadd.f32 %v4590_v47, %v4582_v45  ;;  %v7589_v53 = vld [vmem:[#allocation27_spill] sm:$0xff] }
 0x122   : > { %v2366_v43 = vadd.f32 %v2334_v54, %v2299_v16  ;;  %3890 = vpow2.f32 %v877_v38  ;;  %v925_v44 = vmul.f32 1.442695, %v841_v24  ;;  %v7594_v58 = vrot.slane %v7593_v55, 1 }
 0x123   : > { %v2059_v15 = vadd.f32 %v4718_v7, %v1817_v9  ;;  %v848_v7 = vsub.f32 0.0, %v5046_v42  ;;  %v818_v3 = vsub.f32 0.0, %v5062_v14 }
 0x124   : > { %v2608_v32 = vadd.f32 %v4728_v11, %v2366_v43  ;;  %v3887_v56 = vpop.eup %3886  ;;  %v849_v11 = vsub.f32 0.0, %v5055_v41  ;;  %3892 = vpow2.f32 %v925_v44  ;;  %v835_v43 = vsub.f32 0.0, %v5067_v1 }
 0x125   : > { %v2301_v27 = vadd.f32 %v4723_v8, %v2059_v15  ;;  %v1108_v17 = vmul.f32 %v3887_v56, %v7589_v53  ;;  %v939_v52 = vmul.f32 1.442695, %v848_v7  ;;  %v879_v15 = vmul.f32 1.442695, %v818_v3 }
 0x126   : > { %v5058_v40 = vadd.f32 %v4733_v12, %v2608_v32  ;;  %v941_v38 = vmul.f32 1.442695, %v849_v11  ;;  %v673_v32 = vpop.f32.mrf.mxu0 }
 0x127   : > { %v2368_v2 = vadd.f32 %v2336_v6, %v2301_v27  ;;  %v3889_v8 = vpop.eup %3888  ;;  %v913_v6 = vmul.f32 1.442695, %v835_v43  ;;  %v5084_v7 = vadd.f32 %v4590_v47, %v673_v32 }
 0x128   : > { %7588 = vst [vmem:[#allocation33_spill] sm:$0xff] %v5058_v40  ;;  %v3891_v12 = vpop.eup %3890  ;;  %v1009_v63 = vadd.f32 1.0, %v3889_v8 }
 0x129   : > { %v2610_v54 = vadd.f32 %v4911_v30, %v2368_v2  ;;  %v979_v9 = vadd.f32 1.0, %v3891_v12  ;;  %v5078_v30 = vsel %vm1139_vm4, %v1108_v17, 0.0  ;;  %v819_v47 = vsub.f32 0.0, %v5084_v7 }
 0x12a   : > { %3894 = vrcp.f32 %v1009_v63  ;;  %v3893_v26 = vpop.eup %3892  ;;  %v1549_v8 = vmul.f32 %v4630_v20, %v5078_v30  ;;  %v1231_v17 = vmul.f32 %v4676_v34, %v5078_v30 }
 0x12b   : > { %v5072_v16 = vadd.f32 %v4927_v62, %v2610_v54  ;;  %3896 = vrcp.f32 %v979_v9  ;;  %v1306_v62 = vmul.f32 %v4624_v18, %v5078_v30  ;;  %v1003_v35 = vadd.f32 1.0, %v3893_v26 }
 0x12c   : > { %3898 = vpow2.f32 %v939_v52  ;;  %v1664_v3 = vrot.slane %v1549_v8, 2 }
 0x12d   : > { %7590 = vst [vmem:[#allocation27_spill] sm:$0xff] %v5072_v16  ;;  %3900 = vpow2.f32 %v941_v38  ;;  %v1421_v11 = vrot.slane %v1306_v62, 1  ;;  %v7595_v16 = vld [vmem:[#allocation18_spill] sm:$0xff] }
 0x12e   : > { %3902 = vpow2.f32 %v879_v15  ;;  %v881_v15 = vmul.f32 1.442695, %v819_v47  ;;  %v1666_v0 = vsel %vm1618_vm3, %v1664_v3, %v1665_v10  ;;  %v7596_v40 = vrot.slane %v7595_v16, 2  ;;  %v7601_v16 = vld [vmem:[#allocation16_spill] sm:$0xff] }
 0x12f   : > { %3904 = vpow2.f32 %v913_v6 }
 0x130   : > { %v3895_v24 = vpop.eup %3894  ;;  %3906 = vrcp.f32 %v1003_v35 }
 0x131   : > { %v3897_v27 = vpop.eup %3896  ;;  %v1117_v44 = vmul.f32 %v3895_v24, %v5019_v36 }
 0x132   : > { %v3899_v56 = vpop.eup %3898  ;;  %v1087_v12 = vmul.f32 %v3897_v27, %v5022_v5  ;;  %v1423_v5 = vsel %vm1375_vm2, %v1421_v11, %v1422_v4 }
 0x133   : > { %v3901_v2 = vpop.eup %3900  ;;  %v5090_v54 = vsel %vm1139_vm4, %v1117_v44, 0.0  ;;  %v1010_v53 = vadd.f32 1.0, %v3899_v56  ;;  %v7592_v44 = vld [vmem:[#allocation28_spill] sm:$0xff] }
 0x134   : > { %v1788_v36 = vmul.f32 %v4824_v61, %v5090_v54  ;;  %v1011_v52 = vadd.f32 1.0, %v3901_v2  ;;  %v3903_v9 = vpop.eup %3902  ;;  %v5106_v38 = vsel %vm1139_vm4, %v1087_v12, 0.0  ;;  %v1786_v56 = vmul.f32 %v4824_v61, %v7592_v44 }
 0x135   : > { %v3905_v43 = vpop.eup %3904  ;;  %v1768_v26 = vmul.f32 %v4824_v61, %v5106_v38  ;;  %3908 = vrcp.f32 %v1010_v53  ;;  %v2317_v32 = vmul.f32 %v5012_v51, %v5106_v38  ;;  %v980_v62 = vadd.f32 1.0, %v3903_v9 }
 0x136   : > { %v5099_v63 = vadd.f32 %v1788_v36, %v4900_v46  ;;  %v3907_v6 = vpop.eup %3906  ;;  %v1506_v46 = vadd.f32 %v1423_v5, %v1231_v17  ;;  %3910 = vrcp.f32 %v1011_v52  ;;  %v5121_v35 = vadd.f32 1.0, %v3905_v43 }
 0x137   : > { %v5116_v4 = vadd.f32 %v1768_v26, %v4955_v31  ;;  %v5119_v24 = vadd.f32 %v2317_v32, %v4965_v29  ;;  %v1111_v27 = vmul.f32 %v3907_v6, %v5043_v57  ;;  %3912 = vpow2.f32 %v881_v15 }
 0x138   : > { %v2335_v2 = vmul.f32 %v5012_v51, %v7592_v44  ;;  %v1749_v48 = vadd.f32 %v1666_v0, %v1506_v46  ;;  %3914 = vrcp.f32 %v980_v62  ;;  %v1237_v31 = vmul.f32 %v4676_v34, %v5090_v54 }
 0x139   : > { %v1315_v29 = vmul.f32 %v4624_v18, %v5090_v54  ;;  %v1558_v11 = vmul.f32 %v4630_v20, %v5090_v54  ;;  %v5136_v57 = vsel %vm1139_vm4, %v1111_v27, 0.0  ;;  %v5140_v12 = vmul.f32 %v4635_v21, %v5090_v54 }
 0x13a   : > { %v1309_v36 = vmul.f32 %v4624_v18, %v5136_v57  ;;  %v1552_v53 = vmul.f32 %v4630_v20, %v5136_v57  ;;  %v1784_v47 = vmul.f32 %v4824_v61, %v5136_v57  ;;  %v5150_v17 = vmul.f32 %v4643_v23, %v5090_v54 }
 0x13b   : > { %v3909_v10 = vpop.eup %3908  ;;  %v1233_v52 = vmul.f32 %v4676_v34, %v5136_v57  ;;  %v1859_v9 = vmul.f32 %v4635_v21, %v5136_v57  ;;  %v2101_v3 = vmul.f32 %v4643_v23, %v5136_v57  ;;  %v5160_v5 = vmul.f32 %v5012_v51, %v5090_v54 }
 0x13c   : > { %v3911_v8 = vpop.eup %3910  ;;  %v1426_v43 = vrot.slane %v1309_v36, 1  ;;  %v1669_v26 = vrot.slane %v1552_v53, 2  ;;  %v1816_v15 = vadd.f32 %v1784_v47, %v1749_v48  ;;  %v5163_v62 = vmul.f32 %v3909_v10, %v5046_v42  ;;  %v7597_v53 = vld [vmem:[#allocation19_spill] sm:$0xff]  ;;  %v7599_v42 = vld [vmem:[#allocation20_spill] sm:$0xff] }
 0x13d   : > { %v3913_v6 = vpop.eup %3912  ;;  %v1973_v46 = vrot.slane %v1859_v9, 1  ;;  %v2215_v32 = vrot.slane %v2101_v3, 2  ;;  %v1119_v0 = vmul.f32 %v3911_v8, %v5055_v41  ;;  %v1436_v44 = vrot.slane %v1315_v29, 1 }
 0x13e   : > { %v3915_v27 = vpop.eup %3914  ;;  %v1679_v28 = vrot.slane %v1558_v11, 2  ;;  %v1428_v39 = vsel %vm1375_vm2, %v1426_v43, %v7594_v58  ;;  %v1671_v36 = vsel %vm1618_vm3, %v1669_v26, %v7596_v40  ;;  %v7598_v47 = vrot.slane %v7597_v53, 1 }
 0x13f   : > { %v1508_v48 = vadd.f32 %v1428_v39, %v1233_v52  ;;  %v7600_v10 = vrot.slane %v7599_v42, 2  ;;  %v1789_v29 = vmul.f32 %v4824_v61, %v5163_v62  ;;  %v1983_v55 = vrot.slane %v5140_v12, 1 }
 0x140   : > { %v1975_v9 = vsel %vm1375_vm2, %v1973_v46, %v7598_v47  ;;  %v2225_v58 = vrot.slane %v5150_v17, 2  ;;  %v5184_v11 = vmul.f32 %v7601_v16, %v5090_v54  ;;  %v5188_v40 = vmul.f32 %v4653_v25, %v5090_v54  ;;  %v7602_v47 = vld [vmem:[#allocation29_spill] sm:$0xff] }
 0x141   : > { %v2217_v41 = vsel %vm1618_vm3, %v2215_v32, %v7600_v10  ;;  %v2058_v39 = vadd.f32 %v1975_v9, %v1816_v15  ;;  %v1751_v8 = vadd.f32 %v1671_v36, %v1508_v48  ;;  %v1195_v52 = vsel %vm1150_vm1, %v1119_v0, 0.0 }
 0x142   : > { %v1866_v3 = vmul.f32 %v4635_v21, %v5163_v62  ;;  %v1316_v12 = vmul.f32 %v4624_v18, %v5163_v62  ;;  %v1317_v17 = vmul.f32 %v4624_v18, %v1195_v52  ;;  %v1559_v26 = vmul.f32 %v4630_v20, %v5163_v62 }
 0x143   : > { %v2300_v43 = vadd.f32 %v2217_v41, %v2058_v39  ;;  %v1818_v15 = vadd.f32 %v1786_v56, %v1751_v8  ;;  %v1238_v54 = vmul.f32 %v4676_v34, %v5163_v62  ;;  %v1560_v46 = vmul.f32 %v4630_v20, %v1195_v52 }
 0x144   : > { %v1821_v32 = vadd.f32 %v1789_v29, %v4917_v19  ;;  %v1437_v36 = vrot.slane %v1316_v12, 1  ;;  %v1439_v48 = vrot.slane %v1317_v17, 1  ;;  %v1680_v53 = vrot.slane %v1559_v26, 2 }
 0x145   : > { %v2367_v0 = vadd.f32 %v2335_v2, %v2300_v43  ;;  %v2060_v9 = vadd.f32 %v7602_v47, %v1818_v15  ;;  %v1682_v42 = vrot.slane %v1560_v46, 2  ;;  %v1867_v10 = vmul.f32 %v4635_v21, %v1195_v52  ;;  %v7604_v47 = vld [vmem:[#allocation30_spill] sm:$0xff] }
 0x146   : > { %v2108_v41 = vmul.f32 %v4643_v23, %v5163_v62  ;;  %v1438_v39 = vsel %vm1375_vm2, %v1436_v44, %v1437_v36  ;;  %v1440_v8 = vsel %vm1375_vm2, %v1437_v36, %v1439_v48  ;;  %v1681_v19 = vsel %vm1618_vm3, %v1679_v28, %v1680_v53 }
 0x147   : > { %v2609_v56 = vadd.f32 %v4903_v49, %v2367_v0  ;;  %v2529_v2 = vrot.slane %v5184_v11, 1  ;;  %v1512_v29 = vadd.f32 %v1438_v39, %v1237_v31  ;;  %v1513_v43 = vadd.f32 %v1440_v8, %v1238_v54 }
 0x148   : > { %v1683_v12 = vsel %vm1618_vm3, %v1680_v53, %v1682_v42  ;;  %v1984_v21 = vrot.slane %v1866_v3, 1  ;;  %v1986_v26 = vrot.slane %v1867_v10, 1  ;;  %v2109_v15 = vmul.f32 %v4643_v23, %v1195_v52 }
 0x149   : > { %v5214_v17 = vadd.f32 %v4915_v60, %v2609_v56  ;;  %v1285_v49 = vmul.f32 %v4624_v18, %v5106_v38  ;;  %v5219_v44 = vadd.f32 %v1681_v19, %v1512_v29  ;;  %v5221_v46 = vadd.f32 %v1683_v12, %v1513_v43  ;;  %v5253_v19 = vpop.f32.mrf.mxu2 }
 0x14a   : > { %v2226_v28 = vrot.slane %v2108_v41, 2  ;;  %v2771_v31 = vrot.slane %v5188_v40, 2  ;;  %v1985_v11 = vsel %vm1375_vm2, %v1983_v55, %v1984_v21  ;;  %v1987_v54 = vsel %vm1375_vm2, %v1984_v21, %v1986_v26 }
 0x14b   : > { %7603 = vst [vmem:[#allocation28_spill] sm:$0xff] %v5214_v17  ;;  %v2228_v60 = vrot.slane %v2109_v15, 2  ;;  %v2062_v3 = vadd.f32 %v1985_v11, %v5099_v63  ;;  %v2063_v0 = vadd.f32 %v1987_v54, %v1821_v32  ;;  %v981_v36 = vadd.f32 1.0, %v3913_v6  ;;  %v5271_v15 = vld [vmem:[%s7463_s3 + $0x5] ss:$0 sm:$0xff] }
 0x14c   : > { %v2227_v23 = vsel %vm1618_vm3, %v2225_v58, %v2226_v28  ;;  %v5229_v48 = vmul.f32 %v3915_v27, %v5062_v14  ;;  %v2302_v42 = vadd.f32 %v7604_v47, %v2060_v9  ;;  %v2338_v40 = vmul.f32 %v5012_v51, %v5163_v62 }
 0x14d   : > { %v2229_v53 = vsel %vm1618_vm3, %v2226_v28, %v2228_v60  ;;  %v5235_v55 = vadd.f32 %v2227_v23, %v2062_v3  ;;  %v2414_v63 = vmul.f32 %v7601_v16, %v5163_v62  ;;  %v2415_v58 = vmul.f32 %v7601_v16, %v1195_v52  ;;  %v5287_v23 = vld [vmem:[%s7463_s3 + $0x6] ss:$0 sm:$0xff] }
 0x14e   : > { %v5237_v10 = vadd.f32 %v2229_v53, %v2063_v0  ;;  %v1528_v14 = vmul.f32 %v4630_v20, %v5106_v38  ;;  %v2369_v6 = vadd.f32 %v5160_v5, %v2302_v42  ;;  %v2370_v27 = vadd.f32 %v2338_v40, %v4919_v59  ;;  %v676_v53 = vpop.f32.mrf.mxu0  ;;  %v5296_v42 = vld [vmem:[%s7463_s3 + $0x9] ss:$0 sm:$0xff] }
 0x14f   : > { %v2656_v32 = vmul.f32 %v4653_v25, %v5163_v62  ;;  %v2530_v9 = vrot.slane %v2414_v63, 1  ;;  %v2532_v41 = vrot.slane %v2415_v58, 1  ;;  %v2657_v56 = vmul.f32 %v4653_v25, %v1195_v52  ;;  %v5260_v25 = vld [vmem:[%s7463_s3 + $0x2] ss:$0 sm:$0xff] }
 0x150   : > { %3916 = vrcp.f32 %v981_v36  ;;  %v1217_v39 = vmul.f32 %v4676_v34, %v5106_v38  ;;  %v1386_v8 = vrot.slane %v1285_v49, 1  ;;  %v1286_v20 = vmul.f32 %v4624_v18, %v5229_v48 }
 0x151   : > { %v2772_v16 = vrot.slane %v2656_v32, 2  ;;  %v2531_v59 = vsel %vm1375_vm2, %v2529_v2, %v2530_v9  ;;  %v2533_v5 = vsel %vm1375_vm2, %v2530_v9, %v2532_v41  ;;  %v2774_v62 = vrot.slane %v2657_v56, 2  ;;  %v5309_v9 = vld [vmem:[%s7463_s3 + $0xa] ss:$0 sm:$0xff] }
 0x152   : > { %v1529_v34 = vmul.f32 %v5260_v25, %v5229_v48  ;;  %v1629_v52 = vrot.slane %v1528_v14, 2  ;;  %v2611_v29 = vadd.f32 %v2531_v59, %v2369_v6  ;;  %v2612_v43 = vadd.f32 %v2533_v5, %v2370_v27  ;;  %v769_v5 = vpop.f32.mrf.mxu2 }
 0x153   : > { %v2773_v18 = vsel %vm1618_vm3, %v2771_v31, %v2772_v16  ;;  %v2775_v12 = vsel %vm1618_vm3, %v2772_v16, %v2774_v62  ;;  %v1387_v21 = vrot.slane %v1286_v20, 1  ;;  %v1769_v26 = vmul.f32 %v4824_v61, %v5229_v48 }
 0x154   : > { %v1630_v2 = vrot.slane %v1529_v34, 2  ;;  %v1835_v49 = vmul.f32 %v5271_v15, %v5106_v38  ;;  %v5275_v28 = vadd.f32 %v2773_v18, %v2611_v29  ;;  %v5277_v11 = vadd.f32 %v2775_v12, %v2612_v43  ;;  %v5328_v29 = vld [vmem:[%s7463_s3] ss:$0 sm:$0xff] }
 0x155   : > { %v1836_v31 = vmul.f32 %v5271_v15, %v5229_v48  ;;  %v1388_v60 = vsel %vm1375_vm2, %v1386_v8, %v1387_v21  ;;  %v1801_v0 = vadd.f32 %v1769_v26, %v5014_v33  ;;  %v2078_v36 = vmul.f32 %v5287_v23, %v5229_v48 }
 0x156   : > { %7605 = vst [vmem:[#allocation17_spill] sm:$0xff] %v5275_v28  ;;  %v3917_v54 = vpop.eup %3916  ;;  %v1631_v3 = vsel %vm1618_vm3, %v1629_v52, %v1630_v2  ;;  %v2077_v47 = vmul.f32 %v5287_v23, %v5106_v38  ;;  %v2383_v33 = vmul.f32 %v5296_v42, %v5106_v38  ;;  %v1492_v63 = vadd.f32 %v1388_v60, %v1217_v39 }
 0x157   : > { %7606 = vst [vmem:[#allocation18_spill] sm:$0xff] %v5277_v11  ;;  %v1089_v40 = vmul.f32 %v3917_v54, %v5084_v7  ;;  %3918 = vrcp.f32 %v5121_v35  ;;  %v1934_v58 = vrot.slane %v1836_v31, 1  ;;  %v1933_v14 = vrot.slane %v1835_v49, 1  ;;  %v5316_v7 = vld [vmem:[%s7463_s3 + $0x1] ss:$0 sm:$0xff] }
 0x158   : > { %v5304_v27 = vadd.f32 %v1631_v3, %v1492_v63  ;;  %v2176_v32 = vrot.slane %v2078_v36, 2  ;;  %v2625_v41 = vmul.f32 %v5309_v9, %v5106_v38  ;;  %v2175_v8 = vrot.slane %v2077_v47, 2 }
 0x159   : > { %v1165_v6 = vsel %vm1150_vm1, %v1089_v40, 0.0  ;;  %v2479_v16 = vrot.slane %v2383_v33, 1  ;;  %v1935_v20 = vsel %vm1375_vm2, %v1933_v14, %v1934_v58  ;;  %v2318_v52 = vmul.f32 %v5012_v51, %v5229_v48 }
 0x15a   : > { %v1287_v35 = vmul.f32 %v5316_v7, %v1165_v6  ;;  %v1530_v56 = vmul.f32 %v5260_v25, %v1165_v6  ;;  %v1837_v39 = vmul.f32 %v5271_v15, %v1165_v6  ;;  %v2079_v59 = vmul.f32 %v5287_v23, %v1165_v6 }
 0x15b   : > { %v1218_v43 = vmul.f32 %v5328_v29, %v5229_v48  ;;  %v2042_v18 = vadd.f32 %v1935_v20, %v5116_v4  ;;  %v2177_v12 = vsel %vm1618_vm3, %v2175_v8, %v2176_v32  ;;  %v2721_v31 = vrot.slane %v2625_v41, 2  ;;  %v679_v41 = vpop.f32.mrf.mxu0 }
 0x15c   : > { %v1389_v62 = vrot.slane %v1287_v35, 1  ;;  %v1632_v38 = vrot.slane %v1530_v56, 2  ;;  %v1936_v34 = vrot.slane %v1837_v39, 1  ;;  %v2178_v26 = vrot.slane %v2079_v59, 2 }
 0x15d   : > { %v3919_v49 = vpop.eup %3918  ;;  %v5338_v40 = vadd.f32 %v2177_v12, %v2042_v18  ;;  %v2350_v63 = vadd.f32 %v2318_v52, %v5016_v50  ;;  %v2384_v4 = vmul.f32 %v5296_v42, %v5229_v48  ;;  %v2385_v14 = vmul.f32 %v5296_v42, %v1165_v6 }
 0x15e   : > { %v1390_v54 = vsel %vm1375_vm2, %v1387_v21, %v1389_v62  ;;  %v1633_v60 = vsel %vm1618_vm3, %v1630_v2, %v1632_v38  ;;  %v1937_v3 = vsel %vm1375_vm2, %v1934_v58, %v1936_v34  ;;  %v2179_v33 = vsel %vm1618_vm3, %v2176_v32, %v2178_v26  ;;  %v5354_v32 = vld [vmem:[%s7462_s2] ss:$0 sm:$0xff] }
 0x15f   : > { %v1493_v36 = vadd.f32 %v1390_v54, %v1218_v43  ;;  %v2043_v47 = vadd.f32 %v1937_v3, %v1801_v0  ;;  %v2626_v21 = vmul.f32 %v5309_v9, %v5229_v48  ;;  %v2627_v0 = vmul.f32 %v5309_v9, %v1165_v6  ;;  %v772_v43 = vpop.f32.mrf.mxu2 }
 0x160   : > { %v767_v50 = vadd.f32 %v5354_v32, %v5253_v19  ;;  %v2480_v35 = vrot.slane %v2384_v4, 1  ;;  %v2482_v56 = vrot.slane %v2385_v14, 1  ;;  %v677_v48 = vadd.f32 %v5354_v32, %v676_v53 }
 0x161   : > { %v5346_v2 = vadd.f32 %v1633_v60, %v1493_v36  ;;  %v5348_v58 = vadd.f32 %v2179_v33, %v2043_v47  ;;  %v2722_v39 = vrot.slane %v2626_v21, 2  ;;  %v2724_v8 = vrot.slane %v2627_v0, 2 }
 0x162   : > { %v850_v20 = vsub.f32 0.0, %v767_v50  ;;  %v5360_v59 = vadd.f32 %v5354_v32, %v769_v5  ;;  %v2481_v6 = vsel %vm1375_vm2, %v2479_v16, %v2480_v35  ;;  %v2483_v62 = vsel %vm1375_vm2, %v2480_v35, %v2482_v56 }
 0x163   : > { %v2723_v38 = vsel %vm1618_vm3, %v2721_v31, %v2722_v39  ;;  %v2591_v34 = vadd.f32 %v2481_v6, %v5119_v24  ;;  %v2592_v52 = vadd.f32 %v2483_v62, %v2350_v63  ;;  %v2725_v19 = vsel %vm1618_vm3, %v2722_v39, %v2724_v8  ;;  %v682_v36 = vpop.f32.mrf.mxu0 }
 0x164   : > { %v943_v18 = vmul.f32 1.442695, %v850_v20  ;;  %v820_v12 = vsub.f32 0.0, %v677_v48  ;;  %v851_v53 = vsub.f32 0.0, %v5360_v59  ;;  %v5373_v54 = vadd.f32 %v5354_v32, %v772_v43 }
 0x165   : > { %v5368_v26 = vadd.f32 %v2723_v38, %v2591_v34  ;;  %v5370_v5 = vadd.f32 %v2725_v19, %v2592_v52  ;;  %v1105_v31 = vmul.f32 %v3919_v49, %v5067_v1  ;;  %v5377_v60 = vadd.f32 %v5354_v32, %v679_v41 }
 0x166   : > { %3920 = vpow2.f32 %v943_v18  ;;  %v883_v16 = vmul.f32 1.442695, %v820_v12  ;;  %v945_v24 = vmul.f32 1.442695, %v851_v53  ;;  %v852_v3 = vsub.f32 0.0, %v5373_v54  ;;  %v7607_v12 = vld [vmem:[#allocation25_spill] sm:$0xff] }
 0x167   : > { %v5382_v33 = vsel %vm1139_vm4, %v1105_v31, 0.0  ;;  %v821_v63 = vsub.f32 0.0, %v5377_v60  ;;  %v5386_v4 = vadd.f32 %v5354_v32, %v682_v36  ;;  %v7608_v53 = vrot.slane %v7607_v12, 1 }
 0x168   : > { %3922 = vpow2.f32 %v883_v16  ;;  %v947_v47 = vmul.f32 1.442695, %v852_v3  ;;  %v1303_v21 = vmul.f32 %v5316_v7, %v5382_v33  ;;  %v1546_v20 = vmul.f32 %v5260_v25, %v5382_v33 }
 0x169   : > { %3924 = vpow2.f32 %v945_v24  ;;  %v885_v0 = vmul.f32 1.442695, %v821_v63  ;;  %v822_v35 = vsub.f32 0.0, %v5386_v4  ;;  %v1229_v52 = vmul.f32 %v5328_v29, %v5382_v33 }
 0x16a   : > { %3926 = vpow2.f32 %v947_v47  ;;  %v1416_v8 = vrot.slane %v1303_v21, 1  ;;  %v1659_v18 = vrot.slane %v1546_v20, 2 }
 0x16b   : > { %v887_v6 = vmul.f32 1.442695, %v822_v35 }
 0x16c   : > { %v3921_v1 = vpop.eup %3920  ;;  %v1418_v16 = vsel %vm1375_vm2, %v1416_v8, %v7608_v53 }
 0x16d   : > { %v1012_v49 = vadd.f32 1.0, %v3921_v1  ;;  %v1504_v47 = vadd.f32 %v1418_v16, %v1229_v52 }
 0x16e   : > { %v3923_v14 = vpop.eup %3922 }
 0x16f   : > { %3928 = vrcp.f32 %v1012_v49  ;;  %v982_v41 = vadd.f32 1.0, %v3923_v14  ;;  %v3925_v56 = vpop.eup %3924 }
 0x170   : > { %v3927_v39 = vpop.eup %3926  ;;  %v1013_v62 = vadd.f32 1.0, %v3925_v56 }
 0x171   : > { %3930 = vrcp.f32 %v982_v41  ;;  %v1014_v34 = vadd.f32 1.0, %v3927_v39 }
 0x172   : > { %3932 = vpow2.f32 %v885_v0 }
 0x173   : > { %3934 = vpow2.f32 %v887_v6 }
 0x174   : > { %3936 = vrcp.f32 %v1013_v62 }
 0x175   : > { %v3929_v38 = vpop.eup %3928  ;;  %3938 = vrcp.f32 %v1014_v34 }
 0x176   : > { %v1120_v19 = vmul.f32 %v3929_v38, %v767_v50  ;;  %v7609_v50 = vld [vmem:[#allocation26_spill] sm:$0xff] }
 0x177   : > { %v3931_v43 = vpop.eup %3930  ;;  %v7610_v1 = vrot.slane %v7609_v50, 2  ;;  %v5429_v38 = vld [vmem:[%s7463_s3 + $0x4] ss:$0 sm:$0xff] }
 0x178   : > { %v1196_v31 = vsel %vm1139_vm4, %v1120_v19, 0.0  ;;  %v3933_v24 = vpop.eup %3932  ;;  %v1090_v36 = vmul.f32 %v3931_v43, %v677_v48 }
 0x179   : > { %v1790_v3 = vmul.f32 %v4824_v61, %v1196_v31  ;;  %v2339_v63 = vmul.f32 %v5012_v51, %v1196_v31  ;;  %v1661_v49 = vsel %vm1618_vm3, %v1659_v18, %v7610_v1  ;;  %v983_v41 = vadd.f32 1.0, %v3933_v24  ;;  %v3935_v0 = vpop.eup %3934 }
 0x17a   : > { %v1318_v35 = vmul.f32 %v5316_v7, %v1196_v31  ;;  %v5412_v48 = vsel %vm1139_vm4, %v1090_v36, 0.0  ;;  %v3937_v56 = vpop.eup %3936  ;;  %v5414_v39 = vadd.f32 %v1661_v49, %v1504_v47  ;;  %v1561_v8 = vmul.f32 %v5260_v25, %v1196_v31 }
 0x17b   : > { %v1822_v14 = vadd.f32 %v1790_v3, %v5219_v44  ;;  %v5407_v21 = vadd.f32 %v2339_v63, %v5235_v55  ;;  %v1868_v20 = vmul.f32 %v5271_v15, %v1196_v31  ;;  %v2110_v44 = vmul.f32 %v5287_v23, %v1196_v31  ;;  %v3939_v6 = vpop.eup %3938 }
 0x17c   : > { %v5421_v55 = vmul.f32 %v4824_v61, %v5078_v30  ;;  %v5424_v62 = vmul.f32 %v5296_v42, %v1196_v31  ;;  %v1770_v34 = vmul.f32 %v5429_v38, %v5412_v48  ;;  %v2319_v52 = vmul.f32 %v5012_v51, %v5412_v48 }
 0x17d   : > { %v1239_v19 = vmul.f32 %v5328_v29, %v1196_v31  ;;  %v5437_v43 = vmul.f32 %v5309_v9, %v1196_v31  ;;  %3940 = vrcp.f32 %v983_v41  ;;  %v984_v61 = vadd.f32 1.0, %v3935_v0 }
 0x17e   : > { %v1441_v18 = vrot.slane %v1318_v35, 1  ;;  %v5440_v12 = vadd.f32 %v1770_v34, %v5304_v27  ;;  %v5443_v53 = vadd.f32 %v2319_v52, %v5338_v40  ;;  %v5446_v16 = vmul.f32 %v3937_v56, %v5360_v59 }
 0x17f   : > { %v1684_v24 = vrot.slane %v1561_v8, 2  ;;  %v1988_v3 = vrot.slane %v1868_v20, 1  ;;  %v2230_v36 = vrot.slane %v2110_v44, 2  ;;  %v1122_v47 = vmul.f32 %v3939_v6, %v5373_v54 }
 0x180   : > { %v2534_v31 = vrot.slane %v5424_v62, 1  ;;  %v5452_v63 = vmul.f32 %v5316_v7, %v5446_v16  ;;  %v5456_v27 = vmul.f32 %v5260_v25, %v5446_v16  ;;  %v1791_v40 = vmul.f32 %v5429_v38, %v5446_v16 }
 0x181   : > { %v2776_v59 = vrot.slane %v5437_v43, 2  ;;  %v5463_v50 = vmul.f32 %v5328_v29, %v5412_v48  ;;  %v1869_v54 = vmul.f32 %v5271_v15, %v5446_v16  ;;  %v2111_v1 = vmul.f32 %v5287_v23, %v5446_v16 }
 0x182   : > { %7611 = vst [vmem:[#allocation19_spill] sm:$0xff] %v5452_v63  ;;  %v1288_v49 = vmul.f32 %v5316_v7, %v5412_v48  ;;  %v5473_v41 = vsel %vm1150_vm1, %v1122_v47, 0.0  ;;  %v7514_v0 = vrot.slane %v5452_v63, 1  ;;  %v7515_v35 = vrot.slane %v5456_v27, 2 }
 0x183   : > { %v3941_v56 = vpop.eup %3940  ;;  %v1823_v8 = vadd.f32 %v1791_v40, %v5221_v46  ;;  %v1870_v20 = vmul.f32 %v5271_v15, %v5473_v41  ;;  %v1989_v44 = vrot.slane %v1869_v54, 1  ;;  %v2112_v6 = vmul.f32 %v5287_v23, %v5473_v41 }
 0x184   : > { %v1531_v62 = vmul.f32 %v5260_v25, %v5412_v48  ;;  %v1838_v34 = vmul.f32 %v5271_v15, %v5412_v48  ;;  %v1443_v52 = vsel %vm1375_vm2, %v1441_v18, %v7514_v0  ;;  %v1686_v46 = vsel %vm1618_vm3, %v1684_v24, %v7515_v35 }
 0x185   : > { %v1514_v43 = vadd.f32 %v1443_v52, %v1239_v19  ;;  %v1990_v47 = vsel %vm1375_vm2, %v1988_v3, %v1989_v44  ;;  %v1991_v40 = vrot.slane %v1870_v20, 1  ;;  %v2231_v54 = vrot.slane %v2111_v1, 2 }
 0x186   : > { %v1391_v11 = vrot.slane %v1288_v49, 1  ;;  %v5495_v28 = vmul.f32 %v5287_v23, %v5412_v48  ;;  %v2064_v17 = vadd.f32 %v1990_v47, %v1822_v14  ;;  %v2233_v45 = vrot.slane %v2112_v6, 2 }
 0x187   : > { %v5498_v63 = vmul.f32 %v3941_v56, %v5377_v60  ;;  %v5500_v18 = vadd.f32 %v1686_v46, %v1514_v43  ;;  %v1992_v0 = vsel %vm1375_vm2, %v1989_v44, %v1991_v40  ;;  %v2232_v19 = vsel %vm1618_vm3, %v2230_v36, %v2231_v54 }
 0x188   : > { %v2065_v24 = vadd.f32 %v1992_v0, %v1823_v8  ;;  %v2234_v3 = vsel %vm1618_vm3, %v2231_v54, %v2233_v45  ;;  %v5505_v1 = vadd.f32 %v2232_v19, %v2064_v17  ;;  %v2340_v49 = vmul.f32 %v5012_v51, %v5446_v16 }
 0x189   : > { %v1634_v20 = vrot.slane %v1531_v62, 2  ;;  %v2417_v14 = vmul.f32 %v5296_v42, %v5446_v16  ;;  %v2418_v60 = vmul.f32 %v5296_v42, %v5473_v41  ;;  %v2659_v56 = vmul.f32 %v5309_v9, %v5446_v16 }
 0x18a   : > { %7612 = vst [vmem:[#allocation20_spill] sm:$0xff] %v5505_v1  ;;  %v5515_v44 = vadd.f32 %v2234_v3, %v2065_v24  ;;  %v2372_v36 = vadd.f32 %v2340_v49, %v5237_v10  ;;  %v2660_v45 = vmul.f32 %v5309_v9, %v5473_v41  ;;  %3942 = vrcp.f32 %v984_v61 }
 0x18b   : > { %v1938_v17 = vrot.slane %v1838_v34, 1  ;;  %v2535_v0 = vrot.slane %v2417_v14, 1  ;;  %v2537_v8 = vrot.slane %v2418_v60, 1  ;;  %v2777_v6 = vrot.slane %v2659_v56, 2 }
 0x18c   : > { %7613 = vst [vmem:[#allocation16_spill] sm:$0xff] %v5515_v44  ;;  %v2779_v62 = vrot.slane %v2660_v45, 2  ;;  %v1289_v52 = vmul.f32 %v5316_v7, %v5498_v63  ;;  %v1532_v46 = vmul.f32 %v5260_v25, %v5498_v63  ;;  %v1771_v43 = vmul.f32 %v5429_v38, %v5498_v63 }
 0x18d   : > { %v2536_v10 = vsel %vm1375_vm2, %v2534_v31, %v2535_v0  ;;  %v2538_v47 = vsel %vm1375_vm2, %v2535_v0, %v2537_v8  ;;  %v2778_v61 = vsel %vm1618_vm3, %v2776_v59, %v2777_v6  ;;  %v1839_v34 = vmul.f32 %v5271_v15, %v5498_v63 }
 0x18e   : > { %v2613_v40 = vadd.f32 %v2536_v10, %v5407_v21  ;;  %v2614_v54 = vadd.f32 %v2538_v47, %v2372_v36  ;;  %v2780_v19 = vsel %vm1618_vm3, %v2777_v6, %v2779_v62  ;;  %v1392_v24 = vrot.slane %v1289_v52, 1  ;;  %v685_v36 = vpop.f32.mrf.mxu0 }
 0x18f   : > { %v1635_v3 = vrot.slane %v1532_v46, 2  ;;  %v1803_v49 = vadd.f32 %v1771_v43, %v5346_v2  ;;  %v1939_v14 = vrot.slane %v1839_v34, 1  ;;  %v2081_v31 = vmul.f32 %v5287_v23, %v5498_v63 }
 0x190   : > { %v3943_v60 = vpop.eup %3942  ;;  %v5536_v56 = vadd.f32 %v2778_v61, %v2613_v40  ;;  %v5538_v59 = vadd.f32 %v2780_v19, %v2614_v54  ;;  %v1393_v45 = vsel %vm1375_vm2, %v1391_v11, %v1392_v24  ;;  %v2320_v21 = vmul.f32 %v5012_v51, %v5498_v63 }
 0x191   : > { %v1092_v0 = vmul.f32 %v3943_v60, %v5386_v4  ;;  %v1494_v8 = vadd.f32 %v1393_v45, %v5463_v50  ;;  %v1636_v2 = vsel %vm1618_vm3, %v1634_v20, %v1635_v3  ;;  %v1940_v6 = vsel %vm1375_vm2, %v1938_v17, %v1939_v14 }
 0x192   : > { %v2180_v62 = vrot.slane %v5495_v28, 2  ;;  %v2386_v52 = vmul.f32 %v5296_v42, %v5412_v48  ;;  %v2044_v46 = vadd.f32 %v1940_v6, %v5440_v12  ;;  %v2181_v11 = vrot.slane %v2081_v31, 2 }
 0x193   : > { %v1168_v51 = vsel %vm1150_vm1, %v1092_v0, 0.0  ;;  %v5553_v43 = vadd.f32 %v1636_v2, %v1494_v8  ;;  %v2352_v4 = vadd.f32 %v2320_v21, %v5348_v58  ;;  %v2387_v50 = vmul.f32 %v5296_v42, %v5498_v63 }
 0x194   : > { %v1856_v20 = vmul.f32 %v5271_v15, %v5078_v30  ;;  %v2098_v28 = vmul.f32 %v5287_v23, %v5078_v30  ;;  %v1290_v17 = vmul.f32 %v5316_v7, %v1168_v51  ;;  %v1533_v12 = vmul.f32 %v5260_v25, %v1168_v51 }
 0x195   : > { %v1840_v10 = vmul.f32 %v5271_v15, %v1168_v51  ;;  %v2082_v47 = vmul.f32 %v5287_v23, %v1168_v51  ;;  %v2182_v61 = vsel %vm1618_vm3, %v2180_v62, %v2181_v11  ;;  %v2388_v58 = vmul.f32 %v5296_v42, %v1168_v51 }
 0x196   : > { %v2484_v34 = vrot.slane %v2386_v52, 1  ;;  %v1220_v40 = vmul.f32 %v5328_v29, %v5498_v63  ;;  %v1394_v54 = vrot.slane %v1290_v17, 1  ;;  %v1637_v19 = vrot.slane %v1533_v12, 2 }
 0x197   : > { %v1941_v31 = vrot.slane %v1840_v10, 1  ;;  %v2183_v60 = vrot.slane %v2082_v47, 2  ;;  %v5570_v45 = vadd.f32 %v2182_v61, %v2044_v46  ;;  %v2485_v21 = vrot.slane %v2387_v50, 1 }
 0x198   : > { %v2628_v0 = vmul.f32 %v5309_v9, %v5412_v48  ;;  %v1395_v8 = vsel %vm1375_vm2, %v1392_v24, %v1394_v54  ;;  %v1638_v2 = vsel %vm1618_vm3, %v1635_v3, %v1637_v19  ;;  %v2487_v6 = vrot.slane %v2388_v58, 1  ;;  %v688_v48 = vpop.f32.mrf.mxu0 }
 0x199   : > { %v1968_v62 = vrot.slane %v1856_v20, 1  ;;  %v1495_v52 = vadd.f32 %v1395_v8, %v1220_v40  ;;  %v1942_v35 = vsel %vm1375_vm2, %v1939_v14, %v1941_v31  ;;  %v2184_v17 = vsel %vm1618_vm3, %v2181_v11, %v2183_v60 }
 0x19a   : > { %v2045_v12 = vadd.f32 %v1942_v35, %v1803_v49  ;;  %v2486_v10 = vsel %vm1375_vm2, %v2484_v34, %v2485_v21  ;;  %v2488_v46 = vsel %vm1375_vm2, %v2485_v21, %v2487_v6  ;;  %v2629_v50 = vmul.f32 %v5309_v9, %v5498_v63  ;;  %v5611_v21 = vld [vmem:[%s7463_s3 + $0x8] ss:$0 sm:$0xff] }
 0x19b   : > { %v5582_v47 = vadd.f32 %v1638_v2, %v1495_v52  ;;  %v2593_v24 = vadd.f32 %v2486_v10, %v5443_v53  ;;  %v2594_v3 = vadd.f32 %v2488_v46, %v2352_v4  ;;  %v2630_v20 = vmul.f32 %v5309_v9, %v1168_v51  ;;  %v5626_v52 = vld [vmem:[%s7464_s4] ss:$0 sm:$0xff]  ;;  %v7616_v10 = vld [vmem:[#allocation21_spill] sm:$0xff] }
 0x19c   : > { %v2726_v61 = vrot.slane %v2628_v0, 2  ;;  %v5586_v14 = vadd.f32 %v2184_v17, %v2045_v12  ;;  %v2727_v11 = vrot.slane %v2629_v50, 2  ;;  %v5589_v35 = vadd.f32 %v5354_v32, %v685_v36 }
 0x19d   : > { %v2729_v49 = vrot.slane %v2630_v20, 2  ;;  %v1814_v58 = vadd.f32 %v5421_v55, %v5414_v39  ;;  %v2210_v40 = vrot.slane %v2098_v28, 2  ;;  %v7614_v53 = vrot.slane %v4981_v37, 1  ;;  %v7618_v20 = vld [vmem:[#allocation33_spill] sm:$0xff] }
 0x19e   : > { %v2728_v63 = vsel %vm1618_vm3, %v2726_v61, %v2727_v11  ;;  %v823_v34 = vsub.f32 0.0, %v5589_v35  ;;  %v7615_v60 = vrot.slane %v4985_v13, 2  ;;  %v2407_v55 = vmul.f32 %v5296_v42, %v5136_v57 }
 0x19f   : > { %v1970_v51 = vsel %vm1375_vm2, %v1968_v62, %v7614_v53  ;;  %v2730_v4 = vsel %vm1618_vm3, %v2727_v11, %v2729_v49  ;;  %v5599_v54 = vadd.f32 %v2728_v63, %v2593_v24  ;;  %v2333_v0 = vmul.f32 %v5611_v21, %v5136_v57  ;;  %v7620_v63 = vld [vmem:[#allocation27_spill] sm:$0xff] }
 0x1a0   : > { %v5601_v19 = vadd.f32 %v2730_v4, %v2594_v3  ;;  %v889_v36 = vmul.f32 1.442695, %v823_v34  ;;  %v2056_v31 = vadd.f32 %v1970_v51, %v1814_v58  ;;  %v2212_v39 = vsel %vm1618_vm3, %v2210_v40, %v7615_v60  ;;  %v691_v28 = vpop.f32.mrf.mxu0  ;;  %v775_v3 = vpop.f32.mrf.mxu2  ;;  %v7622_v40 = vld [vmem:[#allocation22_spill] sm:$0xff] }
 0x1a1   : > { %v5616_v8 = vadd.f32 %v5354_v32, %v688_v48  ;;  %v2519_v13 = vrot.slane %v2407_v55, 1  ;;  %v2649_v2 = vmul.f32 %v5309_v9, %v5136_v57  ;;  %v5621_v6 = vadd.f32 %v5354_v32, %v691_v28  ;;  %v7625_v55 = vld [vmem:[#allocation23_spill] sm:$0xff] }
 0x1a2   : > { %3944 = vpow2.f32 %v889_v36  ;;  %v2298_v37 = vadd.f32 %v2212_v39, %v2056_v31  ;;  %v7617_v46 = vrot.slane %v7616_v10, 1  ;;  %v5635_v61 = vadd.f32 %v5626_v52, %v7618_v20 }
 0x1a3   : > { %v824_v12 = vsub.f32 0.0, %v5616_v8  ;;  %v2761_v48 = vrot.slane %v2649_v2, 2  ;;  %v825_v57 = vsub.f32 0.0, %v5621_v6  ;;  %v1853_v58 = vmul.f32 %v5271_v15, %v5382_v33 }
 0x1a4   : > { %v2365_v17 = vadd.f32 %v2333_v0, %v2298_v37  ;;  %v2521_v50 = vsel %vm1375_vm2, %v2519_v13, %v7617_v46  ;;  %7619 = vst [vmem:[#allocation29_spill] sm:$0xff] %v5635_v61  ;;  %v5641_v34 = vadd.f32 %v5626_v52, %v7620_v63  ;;  %v7623_v53 = vrot.slane %v7622_v40, 2 }
 0x1a5   : > { %v891_v49 = vmul.f32 1.442695, %v824_v12  ;;  %v893_v4 = vmul.f32 1.442695, %v825_v57  ;;  %v5648_v36 = vmul.f32 %v5429_v38, %v5382_v33  ;;  %v2095_v31 = vmul.f32 %v5287_v23, %v5382_v33 }
 0x1a6   : > { %v2607_v11 = vadd.f32 %v2521_v50, %v2365_v17  ;;  %7621 = vst [vmem:[#allocation30_spill] sm:$0xff] %v5641_v34  ;;  %v2763_v51 = vsel %vm1618_vm3, %v2761_v48, %v7623_v53  ;;  %v5654_v60 = vadd.f32 %v5626_v52, %v5368_v26  ;;  %v2401_v39 = vmul.f32 %v5296_v42, %v5382_v33 }
 0x1a7   : > { %7624 = vst [vmem:[#allocation25_spill] sm:$0xff] %v5648_v36  ;;  %v1854_v28 = vmul.f32 %v5271_v15, %v7625_v55  ;;  %v2096_v37 = vmul.f32 %v5287_v23, %v7625_v55  ;;  %v5664_v0 = vadd.f32 %v5626_v52, %v5370_v5  ;;  %v5668_v13 = vmul.f32 %v5611_v21, %v5382_v33 }
 0x1a8   : > { %v3945_v62 = vpop.eup %3944  ;;  %v2918_v26 = vsub.f32 0.0, %v5635_v61  ;;  %v2849_v2 = vadd.f32 %v2763_v51, %v2607_v11  ;;  %v1963_v17 = vrot.slane %v1853_v58, 1  ;;  %v2643_v12 = vmul.f32 %v5309_v9, %v5382_v33 }
 0x1a9   : > { %v985_v24 = vadd.f32 1.0, %v3945_v62  ;;  %7626 = vst [vmem:[#allocation26_spill] sm:$0xff] %v5668_v13  ;;  %v2920_v10 = vsub.f32 0.0, %v5641_v34  ;;  %v2205_v46 = vrot.slane %v2095_v31, 2  ;;  %v2402_v5 = vmul.f32 %v5296_v42, %v7625_v55 }
 0x1aa   : > { %v2644_v50 = vmul.f32 %v5309_v9, %v7625_v55  ;;  %v2901_v48 = vsub.f32 0.0, %v5654_v60  ;;  %v1964_v57 = vrot.slane %v1854_v28, 1  ;;  %v2206_v20 = vrot.slane %v2096_v37, 2 }
 0x1ab   : > { %3946 = vrcp.f32 %v985_v24  ;;  %v2509_v24 = vrot.slane %v2401_v39, 1  ;;  %v2902_v11 = vsub.f32 0.0, %v5664_v0  ;;  %v2967_v58 = vmul.f32 1.442695, %v2918_v26  ;;  %v778_v39 = vpop.f32.mrf.mxu2 }
 0x1ac   : > { %3948 = vpow2.f32 %v891_v49  ;;  %v7627_v49 = vld [vmem:[#allocation24_spill] sm:$0xff]  ;;  %v5683_v63 = vadd.f32 %v5626_v52, %v2849_v2  ;;  %v2751_v53 = vrot.slane %v2643_v12, 2  ;;  %v2971_v31 = vmul.f32 1.442695, %v2920_v10 }
 0x1ad   : > { %3950 = vpow2.f32 %v893_v4  ;;  %v1855_v33 = vmul.f32 %v5271_v15, %v7627_v49  ;;  %v2097_v51 = vmul.f32 %v5287_v23, %v7627_v49  ;;  %v2403_v4 = vmul.f32 %v5296_v42, %v7627_v49 }
 0x1ae   : > { %7628 = vst [vmem:[#allocation21_spill] sm:$0xff] %v5683_v63  ;;  %v2510_v37 = vrot.slane %v2402_v5, 1  ;;  %v2752_v34 = vrot.slane %v2644_v50, 2  ;;  %v2933_v61 = vmul.f32 1.442695, %v2901_v48  ;;  %v5691_v26 = vadd.f32 %v5354_v32, %v775_v3 }
 0x1af   : > { %v5694_v13 = vsel %vm1375_vm2, %v1963_v17, %v1964_v57  ;;  %v2935_v12 = vmul.f32 1.442695, %v2902_v11  ;;  %v1966_v10 = vrot.slane %v1855_v33, 1  ;;  %3952 = vpow2.f32 %v2967_v58 }
 0x1b0   : > { %7629 = vst [vmem:[#allocation33_spill] sm:$0xff] %v5694_v13  ;;  %v2917_v5 = vsub.f32 0.0, %v5683_v63  ;;  %v2208_v3 = vrot.slane %v2097_v51, 2  ;;  %v2512_v36 = vrot.slane %v2403_v4, 1  ;;  %3954 = vpow2.f32 %v2971_v31 }
 0x1b1   : > { %v3947_v62 = vpop.eup %3946  ;;  %3956 = vpow2.f32 %v2933_v61  ;;  %v5710_v11 = vsel %vm1375_vm2, %v2509_v24, %v2510_v37  ;;  %v5718_v51 = vsel %vm1618_vm3, %v2751_v53, %v2752_v34  ;;  %v5737_v53 = vadd.f32 %v5626_v52, %v5599_v54 }
 0x1b2   : > { %v1093_v40 = vmul.f32 %v3947_v62, %v5589_v35  ;;  %v3949_v28 = vpop.eup %3948  ;;  %v5697_v35 = vsel %vm1618_vm3, %v2205_v46, %v2206_v20  ;;  %v2645_v62 = vmul.f32 %v5309_v9, %v7627_v49  ;;  %v853_v46 = vsub.f32 0.0, %v5691_v26  ;;  %7632 = vst [vmem:[#allocation22_spill] sm:$0xff] %v5710_v11 }
 0x1b3   : > { %v3951_v2 = vpop.eup %3950  ;;  %7630 = vst [vmem:[#allocation27_spill] sm:$0xff] %v5697_v35  ;;  %v986_v17 = vadd.f32 1.0, %v3949_v28  ;;  %3958 = vpow2.f32 %v2935_v12  ;;  %v2965_v61 = vmul.f32 1.442695, %v2917_v5  ;;  %v5724_v31 = vsel %vm1618_vm3, %v2206_v20, %v2208_v3  ;;  %v7640_v5 = vld [vmem:[#allocation28_spill] sm:$0xff] }
 0x1b4   : > { %v5704_v48 = vsel %vm1139_vm4, %v1093_v40, 0.0  ;;  %v987_v49 = vadd.f32 1.0, %v3951_v2  ;;  %v2754_v33 = vrot.slane %v2645_v62, 2  ;;  %v5715_v40 = vsel %vm1375_vm2, %v1964_v57, %v1966_v10  ;;  %7634 = vst [vmem:[#allocation34_spill] sm:$0xff] %v5718_v51  ;;  %v7639_v10 = vld [vmem:[#allocation32_spill] sm:$0xff] }
 0x1b5   : > { %v1772_v35 = vmul.f32 %v5429_v38, %v5704_v48  ;;  %v2321_v58 = vmul.f32 %v5611_v21, %v5704_v48  ;;  %7633 = vst [vmem:[#allocation24_spill] sm:$0xff] %v5715_v40  ;;  %v5730_v28 = vadd.f32 %v5354_v32, %v778_v39  ;;  %3960 = vrcp.f32 %v986_v17  ;;  %v3953_v2 = vpop.eup %3952  ;;  %v7638_v39 = vld [vmem:[#allocation31_spill] sm:$0xff] }
 0x1b6   : > { %7635 = vst [vmem:[#allocation35_spill] sm:$0xff] %v5724_v31  ;;  %v5733_v57 = vsel %vm1375_vm2, %v2510_v37, %v2512_v36  ;;  %3962 = vrcp.f32 %v987_v49  ;;  %v5740_v20 = vsel %vm1618_vm3, %v2752_v34, %v2754_v33  ;;  %v5746_v62 = vmul.f32 %v5296_v42, %v7638_v39  ;;  %v781_v37 = vpop.f32.mrf.mxu2 }
 0x1b7   : > { %v5721_v4 = vadd.f32 %v1772_v35, %v5553_v43  ;;  %v5727_v24 = vadd.f32 %v2321_v58, %v5570_v45  ;;  %7636 = vst [vmem:[#allocation36_spill] sm:$0xff] %v5733_v57  ;;  %v949_v43 = vmul.f32 1.442695, %v853_v46  ;;  %v3955_v35 = vpop.eup %3954  ;;  %v2404_v45 = vmul.f32 %v5296_v42, %v5078_v30 }
 0x1b8   : > { %7637 = vst [vmem:[#allocation37_spill] sm:$0xff] %v5740_v20  ;;  %v5750_v36 = vadd.f32 %v5626_v52, %v5601_v19  ;;  %v3957_v54 = vpop.eup %3956  ;;  %v5754_v12 = vmul.f32 %v5309_v9, %v5078_v30  ;;  %v5758_v34 = vmul.f32 %v5296_v42, %v7639_v10  ;;  %v5762_v3 = vadd.f32 %v5626_v52, %v7640_v5 }
 0x1b9   : > { %3964 = vpow2.f32 %v2965_v61  ;;  %v3959_v17 = vpop.eup %3958  ;;  %v5766_v19 = vmul.f32 %v5611_v21, %v5078_v30  ;;  %v5770_v46 = vmul.f32 %v5309_v9, %v7638_v39  ;;  %v3014_v49 = vadd.f32 1.0, %v3953_v2 }
 0x1ba   : > { %7641 = vst [vmem:[#allocation32_spill] sm:$0xff] %v5762_v3  ;;  %v854_v33 = vsub.f32 0.0, %v5730_v28  ;;  %v3016_v58 = vadd.f32 1.0, %v3955_v35  ;;  %v2903_v63 = vsub.f32 0.0, %v5737_v53  ;;  %3966 = vpow2.f32 %v949_v43 }
 0x1bb   : > { %7642 = vst [vmem:[#allocation28_spill] sm:$0xff] %v5766_v19  ;;  %v5775_v5 = vadd.f32 %v5354_v32, %v781_v37  ;;  %v3961_v61 = vpop.eup %3960  ;;  %v2514_v20 = vrot.slane %v2404_v45, 1  ;;  %v2997_v30 = vadd.f32 1.0, %v3957_v54  ;;  %v2904_v57 = vsub.f32 0.0, %v5750_v36 }
 0x1bc   : > { %v3963_v40 = vpop.eup %3962  ;;  %v2919_v35 = vsub.f32 0.0, %v5762_v3  ;;  %v2998_v19 = vadd.f32 1.0, %v3959_v17  ;;  %v5784_v43 = vmul.f32 %v5309_v9, %v7639_v10  ;;  %3968 = vrcp.f32 %v3014_v49 }
 0x1bd   : > { %v951_v45 = vmul.f32 1.442695, %v854_v33  ;;  %3970 = vrcp.f32 %v3016_v58  ;;  %v2937_v54 = vmul.f32 1.442695, %v2903_v63  ;;  %v5788_v11 = vmul.f32 %v3961_v61, %v5616_v8  ;;  %v7645_v58 = vld [vmem:[#allocation17_spill] sm:$0xff]  ;;  %v7647_v61 = vld [vmem:[#allocation18_spill] sm:$0xff] }
 0x1be   : > { %v855_v51 = vsub.f32 0.0, %v5775_v5  ;;  %v7643_v2 = vrot.slane %v5746_v62, 1  ;;  %3972 = vrcp.f32 %v2997_v30  ;;  %v2939_v10 = vmul.f32 1.442695, %v2904_v57 }
 0x1bf   : > { %v3965_v31 = vpop.eup %3964  ;;  %v1095_v3 = vmul.f32 %v3963_v40, %v5621_v6  ;;  %v5797_v49 = vmul.f32 1.442695, %v2919_v35  ;;  %3974 = vrcp.f32 %v2998_v19  ;;  %v1291_v63 = vmul.f32 %v5316_v7, %v5704_v48 }
 0x1c0   : > { %v5794_v17 = vsel %vm1375_vm2, %v2514_v20, %v7643_v2  ;;  %v3967_v37 = vpop.eup %3966  ;;  %v1534_v8 = vmul.f32 %v5260_v25, %v5704_v48  ;;  %v5803_v33 = vadd.f32 1.0, %v3965_v31  ;;  %v5807_v20 = vadd.f32 %v5626_v52, %v7645_v58 }
 0x1c1   : > { %7644 = vst [vmem:[#allocation38_spill] sm:$0xff] %v5794_v17  ;;  %v5811_v57 = vadd.f32 %v5626_v52, %v7647_v61  ;;  %3976 = vpow2.f32 %v951_v45  ;;  %v953_v6 = vmul.f32 1.442695, %v855_v51  ;;  %v5815_v40 = vmul.f32 %v5316_v7, %v5788_v11 }
 0x1c2   : > { %7646 = vst [vmem:[#allocation17_spill] sm:$0xff] %v5807_v20  ;;  %3978 = vpow2.f32 %v2937_v54  ;;  %v5819_v19 = vmul.f32 %v5260_v25, %v5788_v11  ;;  %v5821_v31 = vpop.eup %3968  ;;  %v1015_v30 = vadd.f32 1.0, %v3967_v37  ;;  %v1841_v2 = vmul.f32 %v5271_v15, %v5704_v48 }
 0x1c3   : > { %7648 = vst [vmem:[#allocation18_spill] sm:$0xff] %v5811_v57  ;;  %3980 = vpow2.f32 %v2939_v10  ;;  %v5827_v35 = vsel %vm1150_vm1, %v1095_v3, 0.0  ;;  %v5829_v51 = vpop.eup %3970  ;;  %v1396_v45 = vrot.slane %v1291_v63, 1  ;;  %v1639_v54 = vrot.slane %v1534_v8, 2 }
 0x1c4   : > { %7649 = vst [vmem:[#allocation39_spill] sm:$0xff] %v5815_v40  ;;  %v7525_v58 = vrot.slane %v5815_v40, 1  ;;  %v7526_v61 = vrot.slane %v5819_v19, 2  ;;  %v5833_v17 = vpop.eup %3972  ;;  %v1221_v37 = vmul.f32 %v5328_v29, %v5704_v48  ;;  %v2083_v10 = vmul.f32 %v5287_v23, %v5704_v48 }
 0x1c5   : > { %7650 = vst [vmem:[#allocation40_spill] sm:$0xff] %v5819_v19  ;;  %v1773_v3 = vmul.f32 %v5429_v38, %v5788_v11  ;;  %v5843_v63 = vpop.eup %3974  ;;  %3982 = vpow2.f32 %v953_v6  ;;  %v1843_v13 = vmul.f32 %v5271_v15, %v5827_v35  ;;  %v5855_v55 = vmul.f32 %v5316_v7, %v5473_v41 }
 0x1c6   : > { %7651 = vst [vmem:[#allocation41_spill] sm:$0xff] %v5821_v31  ;;  %v1398_v8 = vsel %vm1375_vm2, %v1396_v45, %v7525_v58  ;;  %v1641_v31 = vsel %vm1618_vm3, %v1639_v54, %v7526_v61  ;;  %3984 = vrcp.f32 %v1015_v30  ;;  %v1943_v44 = vrot.slane %v1841_v2, 1  ;;  %v694_v30 = vpop.f32.mrf.mxu0 }
 0x1c7   : > { %7652 = vst [vmem:[#allocation42_spill] sm:$0xff] %v5829_v51  ;;  %v1842_v51 = vmul.f32 %v5271_v15, %v5788_v11  ;;  %v3977_v39 = vpop.eup %3976  ;;  %v1496_v22 = vadd.f32 %v1398_v8, %v1221_v37  ;;  %v1805_v40 = vadd.f32 %v1773_v3, %v5582_v47  ;;  %v1946_v45 = vrot.slane %v1843_v13, 1 }
 0x1c8   : > { %v3979_v6 = vpop.eup %3978  ;;  %v2084_v58 = vmul.f32 %v5287_v23, %v5788_v11  ;;  %v2185_v61 = vrot.slane %v2083_v10, 2  ;;  %v2389_v15 = vmul.f32 %v5296_v42, %v5704_v48  ;;  %v2085_v7 = vmul.f32 %v5287_v23, %v5827_v35 }
 0x1c9   : > { %v1944_v1 = vrot.slane %v1842_v51, 1  ;;  %v3981_v54 = vpop.eup %3980  ;;  %v5862_v19 = vadd.f32 %v1641_v31, %v1496_v22  ;;  %v2322_v13 = vmul.f32 %v5611_v21, %v5788_v11  ;;  %v2631_v37 = vmul.f32 %v5309_v9, %v5704_v48 }
 0x1ca   : > { %v2186_v51 = vrot.slane %v2084_v58, 2  ;;  %v2188_v22 = vrot.slane %v2085_v7, 2 }
 0x1cb   : > { %7653 = vst [vmem:[#allocation43_spill] sm:$0xff] %v5862_v19  ;;  %v1945_v2 = vsel %vm1375_vm2, %v1943_v44, %v1944_v1  ;;  %v1947_v47 = vsel %vm1375_vm2, %v1944_v1, %v1946_v45  ;;  %v3983_v31 = vpop.eup %3982  ;;  %v2354_v23 = vadd.f32 %v2322_v13, %v5586_v14  ;;  %v2390_v44 = vmul.f32 %v5296_v42, %v5788_v11 }
 0x1cc   : > { %v2046_v10 = vadd.f32 %v1945_v2, %v5721_v4  ;;  %v2047_v3 = vadd.f32 %v1947_v47, %v1805_v40  ;;  %v2187_v8 = vsel %vm1618_vm3, %v2185_v61, %v2186_v51  ;;  %v2391_v1 = vmul.f32 %v5296_v42, %v5827_v35  ;;  %v3985_v58 = vpop.eup %3984 }
 0x1cd   : > { %v2489_v45 = vrot.slane %v2389_v15, 1  ;;  %v2189_v19 = vsel %vm1618_vm3, %v2186_v51, %v2188_v22  ;;  %v2632_v4 = vmul.f32 %v5309_v9, %v5788_v11  ;;  %v2490_v61 = vrot.slane %v2390_v44, 1 }
 0x1ce   : > { %v5880_v48 = vadd.f32 %v2187_v8, %v2046_v10  ;;  %v5884_v40 = vadd.f32 %v2189_v19, %v2047_v3  ;;  %v2492_v7 = vrot.slane %v2391_v1, 1  ;;  %v2633_v14 = vmul.f32 %v5309_v9, %v5827_v35  ;;  %v784_v9 = vpop.f32.mrf.mxu2 }
 0x1cf   : > { %v1563_v2 = vmul.f32 %v5260_v25, %v5473_v41  ;;  %v2731_v42 = vrot.slane %v2631_v37, 2  ;;  %v1016_v47 = vadd.f32 1.0, %v3977_v39  ;;  %v2732_v15 = vrot.slane %v2632_v4, 2 }
 0x1d0   : > { %7654 = vst [vmem:[#allocation44_spill] sm:$0xff] %v5884_v40  ;;  %v2999_v13 = vadd.f32 1.0, %v3979_v6  ;;  %v2491_v51 = vsel %vm1375_vm2, %v2489_v45, %v2490_v61  ;;  %v2493_v10 = vsel %vm1375_vm2, %v2490_v61, %v2492_v7  ;;  %v2734_v22 = vrot.slane %v2633_v14, 2  ;;  %v7657_v45 = vld [vmem:[#allocation19_spill] sm:$0xff] }
 0x1d1   : > { %v1444_v19 = vrot.slane %v5855_v55, 1  ;;  %v2595_v3 = vadd.f32 %v2491_v51, %v5727_v24  ;;  %v2596_v8 = vadd.f32 %v2493_v10, %v2354_v23  ;;  %v2733_v44 = vsel %vm1618_vm3, %v2731_v42, %v2732_v15  ;;  %v5905_v24 = vpop.f32.mrf.mxu0 }
 0x1d2   : > { %v2921_v1 = vsub.f32 0.0, %v5807_v20  ;;  %v3000_v25 = vadd.f32 1.0, %v3981_v54  ;;  %v2735_v41 = vsel %vm1618_vm3, %v2732_v15, %v2734_v22  ;;  %v5898_v39 = vadd.f32 %v5354_v32, %v694_v30 }
 0x1d3   : > { %v2922_v6 = vsub.f32 0.0, %v5811_v57  ;;  %3986 = vrcp.f32 %v1016_v47  ;;  %v5901_v37 = vadd.f32 %v2733_v44, %v2595_v3  ;;  %v5903_v55 = vadd.f32 %v2735_v41, %v2596_v8 }
 0x1d4   : > { %v1240_v23 = vmul.f32 %v5328_v29, %v5446_v16  ;;  %v5911_v54 = vadd.f32 %v5626_v52, %v5536_v56  ;;  %v5915_v30 = vadd.f32 %v5626_v52, %v5538_v59  ;;  %3988 = vrcp.f32 %v2999_v13 }
 0x1d5   : > { %v7658_v4 = vrot.slane %v7657_v45, 1  ;;  %v1687_v7 = vrot.slane %v1563_v2, 2  ;;  %v1017_v14 = vadd.f32 1.0, %v3983_v31  ;;  %v5921_v42 = vadd.f32 %v5354_v32, %v784_v9 }
 0x1d6   : > { %7655 = vst [vmem:[#allocation45_spill] sm:$0xff] %v5911_v54  ;;  %v2759_v29 = vrot.slane %v5784_v43, 2  ;;  %v2973_v16 = vmul.f32 1.442695, %v2921_v1  ;;  %3990 = vrcp.f32 %v3000_v25  ;;  %v826_v56 = vsub.f32 0.0, %v5898_v39  ;;  %v787_v3 = vpop.f32.mrf.mxu2 }
 0x1d7   : > { %7656 = vst [vmem:[#allocation46_spill] sm:$0xff] %v5915_v30  ;;  %v1445_v61 = vsel %vm1375_vm2, %v7658_v4, %v1444_v19  ;;  %3992 = vpow2.f32 %v5797_v49  ;;  %v2975_v59 = vmul.f32 1.442695, %v2922_v6  ;;  %v5928_v47 = vmul.f32 %v5843_v63, %v5664_v0  ;;  %v5987_v6 = vld [vmem:[%s7463_s3 + $0x2] ss:$0 sm:$0xff] }
 0x1d8   : > { %v1123_v15 = vmul.f32 %v3985_v58, %v5691_v26  ;;  %3994 = vrcp.f32 %v5803_v33  ;;  %v1515_v31 = vadd.f32 %v1445_v61, %v1240_v23  ;;  %v2923_v32 = vsub.f32 0.0, %v5911_v54 }
 0x1d9   : > { %7659 = vst [vmem:[#allocation19_spill] sm:$0xff] %v5928_v47  ;;  %v2924_v43 = vsub.f32 0.0, %v5915_v30  ;;  %v3987_v2 = vpop.eup %3986  ;;  %v5936_v13 = vmul.f32 %v5833_v17, %v5654_v60  ;;  %v7661_v49 = vrot.slane %v5456_v27, 2  ;;  %3996 = vrcp.f32 %v1017_v14  ;;  %v700_v61 = vpop.f32.mrf.mxu0 }
 0x1da   : > { %v856_v0 = vsub.f32 0.0, %v5921_v42  ;;  %v3989_v26 = vpop.eup %3988  ;;  %v7662_v33 = vrot.slane %v5758_v34, 1  ;;  %v7663_v63 = vrot.slane %v5746_v62, 1  ;;  %v7665_v10 = vrot.slane %v5770_v46, 2  ;;  %v5974_v46 = vld [vmem:[%s7463_s3 + $0x1] ss:$0 sm:$0xff] }
 0x1db   : > { %7660 = vst [vmem:[#allocation47_spill] sm:$0xff] %v5936_v13  ;;  %v1688_v51 = vsel %vm1618_vm3, %v7661_v49, %v1687_v7  ;;  %v7666_v60 = vrot.slane %v5754_v12, 2  ;;  %3998 = vpow2.f32 %v2973_v16  ;;  %v895_v27 = vmul.f32 1.442695, %v826_v56 }
 0x1dc   : > { %v5947_v58 = vsel %vm1375_vm2, %v7663_v63, %v7662_v33  ;;  %v7668_v22 = vmov %v7665_v10  ;;  %4000 = vpow2.f32 %v2975_v59  ;;  %v3093_v62 = vadd.f32 %v5928_v47, %v5936_v13  ;;  %v3991_v8 = vpop.eup %3990 }
 0x1dd   : > { %7664 = vst [vmem:[#allocation48_spill] sm:$0xff] %v5947_v58  ;;  %v5954_v17 = vsel %vm1618_vm3, %v7666_v60, %v7665_v10  ;;  %v5959_v19 = vsel %vm1618_vm3, %v7668_v22, %v2759_v29  ;;  %v1199_v34 = vsel %vm1139_vm4, %v1123_v15, 0.0  ;;  %v5965_v12 = vadd.f32 %v1688_v51, %v1515_v31  ;;  %v5979_v25 = vpop.eup %3992  ;;  %v6020_v15 = vld [vmem:[%s7463_s3] ss:$0 sm:$0xff]  ;;  %v6040_v51 = vld [vmem:[%s7463_s3 + $0x9] ss:$0 sm:$0xff] }
 0x1de   : > { %7667 = vst [vmem:[#allocation49_spill] sm:$0xff] %v5954_v17  ;;  %v5967_v44 = vmul.f32 1.442695, %v2923_v32  ;;  %v5969_v9 = vmul.f32 1.442695, %v2924_v43  ;;  %v5977_v1 = vmul.f32 %v5974_v46, %v1199_v34  ;;  %v5982_v41 = vmul.f32 %v3989_v26, %v5737_v53  ;;  %v5995_v7 = vpop.eup %3994 }
 0x1df   : > { %7669 = vst [vmem:[#allocation50_spill] sm:$0xff] %v5959_v19  ;;  %v5990_v23 = vmul.f32 %v5987_v6, %v1199_v34  ;;  %v5993_v45 = vmul.f32 %v3987_v2, %v5730_v28  ;;  %v955_v4 = vmul.f32 1.442695, %v856_v0  ;;  %v1792_v14 = vmul.f32 %v5429_v38, %v1199_v34  ;;  %v6001_v53 = vld [vmem:[%s7463_s3 + $0x5] ss:$0 sm:$0xff]  ;;  %v3997_v56 = vpop.eup %3996 }
 0x1e0   : > { %7670 = vst [vmem:[#allocation51_spill] sm:$0xff] %v5967_v44  ;;  %v6004_v29 = vmul.f32 %v6001_v53, %v1199_v34  ;;  %4002 = vpow2.f32 %v895_v27  ;;  %v6009_v28 = vld [vmem:[%s7462_s2] ss:$0 sm:$0xff]  ;;  %v6015_v59 = vmul.f32 %v3991_v8, %v5750_v36  ;;  %v6023_v31 = vmul.f32 %v6020_v15, %v1199_v34  ;;  %v6028_v32 = vld [vmem:[%s7463_s3 + $0x6] ss:$0 sm:$0xff]  ;;  %v7683_v27 = vld [vmem:[#allocation20_spill] sm:$0xff] }
 0x1e1   : > { %7671 = vst [vmem:[#allocation52_spill] sm:$0xff] %v5969_v9  ;;  %v6012_v16 = vadd.f32 %v6009_v28, %v787_v3  ;;  %v6031_v43 = vmul.f32 %v6028_v32, %v1199_v34  ;;  %v2341_v2 = vmul.f32 %v5611_v21, %v1199_v34  ;;  %v6034_v36 = vpop.eup %3998  ;;  %v6043_v0 = vmul.f32 %v6040_v51, %v1199_v34  ;;  %v6048_v26 = vld [vmem:[%s7463_s3 + $0xa] ss:$0 sm:$0xff] }
 0x1e2   : > { %7672 = vst [vmem:[#allocation53_spill] sm:$0xff] %v5977_v1  ;;  %v6051_v33 = vmul.f32 %v6048_v26, %v1199_v34  ;;  %v6054_v63 = vadd.f32 %v6009_v28, %v700_v61  ;;  %v6056_v10 = vpop.eup %4000  ;;  %v3094_v60 = vadd.f32 %v3093_v62, %v5982_v41  ;;  %4004 = vpow2.f32 %v955_v4 }
 0x1e3   : > { %7673 = vst [vmem:[#allocation54_spill] sm:$0xff] %v5979_v25  ;;  %v6062_v22 = vadd.f32 %v6009_v28, %v5905_v24  ;;  %v6065_v3 = vadd.f32 %v1792_v14, %v5500_v18  ;;  %v1993_v34 = vrot.slane %v6004_v29, 1  ;;  %v1125_v8 = vmul.f32 %v3997_v56, %v5775_v5  ;;  %v790_v29 = vpop.f32.mrf.mxu2 }
 0x1e4   : > { %7674 = vst [vmem:[#allocation55_spill] sm:$0xff] %v5982_v41  ;;  %v857_v61 = vsub.f32 0.0, %v6012_v16  ;;  %v6071_v49 = vadd.f32 %v3094_v60, %v6015_v59  ;;  %v6075_v4 = vadd.f32 %v2341_v2, %v7683_v27  ;;  %v6079_v24 = vadd.f32 %v5626_v52, %v5901_v37 }
 0x1e5   : > { %7675 = vst [vmem:[#allocation56_spill] sm:$0xff] %v5990_v23  ;;  %v6085_v5 = vmul.f32 %v5974_v46, %v5993_v45  ;;  %v828_v56 = vsub.f32 0.0, %v6054_v63  ;;  %v6090_v60 = vmul.f32 %v5987_v6, %v5993_v45  ;;  %v6094_v2 = vmul.f32 %v6001_v53, %v5993_v45 }
 0x1e6   : > { %7676 = vst [vmem:[#allocation57_spill] sm:$0xff] %v5995_v7  ;;  %v4003_v18 = vpop.eup %4002  ;;  %v6098_v37 = vadd.f32 %v5626_v52, %v5903_v55  ;;  %v827_v27 = vsub.f32 0.0, %v6062_v22  ;;  %v1201_v62 = vsel %vm1150_vm1, %v1125_v8, 0.0  ;;  %v1793_v41 = vmul.f32 %v5429_v38, %v5993_v45 }
 0x1e7   : > { %7677 = vst [vmem:[#allocation58_spill] sm:$0xff] %v6015_v59  ;;  %v1242_v59 = vmul.f32 %v6020_v15, %v5993_v45  ;;  %v957_v47 = vmul.f32 1.442695, %v857_v61  ;;  %v1323_v30 = vmul.f32 %v5974_v46, %v1201_v62  ;;  %v6110_v55 = vmul.f32 %v6028_v32, %v5993_v45 }
 0x1e8   : > { %7678 = vst [vmem:[#allocation59_spill] sm:$0xff] %v6020_v15  ;;  %v4005_v13 = vpop.eup %4004  ;;  %v2905_v54 = vsub.f32 0.0, %v6079_v24  ;;  %v988_v57 = vadd.f32 1.0, %v4003_v18  ;;  %v1566_v8 = vmul.f32 %v5987_v6, %v1201_v62  ;;  %v6116_v7 = vadd.f32 %v6009_v28, %v790_v29 }
 0x1e9   : > { %7679 = vst [vmem:[#allocation60_spill] sm:$0xff] %v6023_v31  ;;  %v1994_v61 = vrot.slane %v6094_v2, 1  ;;  %v897_v9 = vmul.f32 1.442695, %v827_v27  ;;  %v1873_v44 = vmul.f32 %v6001_v53, %v1201_v62  ;;  %v2421_v25 = vmul.f32 %v6040_v51, %v1201_v62 }
 0x1ea   : > { %7680 = vst [vmem:[#allocation61_spill] sm:$0xff] %v6034_v36  ;;  %v2906_v36 = vsub.f32 0.0, %v6098_v37  ;;  %v1018_v18 = vadd.f32 1.0, %v4005_v13  ;;  %4006 = vpow2.f32 %v957_v47  ;;  %v1449_v20 = vrot.slane %v1323_v30, 1 }
 0x1eb   : > { %7681 = vst [vmem:[#allocation62_spill] sm:$0xff] %v6040_v51  ;;  %v2115_v19 = vmul.f32 %v6028_v32, %v1201_v62  ;;  %v2941_v58 = vmul.f32 1.442695, %v2905_v54  ;;  %4008 = vrcp.f32 %v988_v57  ;;  %v1692_v29 = vrot.slane %v1566_v8, 2 }
 0x1ec   : > { %7682 = vst [vmem:[#allocation63_spill] sm:$0xff] %v6056_v10  ;;  %v899_v10 = vmul.f32 1.442695, %v828_v56  ;;  %v2420_v56 = vmul.f32 %v6040_v51, %v5993_v45  ;;  %v858_v2 = vsub.f32 0.0, %v6116_v7  ;;  %v1995_v27 = vsel %vm1375_vm2, %v1993_v34, %v1994_v61 }
 0x1ed   : > { %7684 = vst [vmem:[#allocation20_spill] sm:$0xff] %v6085_v5  ;;  %v2236_v38 = vrot.slane %v6110_v55, 2  ;;  %v2943_v17 = vmul.f32 1.442695, %v2906_v36  ;;  %v2542_v13 = vrot.slane %v2421_v25, 1  ;;  %v2663_v30 = vmul.f32 %v6048_v26, %v1201_v62  ;;  %v703_v55 = vpop.f32.mrf.mxu0 }
 0x1ee   : > { %7685 = vst [vmem:[#allocation64_spill] sm:$0xff] %v6090_v60  ;;  %4010 = vpow2.f32 %v899_v10  ;;  %v1293_v54 = vmul.f32 %v5974_v46, %v5827_v35  ;;  %v1825_v57 = vadd.f32 %v1793_v41, %v5965_v12  ;;  %v1996_v47 = vrot.slane %v1873_v44, 1 }
 0x1ef   : > { %4012 = vpow2.f32 %v897_v9  ;;  %v2342_v8 = vmul.f32 %v5611_v21, %v5993_v45  ;;  %v7687_v34 = vrot.slane %v6085_v5, 1  ;;  %v2540_v9 = vrot.slane %v2420_v56, 1 }
 0x1f0   : > { %4014 = vrcp.f32 %v1018_v18  ;;  %v4007_v10 = vpop.eup %4006  ;;  %v2662_v25 = vmul.f32 %v6048_v26, %v5993_v45  ;;  %v959_v62 = vmul.f32 1.442695, %v858_v2  ;;  %v7688_v18 = vrot.slane %v6090_v60, 2  ;;  %v7690_v60 = vld [vmem:[#allocation16_spill] sm:$0xff] }
 0x1f1   : > { %4016 = vpow2.f32 %v2941_v58  ;;  %v1450_v36 = vsel %vm1375_vm2, %v7687_v34, %v1449_v20  ;;  %v4009_v23 = vpop.eup %4008  ;;  %v2066_v44 = vadd.f32 %v1995_v27, %v6065_v3  ;;  %v2238_v41 = vrot.slane %v2115_v19, 2 }
 0x1f2   : > { %v1693_v12 = vsel %vm1618_vm3, %v7688_v18, %v1692_v29  ;;  %4018 = vpow2.f32 %v2943_v17  ;;  %v7689_v31 = vrot.slane %v6031_v43, 2  ;;  %v2543_v56 = vsel %vm1375_vm2, %v2540_v9, %v2542_v13 }
 0x1f3   : > { %v2784_v34 = vrot.slane %v2663_v30, 2  ;;  %v1399_v45 = vrot.slane %v1293_v54, 1  ;;  %v1517_v40 = vadd.f32 %v1450_v36, %v1242_v59  ;;  %v1997_v1 = vsel %vm1375_vm2, %v1994_v61, %v1996_v47  ;;  %v7693_v54 = vld [vmem:[#allocation39_spill] sm:$0xff] }
 0x1f4   : > { %v4011_v58 = vpop.eup %4010  ;;  %v2237_v20 = vsel %vm1618_vm3, %v7689_v31, %v2236_v38  ;;  %v2374_v5 = vadd.f32 %v2342_v8, %v7690_v60  ;;  %v6151_v29 = vadd.f32 %v6009_v28, %v703_v55  ;;  %v2782_v17 = vrot.slane %v2662_v25, 2 }
 0x1f5   : > { %v4013_v2 = vpop.eup %4012  ;;  %v1536_v43 = vmul.f32 %v5987_v6, %v5827_v35  ;;  %v1019_v3 = vadd.f32 1.0, %v4007_v10  ;;  %4020 = vpow2.f32 %v959_v62  ;;  %v2239_v27 = vsel %vm1618_vm3, %v2236_v38, %v2238_v41 }
 0x1f6   : > { %7691 = vst [vmem:[#allocation16_spill] sm:$0xff] %v6151_v29  ;;  %v4015_v19 = vpop.eup %4014  ;;  %v7692_v13 = vrot.slane %v6043_v0, 1  ;;  %v2616_v61 = vadd.f32 %v2543_v56, %v2374_v5  ;;  %v990_v30 = vadd.f32 1.0, %v4011_v58  ;;  %v2785_v60 = vsel %vm1618_vm3, %v2782_v17, %v2784_v34 }
 0x1f7   : > { %v4017_v31 = vpop.eup %4016  ;;  %v7694_v47 = vrot.slane %v7693_v54, 1  ;;  %v1096_v36 = vmul.f32 %v4009_v23, %v5898_v39  ;;  %v989_v35 = vadd.f32 1.0, %v4013_v2  ;;  %v2067_v25 = vadd.f32 %v1997_v1, %v1825_v57  ;;  %v793_v1 = vpop.f32.mrf.mxu2 }
 0x1f8   : > { %v2541_v59 = vsel %vm1375_vm2, %v7692_v13, %v2540_v9  ;;  %v4019_v10 = vpop.eup %4018  ;;  %v1222_v38 = vmul.f32 %v6020_v15, %v5788_v11  ;;  %v1126_v0 = vmul.f32 %v4015_v19, %v5921_v42  ;;  %v829_v9 = vsub.f32 0.0, %v6151_v29  ;;  %v7698_v19 = vld [vmem:[#allocation40_spill] sm:$0xff] }
 0x1f9   : > { %v1400_v8 = vsel %vm1375_vm2, %v7694_v47, %v1399_v45  ;;  %v2615_v5 = vadd.f32 %v2541_v59, %v6075_v4  ;;  %v1642_v62 = vrot.slane %v1536_v43, 2  ;;  %v3001_v55 = vadd.f32 1.0, %v4017_v31 }
 0x1fa   : > { %4022 = vrcp.f32 %v1019_v3  ;;  %v7695_v18 = vrot.slane %v6051_v33, 2  ;;  %v2858_v39 = vadd.f32 %v2785_v60, %v2616_v61  ;;  %v1497_v23 = vadd.f32 %v1400_v8, %v1222_v38  ;;  %v6211_v61 = vld [vmem:[%s7463_s3 + $0x4] ss:$0 sm:$0xff] }
 0x1fb   : > { %4024 = vrcp.f32 %v990_v30  ;;  %v4021_v57 = vpop.eup %4020  ;;  %v3002_v58 = vadd.f32 1.0, %v4019_v10  ;;  %v1172_v11 = vsel %vm1139_vm4, %v1096_v36, 0.0  ;;  %v6175_v42 = vadd.f32 %v6009_v28, %v793_v1 }
 0x1fc   : > { %v2783_v41 = vsel %vm1618_vm3, %v7695_v18, %v2782_v17  ;;  %4026 = vrcp.f32 %v989_v35  ;;  %v6177_v4 = vadd.f32 %v1693_v12, %v1517_v40  ;;  %v2308_v56 = vadd.f32 %v2237_v20, %v2066_v44 }
 0x1fd   : > { %7696 = vst [vmem:[#allocation39_spill] sm:$0xff] %v6175_v42  ;;  %v6181_v33 = vsel %vm1139_vm4, %v1126_v0, 0.0  ;;  %v901_v34 = vmul.f32 1.442695, %v829_v9  ;;  %v6183_v45 = vadd.f32 %v2239_v27, %v2067_v25  ;;  %v6185_v2 = vadd.f32 %v2783_v41, %v2615_v5  ;;  %v7703_v41 = vld [vmem:[#allocation43_spill] sm:$0xff] }
 0x1fe   : > { %v7699_v17 = vrot.slane %v7698_v19, 2  ;;  %4028 = vrcp.f32 %v3001_v55  ;;  %v6191_v3 = vadd.f32 %v5626_v52, %v2858_v39  ;;  %v6196_v12 = vmul.f32 %v5974_v46, %v1172_v11 }
 0x1ff   : > { %7697 = vst [vmem:[#allocation65_spill] sm:$0xff] %v6185_v2  ;;  %v1020_v44 = vadd.f32 1.0, %v4021_v57  ;;  %4030 = vrcp.f32 %v3002_v58  ;;  %v2343_v31 = vmul.f32 %v5611_v21, %v6181_v33  ;;  %v6201_v27 = vmul.f32 %v5987_v6, %v1172_v11  ;;  %v796_v25 = vpop.f32.mrf.mxu2 }
 0x200   : > { %v1643_v43 = vsel %vm1618_vm3, %v7699_v17, %v1642_v62  ;;  %7700 = vst [vmem:[#allocation40_spill] sm:$0xff] %v6191_v3  ;;  %v4023_v20 = vpop.eup %4022  ;;  %v859_v13 = vsub.f32 0.0, %v6175_v42  ;;  %v6206_v52 = vmul.f32 %v6040_v51, %v6181_v33  ;;  %v1774_v30 = vmul.f32 %v6211_v61, %v1172_v11 }
 0x201   : > { %v6193_v40 = vadd.f32 %v1643_v43, %v1497_v23  ;;  %v4025_v59 = vpop.eup %4024  ;;  %v6215_v60 = vmul.f32 %v6001_v53, %v1172_v11  ;;  %4032 = vpow2.f32 %v901_v34  ;;  %v6219_v47 = vmul.f32 %v5974_v46, %v6181_v33  ;;  %v7710_v23 = vld [vmem:[#allocation53_spill] sm:$0xff] }
 0x202   : > { %v4027_v54 = vpop.eup %4026  ;;  %v6223_v8 = vmul.f32 %v6048_v26, %v6181_v33  ;;  %v6226_v36 = vmul.f32 %v6020_v15, %v1172_v11  ;;  %v6229_v35 = vmul.f32 %v6028_v32, %v1172_v11  ;;  %v6233_v10 = vmul.f32 %v6001_v53, %v6181_v33 }
 0x203   : > { %v2323_v38 = vmul.f32 %v5611_v21, %v1172_v11  ;;  %4034 = vrcp.f32 %v1020_v44  ;;  %v6237_v9 = vadd.f32 %v2343_v31, %v2308_v56  ;;  %v1127_v62 = vmul.f32 %v4023_v20, %v6012_v16 }
 0x204   : > { %7701 = vst [vmem:[#allocation66_spill] sm:$0xff] %v6229_v35  ;;  %v4029_v0 = vpop.eup %4028  ;;  %v1098_v55 = vmul.f32 %v4025_v59, %v6054_v63  ;;  %v2544_v18 = vrot.slane %v6206_v52, 1  ;;  %v6244_v39 = vadd.f32 %v1774_v30, %v7703_v41  ;;  %v6248_v1 = vmul.f32 %v4027_v54, %v6062_v22 }
 0x205   : > { %7702 = vst [vmem:[#allocation67_spill] sm:$0xff] %v6233_v10  ;;  %v4031_v57 = vpop.eup %4030  ;;  %v2786_v58 = vrot.slane %v6223_v8, 2  ;;  %v2392_v34 = vmul.f32 %v6040_v51, %v1172_v11  ;;  %v6254_v16 = vmul.f32 %v6048_v26, %v1172_v11  ;;  %v6259_v19 = vmul.f32 %v4029_v0, %v6079_v24 }
 0x206   : > { %7704 = vst [vmem:[#allocation43_spill] sm:$0xff] %v6244_v39  ;;  %v2355_v17 = vadd.f32 %v2323_v38, %v5880_v48  ;;  %v6263_v22 = vmul.f32 %v5974_v46, %v1127_v62  ;;  %v6266_v43 = vmul.f32 %v5987_v6, %v1127_v62  ;;  %v1795_v44 = vmul.f32 %v6211_v61, %v1127_v62 }
 0x207   : > { %v6256_v63 = vpop.eup %4032  ;;  %7705 = vst [vmem:[#allocation68_spill] sm:$0xff] %v6259_v19  ;;  %v6270_v20 = vmul.f32 %v6001_v53, %v1127_v62  ;;  %v6273_v11 = vmul.f32 %v6040_v51, %v1127_v62  ;;  %v6277_v24 = vsel %vm1150_vm1, %v1098_v55, 0.0  ;;  %v6280_v48 = vmul.f32 %v4031_v57, %v6098_v37  ;;  %v706_v55 = vpop.f32.mrf.mxu0 }
 0x208   : > { %v6283_v59 = vmul.f32 %v6028_v32, %v1127_v62  ;;  %v2344_v52 = vmul.f32 %v5611_v21, %v1127_v62  ;;  %v2393_v30 = vmul.f32 %v6040_v51, %v6248_v1  ;;  %v2494_v54 = vrot.slane %v2392_v34, 1 }
 0x209   : > { %v4035_v31 = vpop.eup %4034  ;;  %7706 = vst [vmem:[#allocation69_spill] sm:$0xff] %v6280_v48  ;;  %v2736_v8 = vrot.slane %v6254_v16, 2  ;;  %v6290_v38 = vmul.f32 %v6020_v15, %v1127_v62  ;;  %v6293_v0 = vmul.f32 %v6048_v26, %v1127_v62  ;;  %v3096_v37 = vadd.f32 %v6071_v49, %v6259_v19 }
 0x20a   : > { %v2394_v56 = vmul.f32 %v6040_v51, %v6277_v24  ;;  %v1128_v34 = vmul.f32 %v4035_v31, %v6116_v7  ;;  %v6303_v16 = vadd.f32 %v1795_v44, %v6177_v4  ;;  %v6312_v41 = vadd.f32 %v2344_v52, %v6183_v45  ;;  %v7708_v44 = vld [vmem:[#allocation20_spill] sm:$0xff] }
 0x20b   : > { %v6308_v5 = vadd.f32 %v3096_v37, %v6280_v48  ;;  %v2495_v57 = vrot.slane %v2393_v30, 1  ;;  %v6317_v7 = vmul.f32 %v5974_v46, %v6248_v1  ;;  %v961_v4 = vmul.f32 1.442695, %v859_v13 }
 0x20c   : > { %v7709_v31 = vrot.slane %v7708_v44, 1  ;;  %v7711_v37 = vrot.slane %v7710_v23, 1  ;;  %v6330_v45 = vmul.f32 %v6020_v15, %v6248_v1  ;;  %v6334_v52 = vmul.f32 %v5987_v6, %v6248_v1 }
 0x20d   : > { %7707 = vst [vmem:[#allocation70_spill] sm:$0xff] %v6308_v5  ;;  %v2497_v30 = vrot.slane %v2394_v56, 1  ;;  %v2635_v49 = vmul.f32 %v6048_v26, %v6248_v1  ;;  %v1204_v13 = vsel %vm1150_vm1, %v1128_v34, 0.0  ;;  %v7713_v23 = vrot.slane %v6273_v11, 1 }
 0x20e   : > { %v6326_v62 = vsel %vm1375_vm2, %v7711_v37, %v7709_v31  ;;  %7712 = vst [vmem:[#allocation20_spill] sm:$0xff] %v6330_v45  ;;  %v1775_v31 = vmul.f32 %v6211_v61, %v6248_v1  ;;  %v2324_v37 = vmul.f32 %v5611_v21, %v6248_v1  ;;  %v1326_v48 = vmul.f32 %v5974_v46, %v1204_v13 }
 0x20f   : > { %v2546_v44 = vsel %vm1375_vm2, %v2544_v18, %v7713_v23  ;;  %v1876_v56 = vmul.f32 %v6001_v53, %v1204_v13  ;;  %v2496_v19 = vsel %vm1375_vm2, %v2494_v54, %v2495_v57  ;;  %v2636_v34 = vmul.f32 %v6048_v26, %v6277_v24  ;;  %v709_v5 = vpop.f32.mrf.mxu0 }
 0x210   : > { %v1569_v3 = vmul.f32 %v5987_v6, %v1204_v13  ;;  %v7714_v18 = vrot.slane %v6293_v0, 2  ;;  %v6361_v21 = vmul.f32 %v6001_v53, %v6248_v1  ;;  %v2118_v14 = vmul.f32 %v6028_v32, %v1204_v13 }
 0x211   : > { %v2424_v54 = vmul.f32 %v6040_v51, %v1204_v13  ;;  %v2498_v2 = vsel %vm1375_vm2, %v2495_v57, %v2497_v30  ;;  %v2737_v29 = vrot.slane %v2635_v49, 2  ;;  %v6367_v50 = vadd.f32 %v2546_v44, %v6237_v9 }
 0x212   : > { %v6356_v23 = vsel %vm1618_vm3, %v2786_v58, %v7714_v18  ;;  %v2666_v42 = vmul.f32 %v6048_v26, %v1204_v13  ;;  %v7716_v58 = vld [vmem:[#allocation44_spill] sm:$0xff]  ;;  %v1454_v35 = vrot.slane %v1326_v48, 1  ;;  %v2001_v45 = vrot.slane %v1876_v56, 1 }
 0x213   : > { %7715 = vst [vmem:[#allocation53_spill] sm:$0xff] %v6356_v23  ;;  %v2356_v18 = vadd.f32 %v2324_v37, %v7716_v58  ;;  %v2597_v23 = vadd.f32 %v2496_v19, %v2355_v17  ;;  %v2739_v39 = vrot.slane %v2636_v34, 2  ;;  %4036 = vpow2.f32 %v961_v4  ;;  %v799_v37 = vpop.f32.mrf.mxu2 }
 0x214   : > { %v1697_v15 = vrot.slane %v1569_v3, 2  ;;  %v7717_v10 = vrot.slane %v6317_v7, 1  ;;  %v7718_v51 = vrot.slane %v6196_v12, 1  ;;  %v1645_v9 = vrot.slane %v6334_v52, 2 }
 0x215   : > { %v2598_v49 = vadd.f32 %v2498_v2, %v2356_v18  ;;  %v2243_v30 = vrot.slane %v2118_v14, 2  ;;  %v2547_v13 = vrot.slane %v2424_v54, 1  ;;  %v2738_v44 = vsel %vm1618_vm3, %v2736_v8, %v2737_v29 }
 0x216   : > { %v1403_v57 = vsel %vm1375_vm2, %v7718_v51, %v7717_v10  ;;  %v6379_v19 = vadd.f32 %v6009_v28, %v709_v5  ;;  %v6382_v17 = vadd.f32 %v1775_v31, %v6193_v40  ;;  %v1949_v3 = vrot.slane %v6361_v21, 1 }
 0x217   : > { %v2839_v48 = vadd.f32 %v2738_v44, %v2597_v23  ;;  %v6386_v12 = vadd.f32 %v6009_v28, %v706_v55  ;;  %v7719_v51 = vrot.slane %v6263_v22, 1  ;;  %v7720_v14 = vrot.slane %v6270_v20, 1  ;;  %v6428_v23 = vld [vmem:[%s7464_s4] ss:$0 sm:$0xff]  ;;  %v7727_v44 = vld [vmem:[#allocation60_spill] sm:$0xff] }
 0x218   : > { %v2789_v8 = vrot.slane %v2666_v42, 2  ;;  %v2740_v5 = vsel %vm1618_vm3, %v2737_v29, %v2739_v39  ;;  %v7721_v40 = vrot.slane %v6266_v43, 2  ;;  %v6401_v31 = vadd.f32 %v1403_v57, %v6226_v36 }
 0x219   : > { %v1455_v2 = vsel %vm1375_vm2, %v7719_v51, %v1454_v35  ;;  %v2002_v10 = vsel %vm1375_vm2, %v7720_v14, %v2001_v45  ;;  %v6405_v55 = vmul.f32 %v6028_v32, %v6248_v1  ;;  %v2840_v35 = vadd.f32 %v2740_v5, %v2598_v49  ;;  %v4037_v56 = vpop.eup %4036 }
 0x21a   : > { %v6398_v4 = vsel %vm1618_vm3, %v7721_v40, %v1697_v15  ;;  %v7722_v45 = vrot.slane %v6283_v59, 2  ;;  %v7723_v29 = vrot.slane %v6273_v11, 1  ;;  %v6416_v39 = vadd.f32 %v6009_v28, %v796_v25  ;;  %v7731_v40 = vld [vmem:[#allocation56_spill] sm:$0xff] }
 0x21b   : > { %v831_v36 = vsub.f32 0.0, %v6379_v19  ;;  %v6420_v1 = vadd.f32 %v1455_v2, %v6290_v38  ;;  %v6423_v34 = vadd.f32 %v2002_v10, %v6303_v16  ;;  %v6431_v11 = vadd.f32 %v6428_v23, %v2839_v48 }
 0x21c   : > { %v6410_v42 = vsel %vm1618_vm3, %v7722_v45, %v2243_v30  ;;  %v2548_v15 = vsel %vm1375_vm2, %v7723_v29, %v2547_v13  ;;  %v830_v21 = vsub.f32 0.0, %v6386_v12  ;;  %v7724_v25 = vrot.slane %v6293_v0, 2 }
 0x21d   : > { %v1296_v38 = vmul.f32 %v5974_v46, %v6277_v24  ;;  %v1846_v16 = vmul.f32 %v6001_v53, %v6277_v24  ;;  %v6442_v58 = vadd.f32 %v6009_v28, %v799_v37  ;;  %v2618_v18 = vadd.f32 %v2548_v15, %v6312_v41  ;;  %v712_v15 = vpop.f32.mrf.mxu0 }
 0x21e   : > { %v2790_v54 = vsel %vm1618_vm3, %v7724_v25, %v2789_v8  ;;  %v1539_v57 = vmul.f32 %v5987_v6, %v6277_v24  ;;  %v6448_v49 = vadd.f32 %v6428_v23, %v2840_v35  ;;  %v1021_v0 = vadd.f32 1.0, %v4037_v56  ;;  %v7729_v8 = vld [vmem:[#allocation64_spill] sm:$0xff] }
 0x21f   : > { %v7726_v30 = vrot.slane %v6201_v27, 2  ;;  %v1516_v48 = vadd.f32 %v6326_v62, %v7727_v44  ;;  %v860_v51 = vsub.f32 0.0, %v6416_v39  ;;  %v905_v2 = vmul.f32 1.442695, %v831_v36 }
 0x220   : > { %7725 = vst [vmem:[#allocation44_spill] sm:$0xff] %v6448_v49  ;;  %v7728_v41 = vrot.slane %v6215_v60, 1  ;;  %v2907_v10 = vsub.f32 0.0, %v6431_v11  ;;  %v7730_v5 = vrot.slane %v7729_v8, 2  ;;  %v7732_v35 = vrot.slane %v7731_v40, 2 }
 0x221   : > { %v1646_v13 = vsel %vm1618_vm3, %v7726_v30, %v1645_v9  ;;  %v903_v37 = vmul.f32 1.442695, %v830_v21  ;;  %v1404_v56 = vrot.slane %v1296_v38, 1  ;;  %v1951_v45 = vrot.slane %v1846_v16, 1  ;;  %v7733_v16 = vld [vmem:[#allocation67_spill] sm:$0xff] }
 0x222   : > { %v1950_v14 = vsel %vm1375_vm2, %v7728_v41, %v1949_v3  ;;  %v1691_v27 = vsel %vm1618_vm3, %v7732_v35, %v7730_v5  ;;  %v1451_v62 = vrot.slane %v6219_v47, 1  ;;  %v861_v29 = vsub.f32 0.0, %v6442_v58 }
 0x223   : > { %v2908_v60 = vsub.f32 0.0, %v6448_v49  ;;  %4038 = vrcp.f32 %v1021_v0  ;;  %v1567_v36 = vmul.f32 %v5987_v6, %v6181_v33  ;;  %v991_v25 = vadd.f32 1.0, %v6256_v63 }
 0x224   : > { %v1759_v30 = vadd.f32 %v1691_v27, %v1516_v48  ;;  %v1794_v44 = vmul.f32 %v6211_v61, %v6181_v33  ;;  %v963_v21 = vmul.f32 1.442695, %v860_v51  ;;  %4040 = vpow2.f32 %v905_v2  ;;  %v7735_v2 = vld [vmem:[#allocation59_spill] sm:$0xff] }
 0x225   : > { %v2945_v38 = vmul.f32 1.442695, %v2907_v10  ;;  %v1998_v47 = vrot.slane %v7733_v16, 1  ;;  %v2116_v41 = vmul.f32 %v6028_v32, %v6181_v33  ;;  %4042 = vpow2.f32 %v903_v37 }
 0x226   : > { %v7734_v0 = vrot.slane %v6317_v7, 1  ;;  %v1647_v5 = vrot.slane %v1539_v57, 2  ;;  %v2088_v63 = vmul.f32 %v6028_v32, %v6277_v24  ;;  %v965_v48 = vmul.f32 1.442695, %v861_v29 }
 0x227   : > { %v1952_v40 = vsel %vm1375_vm2, %v1949_v3, %v1951_v45  ;;  %v2947_v51 = vmul.f32 1.442695, %v2908_v60  ;;  %v1243_v10 = vmul.f32 %v7735_v2, %v6181_v33  ;;  %4044 = vrcp.f32 %v991_v25  ;;  %v7738_v60 = vld [vmem:[#allocation43_spill] sm:$0xff] }
 0x228   : > { %v1405_v8 = vsel %vm1375_vm2, %v7734_v0, %v1404_v56  ;;  %v7736_v35 = vrot.slane %v6263_v22, 1  ;;  %v1694_v37 = vrot.slane %v1567_v36, 2  ;;  %v1826_v7 = vadd.f32 %v1794_v44, %v1759_v30  ;;  %v7739_v36 = vld [vmem:[#allocation20_spill] sm:$0xff] }
 0x229   : > { %4046 = vpow2.f32 %v963_v21  ;;  %v4039_v56 = vpop.eup %4038  ;;  %v2191_v57 = vrot.slane %v6405_v55, 2  ;;  %v7737_v24 = vrot.slane %v6270_v20, 1  ;;  %v2240_v45 = vrot.slane %v2116_v41, 2 }
 0x22a   : > { %v1453_v27 = vsel %vm1375_vm2, %v1451_v62, %v7736_v35  ;;  %4048 = vpow2.f32 %v2945_v38  ;;  %v4041_v29 = vpop.eup %4040  ;;  %v6494_v33 = vadd.f32 %v1646_v13, %v6401_v31  ;;  %v2048_v22 = vadd.f32 %v1950_v14, %v7738_v60  ;;  %v715_v38 = vpop.f32.mrf.mxu0 }
 0x22b   : > { %v2000_v3 = vsel %vm1375_vm2, %v1998_v47, %v7737_v24  ;;  %v2193_v25 = vrot.slane %v2088_v63, 2  ;;  %4050 = vpow2.f32 %v965_v48  ;;  %v4043_v62 = vpop.eup %4042  ;;  %v1499_v30 = vadd.f32 %v1405_v8, %v7739_v36  ;;  %v7742_v47 = vld [vmem:[#allocation66_spill] sm:$0xff]  ;;  %v7753_v36 = vld [vmem:[#allocation23_spill] sm:$0xff] }
 0x22c   : > { %v2049_v44 = vadd.f32 %v1952_v40, %v6382_v17  ;;  %4052 = vpow2.f32 %v2947_v51  ;;  %v1518_v55 = vadd.f32 %v1453_v27, %v1243_v10  ;;  %v6499_v21 = vadd.f32 %v2790_v54, %v2618_v18  ;;  %v7744_v17 = vld [vmem:[#allocation39_spill] sm:$0xff] }
 0x22d   : > { %v1648_v20 = vsel %vm1618_vm3, %v1645_v9, %v1647_v5  ;;  %v7741_v31 = vrot.slane %v6266_v43, 2  ;;  %v2068_v14 = vadd.f32 %v2000_v3, %v1826_v7  ;;  %v4045_v16 = vpop.eup %4044  ;;  %v7743_v41 = vrot.slane %v7742_v47, 2  ;;  %v7756_v47 = vld [vmem:[#allocation65_spill] sm:$0xff] }
 0x22e   : > { %7740 = vst [vmem:[#allocation60_spill] sm:$0xff] %v6499_v21  ;;  %v1129_v8 = vmul.f32 %v4039_v56, %v7744_v17  ;;  %v7745_v54 = vrot.slane %v6283_v59, 2  ;;  %v993_v52 = vadd.f32 1.0, %v4041_v29  ;;  %v2194_v9 = vsel %vm1618_vm3, %v2191_v57, %v2193_v25  ;;  %v7748_v56 = vld [vmem:[#allocation62_spill] sm:$0xff]  ;;  %v7751_v29 = vld [vmem:[#allocation16_spill] sm:$0xff] }
 0x22f   : > { %v1696_v13 = vsel %vm1618_vm3, %v1694_v37, %v7741_v31  ;;  %v2192_v0 = vsel %vm1618_vm3, %v7743_v41, %v2191_v57  ;;  %v4047_v63 = vpop.eup %4046  ;;  %v992_v5 = vadd.f32 1.0, %v4043_v62  ;;  %v6518_v48 = vadd.f32 %v6009_v28, %v712_v15 }
 0x230   : > { %v2242_v18 = vsel %vm1618_vm3, %v2240_v45, %v7745_v54  ;;  %v6515_v43 = vadd.f32 %v2192_v0, %v2048_v22  ;;  %v4049_v40 = vpop.eup %4048  ;;  %v6520_v51 = vadd.f32 %v1648_v20, %v1499_v30  ;;  %v6522_v10 = vadd.f32 %v2194_v9, %v2049_v44 }
 0x231   : > { %v1761_v35 = vadd.f32 %v1696_v13, %v1518_v55  ;;  %v6525_v59 = vadd.f32 %v6009_v28, %v715_v38  ;;  %v4051_v27 = vpop.eup %4050  ;;  %v6527_v37 = vadd.f32 %v2242_v18, %v2068_v14  ;;  %v6531_v7 = vadd.f32 %v6398_v4, %v6420_v1  ;;  %v6546_v4 = vld [vmem:[%s7463_s3 + $0x8] ss:$0 sm:$0xff]  ;;  %v7754_v13 = vld [vmem:[#allocation53_spill] sm:$0xff] }
 0x232   : > { %v6535_v15 = vadd.f32 %v6410_v42, %v6423_v34  ;;  %v6538_v57 = vmul.f32 0.0, %v7748_v56  ;;  %v4053_v24 = vpop.eup %4052  ;;  %v1205_v45 = vsel %vm1139_vm4, %v1129_v8, 0.0  ;;  %v1099_v60 = vmul.f32 %v4045_v16, %v7751_v29 }
 0x233   : > { %7746 = vst [vmem:[#allocation64_spill] sm:$0xff] %v6527_v37  ;;  %v1022_v22 = vadd.f32 1.0, %v4047_v63  ;;  %4054 = vrcp.f32 %v993_v52  ;;  %v3003_v25 = vadd.f32 1.0, %v4049_v40  ;;  %v6549_v42 = vmul.f32 0.0, %v6546_v4 }
 0x234   : > { %7747 = vst [vmem:[#allocation56_spill] sm:$0xff] %v6535_v15  ;;  %4056 = vrcp.f32 %v992_v5  ;;  %v832_v1 = vsub.f32 0.0, %v6518_v48  ;;  %v1023_v34 = vadd.f32 1.0, %v4051_v27  ;;  %v833_v62 = vsub.f32 0.0, %v6525_v59 }
 0x235   : > { %7749 = vst [vmem:[#allocation67_spill] sm:$0xff] %v6538_v57  ;;  %v6555_v30 = vmul.f32 %v6211_v61, %v7753_v36  ;;  %v6559_v44 = vmul.f32 %v6546_v4, %v7753_v36  ;;  %v3004_v55 = vadd.f32 1.0, %v4053_v24  ;;  %v1796_v20 = vmul.f32 %v6211_v61, %v1205_v45 }
 0x236   : > { %7752 = vst [vmem:[#allocation59_spill] sm:$0xff] %v6549_v42  ;;  %v6563_v31 = vmul.f32 %v6001_v53, %v1205_v45  ;;  %v6567_v14 = vadd.f32 %v7754_v13, %v6367_v50  ;;  %v1175_v38 = vsel %vm1139_vm4, %v1099_v60, 0.0  ;;  %4058 = vrcp.f32 %v1022_v22  ;;  %v718_v60 = vpop.f32.mrf.mxu0 }
 0x237   : > { %v6574_v41 = vadd.f32 %v6428_v23, %v7756_v47  ;;  %4060 = vrcp.f32 %v3003_v25  ;;  %v6577_v0 = vmul.f32 %v6028_v32, %v1205_v45  ;;  %v6580_v17 = vmul.f32 %v6546_v4, %v1205_v45 }
 0x238   : > { %7755 = vst [vmem:[#allocation43_spill] sm:$0xff] %v6567_v14  ;;  %v907_v8 = vmul.f32 1.442695, %v832_v1  ;;  %v6583_v54 = vmul.f32 %v7748_v56, %v1205_v45  ;;  %v6586_v18 = vmul.f32 %v6048_v26, %v1205_v45  ;;  %4062 = vrcp.f32 %v1023_v34 }
 0x239   : > { %7757 = vst [vmem:[#allocation20_spill] sm:$0xff] %v6574_v41  ;;  %v4055_v50 = vpop.eup %4054  ;;  %v909_v52 = vmul.f32 1.442695, %v833_v62  ;;  %4064 = vrcp.f32 %v3004_v55  ;;  %v6588_v9 = vadd.f32 %v1796_v20, %v1761_v35  ;;  %v6592_v40 = vmul.f32 %v5974_v46, %v1175_v38 }
 0x23a   : > { %7758 = vst [vmem:[#allocation66_spill] sm:$0xff] %v6580_v17  ;;  %v4057_v63 = vpop.eup %4056  ;;  %v6595_v27 = vmul.f32 %v5987_v6, %v1175_v38  ;;  %v1776_v24 = vmul.f32 %v6211_v61, %v1175_v38  ;;  %v6599_v29 = vmul.f32 %v6001_v53, %v1175_v38  ;;  %v6602_v45 = vmul.f32 %v6028_v32, %v1175_v38 }
 0x23b   : > { %7759 = vst [vmem:[#allocation39_spill] sm:$0xff] %v6583_v54  ;;  %v2325_v35 = vmul.f32 %v6546_v4, %v1175_v38  ;;  %v2395_v22 = vmul.f32 %v7748_v56, %v1175_v38  ;;  %v1101_v25 = vmul.f32 %v4055_v50, %v6379_v19  ;;  %4066 = vpow2.f32 %v907_v8 }
 0x23c   : > { %7760 = vst [vmem:[#allocation62_spill] sm:$0xff] %v6586_v18  ;;  %v4059_v1 = vpop.eup %4058  ;;  %v2637_v62 = vmul.f32 %v6048_v26, %v1175_v38  ;;  %v6610_v36 = vmul.f32 %v4057_v63, %v6386_v12  ;;  %4068 = vpow2.f32 %v909_v52  ;;  %v6614_v13 = vmul.f32 %v7735_v2, %v1175_v38 }
 0x23d   : > { %v4061_v55 = vpop.eup %4060  ;;  %v1406_v47 = vrot.slane %v6592_v40, 1  ;;  %v6618_v19 = vadd.f32 %v6009_v28, %v718_v60  ;;  %v6622_v16 = vadd.f32 %v1776_v24, %v6494_v33  ;;  %v1953_v12 = vrot.slane %v6599_v29, 1 }
 0x23e   : > { %v4063_v8 = vpop.eup %4062  ;;  %v2357_v38 = vadd.f32 %v2325_v35, %v6515_v43  ;;  %v2499_v20 = vrot.slane %v2395_v22, 1  ;;  %v6630_v40 = vmul.f32 %v4059_v1, %v6416_v39  ;;  %v1177_v60 = vsel %vm1150_vm1, %v1101_v25, 0.0  ;;  %v7764_v22 = vld [vmem:[#allocation31_spill] sm:$0xff] }
 0x23f   : > { %v6626_v63 = vpop.eup %4064  ;;  %v6635_v34 = vmul.f32 %v4061_v55, %v6431_v11  ;;  %v2741_v33 = vrot.slane %v2637_v62, 2  ;;  %v2326_v24 = vmul.f32 %v6546_v4, %v6610_v36  ;;  %v2396_v29 = vmul.f32 %v7748_v56, %v6610_v36 }
 0x240   : > { %7761 = vst [vmem:[#allocation14_spill] sm:$0xff] %v6626_v63  ;;  %v6642_v43 = vmul.f32 %v4063_v8, %v6442_v58  ;;  %v6646_v39 = vmul.f32 %v6211_v61, %v6630_v40  ;;  %v834_v35 = vsub.f32 0.0, %v6618_v19  ;;  %v6651_v11 = vmul.f32 %v6546_v4, %v7764_v22 }
 0x241   : > { %7763 = vst [vmem:[#allocation16_spill] sm:$0xff] %v6635_v34  ;;  %v4067_v5 = vpop.eup %4066  ;;  %v1298_v1 = vmul.f32 %v5974_v46, %v6610_v36  ;;  %v1299_v62 = vmul.f32 %v5974_v46, %v1177_v60  ;;  %v2397_v55 = vmul.f32 %v7748_v56, %v1177_v60  ;;  %v2500_v58 = vrot.slane %v2396_v29, 1 }
 0x242   : > { %v4069_v25 = vpop.eup %4068  ;;  %v1848_v8 = vmul.f32 %v6001_v53, %v6610_v36  ;;  %v1849_v52 = vmul.f32 %v6001_v53, %v1177_v60  ;;  %v2638_v50 = vmul.f32 %v6048_v26, %v6610_v36  ;;  %v2639_v22 = vmul.f32 %v6048_v26, %v1177_v60 }
 0x243   : > { %v2358_v21 = vadd.f32 %v2326_v24, %v6522_v10  ;;  %v2501_v57 = vsel %vm1375_vm2, %v2499_v20, %v2500_v58  ;;  %v2502_v41 = vrot.slane %v2397_v55, 1  ;;  %v994_v14 = vadd.f32 1.0, %v4067_v5 }
 0x244   : > { %v2599_v46 = vadd.f32 %v2501_v57, %v2357_v38  ;;  %v2742_v42 = vrot.slane %v2638_v50, 2  ;;  %v2744_v15 = vrot.slane %v2639_v22, 2  ;;  %v995_v29 = vadd.f32 1.0, %v4069_v25 }
 0x245   : > { %v1407_v17 = vrot.slane %v1298_v1, 1  ;;  %v1409_v37 = vrot.slane %v1299_v62, 1  ;;  %v2503_v34 = vsel %vm1375_vm2, %v2500_v58, %v2502_v41  ;;  %4070 = vrcp.f32 %v994_v14 }
 0x246   : > { %v1954_v63 = vrot.slane %v1848_v8, 1  ;;  %v2600_v49 = vadd.f32 %v2503_v34, %v2358_v21  ;;  %v2743_v54 = vsel %vm1618_vm3, %v2741_v33, %v2742_v42  ;;  %v911_v26 = vmul.f32 1.442695, %v834_v35 }
 0x247   : > { %v1956_v18 = vrot.slane %v1849_v52, 1  ;;  %v2745_v10 = vsel %vm1618_vm3, %v2742_v42, %v2744_v15  ;;  %v2841_v20 = vadd.f32 %v2743_v54, %v2599_v46  ;;  %4072 = vrcp.f32 %v995_v29 }
 0x248   : > { %v1541_v57 = vmul.f32 %v5987_v6, %v6610_v36  ;;  %v1542_v5 = vmul.f32 %v5987_v6, %v1177_v60  ;;  %v1777_v50 = vmul.f32 %v6211_v61, %v6610_v36  ;;  %v2842_v41 = vadd.f32 %v2745_v10, %v2600_v49 }
 0x249   : > { %v6675_v21 = vmul.f32 %v6001_v53, %v6630_v40  ;;  %v2090_v14 = vmul.f32 %v6028_v32, %v6610_v36  ;;  %v2091_v15 = vmul.f32 %v6028_v32, %v1177_v60  ;;  %v6681_v42 = vadd.f32 %v6428_v23, %v2841_v20 }
 0x24a   : > { %v1226_v54 = vmul.f32 %v7735_v2, %v6610_v36  ;;  %v1408_v34 = vsel %vm1375_vm2, %v1406_v47, %v1407_v17  ;;  %v1410_v52 = vsel %vm1375_vm2, %v1407_v17, %v1409_v37  ;;  %4074 = vpow2.f32 %v911_v26 }
 0x24b   : > { %v4071_v49 = vpop.eup %4070  ;;  %v1955_v38 = vsel %vm1375_vm2, %v1953_v12, %v1954_v63  ;;  %v1957_v33 = vsel %vm1375_vm2, %v1954_v63, %v1956_v18  ;;  %v6690_v24 = vadd.f32 %v6428_v23, %v2842_v41  ;;  %v2909_v60 = vsub.f32 0.0, %v6681_v42 }
 0x24c   : > { %v1650_v35 = vrot.slane %v1541_v57, 2  ;;  %v1652_v25 = vrot.slane %v1542_v5, 2  ;;  %v1809_v1 = vadd.f32 %v1777_v50, %v6520_v51  ;;  %v1102_v36 = vmul.f32 %v4071_v49, %v6518_v48  ;;  %v4188_v49 = vld [vmem:[%s7463_s3 + $0x2] ss:$0 sm:$0xff] }
 0x24d   : > { %v4073_v47 = vpop.eup %4072  ;;  %v1500_v37 = vadd.f32 %v1408_v34, %v6614_v13  ;;  %v1501_v17 = vadd.f32 %v1410_v52, %v1226_v54  ;;  %v2196_v62 = vrot.slane %v2090_v14, 2  ;;  %v2198_v55 = vrot.slane %v2091_v15, 2 }
 0x24e   : > { %v6698_v18 = vmul.f32 %v6028_v32, %v6630_v40  ;;  %v6702_v12 = vmul.f32 %v6546_v4, %v6630_v40  ;;  %v2050_v63 = vadd.f32 %v1955_v38, %v6622_v16  ;;  %v2051_v58 = vadd.f32 %v1957_v33, %v1809_v1 }
 0x24f   : > { %v6707_v48 = vmul.f32 %v7748_v56, %v6630_v40  ;;  %v2910_v51 = vsub.f32 0.0, %v6690_v24  ;;  %v2949_v13 = vmul.f32 1.442695, %v2909_v60  ;;  %v1178_v8 = vsel %vm1139_vm4, %v1102_v36, 0.0 }
 0x250   : > { %v4075_v22 = vpop.eup %4074  ;;  %v6715_v46 = vsel %vm1150_vm1, %v6642_v43, 0.0  ;;  %v7765_v29 = vrot.slane %v6595_v27, 2  ;;  %v1653_v26 = vsel %vm1618_vm3, %v1650_v35, %v1652_v25  ;;  %v1103_v56 = vmul.f32 %v4073_v47, %v6525_v59  ;;  %v4187_v27 = vld [vmem:[%s7463_s3 + $0x1] ss:$0 sm:$0xff] }
 0x251   : > { %v1744_v20 = vadd.f32 %v1653_v26, %v1501_v17  ;;  %v7766_v57 = vrot.slane %v6602_v45, 2  ;;  %v2199_v5 = vsel %vm1618_vm3, %v2196_v62, %v2198_v55  ;;  %v1300_v43 = vmul.f32 %v4187_v27, %v1178_v8  ;;  %v6762_v55 = vld [vmem:[%s7463_s3 + $0x9] ss:$0 sm:$0xff] }
 0x252   : > { %v1651_v16 = vsel %vm1618_vm3, %v7765_v29, %v1650_v35  ;;  %v6726_v41 = vadd.f32 %v2199_v5, %v2051_v58  ;;  %v1543_v14 = vmul.f32 %v5987_v6, %v1178_v8  ;;  %4076 = vpow2.f32 %v2949_v13  ;;  %v6746_v6 = vld [vmem:[%s7463_s3 + $0x5] ss:$0 sm:$0xff] }
 0x253   : > { %v1743_v10 = vadd.f32 %v1651_v16, %v1500_v37  ;;  %v2197_v3 = vsel %vm1618_vm3, %v7766_v57, %v2196_v62  ;;  %v2951_v59 = vmul.f32 1.442695, %v2910_v51  ;;  %v1850_v15 = vmul.f32 %v6001_v53, %v1178_v8 }
 0x254   : > { %v2292_v50 = vadd.f32 %v2197_v3, %v2050_v63  ;;  %v996_v54 = vadd.f32 1.0, %v4075_v22  ;;  %v1227_v45 = vmul.f32 %v7735_v2, %v1178_v8  ;;  %v1778_v34 = vmul.f32 %v6211_v61, %v1178_v8  ;;  %v6772_v22 = vld [vmem:[%s7463_s3 + $0xa] ss:$0 sm:$0xff] }
 0x255   : > { %v6735_v52 = vmul.f32 %v4187_v27, %v1103_v56  ;;  %v6740_v38 = vmul.f32 %v4188_v49, %v1103_v56  ;;  %v2092_v33 = vmul.f32 %v6028_v32, %v1178_v8  ;;  %v6749_v53 = vmul.f32 %v6746_v6, %v1103_v56 }
 0x256   : > { %4078 = vrcp.f32 %v996_v54  ;;  %v6752_v2 = vmul.f32 %v6028_v32, %v1103_v56  ;;  %v1411_v60 = vrot.slane %v1300_v43, 1  ;;  %v1654_v35 = vrot.slane %v1543_v14, 2 }
 0x257   : > { %v1412_v25 = vrot.slane %v6735_v52, 1  ;;  %v1655_v1 = vrot.slane %v6740_v38, 2  ;;  %v1958_v36 = vrot.slane %v1850_v15, 1  ;;  %v2327_v47 = vmul.f32 %v6546_v4, %v1178_v8 }
 0x258   : > { %v1959_v37 = vrot.slane %v6749_v53, 1  ;;  %v2201_v17 = vrot.slane %v6752_v2, 2  ;;  %v1810_v62 = vadd.f32 %v1778_v34, %v1743_v10  ;;  %v2398_v32 = vmul.f32 %v6762_v55, %v1178_v8  ;;  %v6767_v51 = vpop.eup %4076  ;;  %v7767_v2 = vld [vmem:[#allocation25_spill] sm:$0xff] }
 0x259   : > { %v1413_v63 = vsel %vm1375_vm2, %v1411_v60, %v1412_v25  ;;  %v2399_v58 = vmul.f32 %v6762_v55, %v1103_v56  ;;  %v2200_v13 = vrot.slane %v2092_v33, 2  ;;  %v2640_v29 = vmul.f32 %v6772_v22, %v1178_v8 }
 0x25a   : > { %v1502_v16 = vadd.f32 %v1413_v63, %v1227_v45  ;;  %v1960_v26 = vsel %vm1375_vm2, %v1958_v36, %v1959_v37  ;;  %v1656_v10 = vsel %vm1618_vm3, %v1654_v35, %v1655_v1  ;;  %v1779_v57 = vmul.f32 %v6211_v61, %v1103_v56  ;;  %v4192_v61 = vld [vmem:[%s7463_s3] ss:$0 sm:$0xff] }
 0x25b   : > { %v2052_v3 = vadd.f32 %v1960_v26, %v1810_v62  ;;  %v2505_v5 = vrot.slane %v2399_v58, 1  ;;  %4080 = vpow2.f32 %v2951_v59  ;;  %v2202_v15 = vsel %vm1618_vm3, %v2200_v13, %v2201_v17  ;;  %v7768_v36 = vld [vmem:[#allocation26_spill] sm:$0xff] }
 0x25c   : > { %v4079_v43 = vpop.eup %4078  ;;  %v1745_v14 = vadd.f32 %v1656_v10, %v1502_v16  ;;  %v2641_v54 = vmul.f32 %v6772_v22, %v1103_v56  ;;  %v2504_v34 = vrot.slane %v2398_v32, 1  ;;  %v2328_v45 = vmul.f32 %v6546_v4, %v1103_v56 }
 0x25d   : > { %v1104_v52 = vmul.f32 %v4079_v43, %v6618_v19  ;;  %v2294_v8 = vadd.f32 %v2202_v15, %v2052_v3  ;;  %v2359_v38 = vadd.f32 %v2327_v47, %v2292_v50  ;;  %v2746_v33 = vrot.slane %v2640_v29, 2  ;;  %v7769_v47 = vld [vmem:[#allocation33_spill] sm:$0xff] }
 0x25e   : > { %v1228_v53 = vmul.f32 %v4192_v61, %v1103_v56  ;;  %v1812_v59 = vadd.f32 %v7767_v2, %v1745_v14  ;;  %v1811_v35 = vadd.f32 %v1779_v57, %v1744_v20  ;;  %v2506_v19 = vsel %vm1375_vm2, %v2504_v34, %v2505_v5  ;;  %v4193_v56 = vld [vmem:[%s7463_s3 + $0x6] ss:$0 sm:$0xff]  ;;  %v7770_v57 = vld [vmem:[#allocation27_spill] sm:$0xff]  ;;  %v7772_v2 = vld [vmem:[#allocation28_spill] sm:$0xff] }
 0x25f   : > { %v1180_v60 = vsel %vm1150_vm1, %v1104_v52, 0.0  ;;  %v2361_v62 = vadd.f32 %v7768_v36, %v2294_v8  ;;  %v2747_v50 = vrot.slane %v2641_v54, 2  ;;  %v2360_v28 = vadd.f32 %v2328_v45, %v6726_v41  ;;  %v7771_v14 = vld [vmem:[#allocation22_spill] sm:$0xff] }
 0x260   : > { %v1302_v32 = vmul.f32 %v4187_v27, %v1180_v60  ;;  %v1545_v63 = vmul.f32 %v4188_v49, %v1180_v60  ;;  %v1852_v4 = vmul.f32 %v6746_v6, %v1180_v60  ;;  %v2054_v58 = vadd.f32 %v7769_v47, %v1812_v59 }
 0x261   : > { %v2094_v13 = vmul.f32 %v4193_v56, %v1180_v60  ;;  %v2400_v20 = vmul.f32 %v6762_v55, %v1180_v60  ;;  %v4081_v29 = vpop.eup %4080  ;;  %v2601_v27 = vadd.f32 %v2506_v19, %v2359_v38  ;;  %v2603_v15 = vadd.f32 %v7771_v14, %v2361_v62  ;;  %v7773_v62 = vld [vmem:[#allocation34_spill] sm:$0xff] }
 0x262   : > { %v1414_v16 = vrot.slane %v1302_v32, 1  ;;  %v1657_v26 = vrot.slane %v1545_v63, 2  ;;  %v1961_v10 = vrot.slane %v1852_v4, 1  ;;  %v2296_v3 = vadd.f32 %v7770_v57, %v2054_v58  ;;  %v7774_v4 = vld [vmem:[#allocation38_spill] sm:$0xff]  ;;  %v7775_v58 = vld [vmem:[#allocation49_spill] sm:$0xff] }
 0x263   : > { %v2203_v49 = vrot.slane %v2094_v13, 2  ;;  %v2507_v43 = vrot.slane %v2400_v20, 1  ;;  %v2748_v41 = vsel %vm1618_vm3, %v2746_v33, %v2747_v50  ;;  %v2642_v36 = vmul.f32 %v6772_v22, %v1180_v60 }
 0x264   : > { %v1415_v54 = vsel %vm1375_vm2, %v1412_v25, %v1414_v16  ;;  %v1658_v34 = vsel %vm1618_vm3, %v1655_v1, %v1657_v26  ;;  %v1962_v52 = vsel %vm1375_vm2, %v1959_v37, %v1961_v10  ;;  %v2363_v38 = vadd.f32 %v7772_v2, %v2296_v3  ;;  %v7776_v26 = vld [vmem:[#allocation24_spill] sm:$0xff]  ;;  %v7778_v3 = vld [vmem:[#allocation35_spill] sm:$0xff] }
 0x265   : > { %v1503_v8 = vadd.f32 %v1415_v54, %v1228_v53  ;;  %v2053_v45 = vadd.f32 %v1962_v52, %v1811_v35  ;;  %v2204_v61 = vsel %vm1618_vm3, %v2201_v17, %v2203_v49  ;;  %v2508_v59 = vsel %vm1375_vm2, %v2505_v5, %v2507_v43  ;;  %v7779_v43 = vld [vmem:[#allocation37_spill] sm:$0xff] }
 0x266   : > { %v2843_v19 = vadd.f32 %v2748_v41, %v2601_v27  ;;  %v2845_v32 = vadd.f32 %v7773_v62, %v2603_v15  ;;  %v2602_v1 = vadd.f32 %v2508_v59, %v2360_v28  ;;  %v2605_v37 = vadd.f32 %v7774_v4, %v2363_v38  ;;  %v7777_v27 = vld [vmem:[#allocation36_spill] sm:$0xff]  ;;  %v3151_v4 = vld [vmem:[%s7465_s5 + $0x68] sm:$0xff] }
 0x267   : > { %v1746_v25 = vadd.f32 %v1658_v34, %v1503_v8  ;;  %v2295_v63 = vadd.f32 %v2204_v61, %v2053_v45  ;;  %v6811_v33 = vmul.f32 %v6772_v22, %v6630_v40  ;;  %v2749_v53 = vrot.slane %v2642_v36, 2 }
 0x268   : > { %v6814_v17 = vadd.f32 %v6428_v23, %v2843_v19  ;;  %v6817_v5 = vadd.f32 %v6428_v23, %v2845_v32  ;;  %v1829_v60 = vadd.f32 %v6646_v39, %v6531_v7  ;;  %v2847_v13 = vadd.f32 %v7775_v58, %v2605_v37  ;;  %v3153_v19 = vld [vmem:[%s7465_s5 + $0x78] sm:$0xff] }
 0x269   : > { %v1813_v35 = vadd.f32 %v6555_v30, %v1746_v25  ;;  %v2362_v47 = vadd.f32 %v6559_v44, %v2295_v63  ;;  %v1879_v40 = vmul.f32 %v6746_v6, %v6715_v46  ;;  %v2750_v28 = vsel %vm1618_vm3, %v2747_v50, %v2749_v53  ;;  %3155 = vmatpush.msrb.mxu1 %v3153_v19  ;;  %v7782_v25 = vld [vmem:[#allocation50_spill] sm:$0xff] }
 0x26a   : > { %v2911_v20 = vsub.f32 0.0, %v6814_v17  ;;  %v2913_v16 = vsub.f32 0.0, %v6817_v5  ;;  %v2844_v7 = vadd.f32 %v2750_v28, %v2602_v1  ;;  %v6832_v30 = vadd.f32 %v6428_v23, %v2847_v13 }
 0x26b   : > { %v2055_v10 = vadd.f32 %v7776_v26, %v1813_v35  ;;  %v2604_v49 = vadd.f32 %v7777_v27, %v2362_v47  ;;  %v2004_v44 = vrot.slane %v6675_v21, 1  ;;  %v3005_v39 = vadd.f32 1.0, %v6767_v51 }
 0x26c   : > { %v2953_v57 = vmul.f32 1.442695, %v2911_v20  ;;  %v2957_v6 = vmul.f32 1.442695, %v2913_v16  ;;  %v6839_v15 = vadd.f32 %v6428_v23, %v2844_v7  ;;  %v2915_v54 = vsub.f32 0.0, %v6832_v30  ;;  %v7784_v20 = vld [vmem:[#allocation62_spill] sm:$0xff] }
 0x26d   : > { %v2297_v50 = vadd.f32 %v7778_v3, %v2055_v10  ;;  %v2846_v14 = vadd.f32 %v7779_v43, %v2604_v49  ;;  %v2006_v34 = vrot.slane %v1879_v40, 1  ;;  %v2121_v52 = vmul.f32 %v4193_v56, %v6715_v46  ;;  %v7785_v49 = vld [vmem:[#allocation39_spill] sm:$0xff]  ;;  %v7787_v3 = vld [vmem:[#allocation44_spill] sm:$0xff] }
 0x26e   : > { %v2246_v41 = vrot.slane %v6698_v18, 2  ;;  %4082 = vpow2.f32 %v2953_v57  ;;  %v2912_v8 = vsub.f32 0.0, %v6839_v15  ;;  %v7780_v45 = vrot.slane %v6563_v31, 1  ;;  %v7781_v18 = vld [vmem:[#allocation48_spill] sm:$0xff]  ;;  %v3149_v57 = vld [vmem:[%s7465_s5 + $0x58] sm:$0xff] }
 0x26f   : > { %v2364_v21 = vadd.f32 %v6651_v11, %v2297_v50  ;;  %v6846_v51 = vadd.f32 %v6428_v23, %v2846_v14  ;;  %4084 = vpow2.f32 %v2957_v6  ;;  %v2427_v2 = vmul.f32 %v6762_v55, %v6715_v46  ;;  %v3152_v31 = vld [vmem:[%s7465_s5 + $0x70] sm:$0xff]  ;;  %v7788_v50 = vld [vmem:[#allocation14_spill] sm:$0xff] }
 0x270   : > { %v2005_v61 = vsel %vm1375_vm2, %v7780_v45, %v2004_v44  ;;  %v3006_v38 = vadd.f32 1.0, %v4081_v29  ;;  %v2961_v56 = vmul.f32 1.442695, %v2915_v54  ;;  %4086 = vrcp.f32 %v3005_v39  ;;  %3156 = vmatpush.msrb.mxu1 %v3152_v31  ;;  %v7790_v14 = vld [vmem:[#allocation70_spill] sm:$0xff] }
 0x271   : > { %v2606_v59 = vadd.f32 %v7781_v18, %v2364_v21  ;;  %v2914_v11 = vsub.f32 0.0, %v6846_v51  ;;  %v2955_v36 = vmul.f32 1.442695, %v2912_v8  ;;  %v2007_v62 = vsel %vm1375_vm2, %v2004_v44, %v2006_v34  ;;  %v7791_v34 = vld [vmem:[#allocation64_spill] sm:$0xff] }
 0x272   : > { %v2248_v32 = vrot.slane %v2121_v52, 2  ;;  %v2550_v55 = vrot.slane %v6707_v48, 1  ;;  %4088 = vpow2.f32 %v2961_v56  ;;  %v2070_v29 = vadd.f32 %v2005_v61, %v6588_v9  ;;  %v3195_v9 = vld [vmem:[%s7467_s7] sm:$0xff]  ;;  %3157 = vmatpush.msrb.mxu1 %v3151_v4  ;;  %v7793_v21 = vld [vmem:[#allocation56_spill] sm:$0xff] }
 0x273   : > { %v2848_v63 = vadd.f32 %v7782_v25, %v2606_v59  ;;  %4090 = vpow2.f32 %v2955_v36  ;;  %v2959_v1 = vmul.f32 1.442695, %v2914_v11  ;;  %v7783_v53 = vrot.slane %v6577_v0, 2  ;;  %v3150_v0 = vld [vmem:[%s7465_s5 + $0x60] sm:$0xff]  ;;  %3216 = vmatpush.msrb.mxu2 %v3195_v9  ;;  %v3148_v18 = vld [vmem:[%s7465_s5 + $0x50] sm:$0xff] }
 0x274   : > { %v4083_v37 = vpop.eup %4082  ;;  %v2552_v47 = vrot.slane %v2427_v2, 1  ;;  %v2669_v48 = vmul.f32 %v6772_v22, %v6715_v46  ;;  %4092 = vrcp.f32 %v3006_v38  ;;  %v2071_v13 = vadd.f32 %v2007_v62, %v1829_v60  ;;  %v7792_v52 = vld [vmem:[#allocation66_spill] sm:$0xff]  ;;  %3158 = vmatpush.msrb.mxu1 %v3150_v0 }
 0x275   : > { %v2247_v35 = vsel %vm1618_vm3, %v7783_v53, %v2246_v41  ;;  %v4085_v58 = vpop.eup %4084  ;;  %v6878_v40 = vadd.f32 %v6428_v23, %v2848_v63  ;;  %4094 = vpow2.f32 %v2959_v1  ;;  %v3007_v28 = vadd.f32 1.0, %v4083_v37 }
 0x276   : > { %v2791_v46 = vrot.slane %v7784_v20, 2  ;;  %v2249_v16 = vsel %vm1618_vm3, %v2246_v41, %v2248_v32  ;;  %v2792_v26 = vrot.slane %v6811_v33, 2  ;;  %v3009_v10 = vadd.f32 1.0, %v4085_v58  ;;  %v4087_v27 = vpop.eup %4086  ;;  %v7789_v33 = vld [vmem:[#allocation16_spill] sm:$0xff]  ;;  %3159 = vmatpush.msrb.mxu1 %v3149_v57  ;;  %v7797_v20 = vld [vmem:[#allocation67_spill] sm:$0xff] }
 0x277   : > { %v2312_v60 = vadd.f32 %v2247_v35, %v2070_v29  ;;  %v7786_v7 = vrot.slane %v7785_v49, 1  ;;  %v2916_v39 = vsub.f32 0.0, %v6878_v40  ;;  %4096 = vrcp.f32 %v3007_v28  ;;  %v7796_v58 = vld [vmem:[#allocation20_spill] sm:$0xff] }
 0x278   : > { %v4089_v6 = vpop.eup %4088  ;;  %v6895_v43 = vmul.f32 %v7788_v50, %v7787_v3  ;;  %v3098_v54 = vadd.f32 %v7790_v14, %v7789_v33  ;;  %v2377_v41 = vadd.f32 %v7792_v52, %v7791_v34  ;;  %v2378_v8 = vadd.f32 %v6702_v12, %v7793_v21  ;;  %v7794_v12 = vld [vmem:[#allocation59_spill] sm:$0xff]  ;;  %3160 = vmatpush.msrb.mxu1 %v3148_v18  ;;  %v7800_v49 = vld [vmem:[#allocation60_spill] sm:$0xff] }
 0x279   : > { %v2551_v44 = vsel %vm1375_vm2, %v7786_v7, %v2550_v55  ;;  %v4091_v45 = vpop.eup %4090  ;;  %v2313_v61 = vadd.f32 %v2249_v16, %v2071_v13  ;;  %v2553_v2 = vsel %vm1375_vm2, %v2550_v55, %v2552_v47  ;;  %v2794_v38 = vrot.slane %v2669_v48, 2  ;;  %v3147_v55 = vld [vmem:[%s7465_s5 + $0x48] sm:$0xff]  ;;  %v3146_v47 = vld [vmem:[%s7465_s5 + $0x40] sm:$0xff]  ;;  %v7804_v52 = vld [vmem:[#allocation52_spill] sm:$0xff] }
 0x27a   : > { %v2963_v56 = vmul.f32 1.442695, %v2916_v39  ;;  %v4093_v59 = vpop.eup %4092  ;;  %v2619_v11 = vadd.f32 %v2551_v44, %v2377_v41  ;;  %v2793_v36 = vsel %vm1618_vm3, %v2791_v46, %v2792_v26  ;;  %v3008_v19 = vadd.f32 1.0, %v4091_v45  ;;  %3161 = vmatpush.msrb.mxu1 %v3147_v55  ;;  %v7795_v48 = vld [vmem:[#allocation43_spill] sm:$0xff]  ;;  %v7801_v39 = vld [vmem:[#allocation54_spill] sm:$0xff] }
 0x27b   : > { %4098 = vrcp.f32 %v3009_v10  ;;  %v4095_v31 = vpop.eup %4094  ;;  %v2379_v62 = vadd.f32 %v7794_v12, %v2312_v60  ;;  %v6910_v32 = vmul.f32 %v4087_v27, %v6681_v42  ;;  %v2670_v29 = vmul.f32 0.0, %v6772_v22  ;;  %v7799_v27 = vld [vmem:[#allocation40_spill] sm:$0xff] }
 0x27c   : > { %4100 = vpow2.f32 %v2963_v56  ;;  %v2620_v25 = vadd.f32 %v2553_v2, %v2378_v8  ;;  %v3010_v63 = vadd.f32 1.0, %v4095_v31  ;;  %v3011_v1 = vadd.f32 1.0, %v4089_v6  ;;  %3162 = vmatpush.msrb.mxu1 %v3146_v47  ;;  %v7802_v6 = vld [vmem:[#allocation51_spill] sm:$0xff] }
 0x27d   : > { %4102 = vrcp.f32 %v3008_v19  ;;  %v4097_v4 = vpop.eup %4096  ;;  %v3099_v37 = vadd.f32 %v3098_v54, %v6895_v43  ;;  %v2380_v53 = vadd.f32 %v7794_v12, %v2313_v61  ;;  %v2795_v42 = vsel %vm1618_vm3, %v2792_v26, %v2794_v38  ;;  %v3144_v54 = vld [vmem:[%s7465_s5 + $0x30] sm:$0xff]  ;;  %v3143_v2 = vld [vmem:[%s7465_s5 + $0x28] sm:$0xff]  ;;  %v3142_v12 = vld [vmem:[%s7465_s5 + $0x20] sm:$0xff] }
 0x27e   : > { %v6920_v35 = vmul.f32 %v4093_v59, %v6690_v24  ;;  %v2861_v22 = vadd.f32 %v2793_v36, %v2619_v11  ;;  %4104 = vrcp.f32 %v3010_v63  ;;  %v6927_v9 = vadd.f32 %v6428_v23, %v7795_v48  ;;  %v3145_v24 = vld [vmem:[%s7465_s5 + $0x38] sm:$0xff] }
 0x27f   : > { %v2925_v13 = vsub.f32 0.0, %v7796_v58  ;;  %v3100_v28 = vadd.f32 %v3099_v37, %v6910_v32  ;;  %v6932_v0 = vmul.f32 %v4097_v4, %v6814_v17  ;;  %v7798_v46 = vrot.slane %v7797_v20, 1  ;;  %3163 = vmatpush.msrb.mxu1 %v3145_v24  ;;  %v7805_v37 = vld [vmem:[#allocation61_spill] sm:$0xff]  ;;  %v7806_v20 = vld [vmem:[#allocation63_spill] sm:$0xff] }
 0x280   : > { %v2796_v26 = vrot.slane %v2670_v29, 2  ;;  %v2926_v60 = vsub.f32 0.0, %v7799_v27  ;;  %v6942_v7 = vadd.f32 %v6428_v23, %v7800_v49  ;;  %v2862_v44 = vadd.f32 %v2795_v42, %v2620_v25 }
 0x281   : > { %v2621_v16 = vadd.f32 %v7798_v46, %v2379_v62  ;;  %v4099_v10 = vpop.eup %4098  ;;  %4106 = vrcp.f32 %v3011_v1  ;;  %v3015_v57 = vadd.f32 1.0, %v7801_v39  ;;  %v7803_v3 = vmov %v7798_v46  ;;  %3164 = vmatpush.msrb.mxu1 %v3144_v54 }
 0x282   : > { %v4101_v17 = vpop.eup %4100  ;;  %4108 = vpow2.f32 %v7802_v6  ;;  %v2622_v50 = vadd.f32 %v7803_v3, %v2380_v53  ;;  %v3101_v14 = vadd.f32 %v3100_v28, %v6920_v35  ;;  %v2927_v21 = vsub.f32 0.0, %v6927_v9  ;;  %v3138_v3 = vld [vmem:[%s7465_s5] sm:$0xff] }
 0x283   : > { %v4103_v34 = vpop.eup %4102  ;;  %4110 = vpow2.f32 %v7804_v52  ;;  %v3012_v41 = vadd.f32 1.0, %v4101_v17  ;;  %v2981_v8 = vmul.f32 1.442695, %v2925_v13  ;;  %v2863_v38 = vadd.f32 %v2796_v26, %v2621_v16  ;;  %3165 = vmatpush.msrb.mxu1 %v3143_v2  ;;  %v3140_v13 = vld [vmem:[%s7465_s5 + $0x10] sm:$0xff]  ;;  %v7810_v52 = vld [vmem:[#allocation41_spill] sm:$0xff] }
 0x284   : > { %v6955_v45 = vmul.f32 %v4103_v34, %v6839_v15  ;;  %v3102_v61 = vadd.f32 %v3101_v14, %v6932_v0  ;;  %v6962_v56 = vadd.f32 %v6428_v23, %v2861_v22  ;;  %v4105_v18 = vpop.eup %4104  ;;  %v2983_v59 = vmul.f32 1.442695, %v2926_v60  ;;  %v7809_v34 = vld [vmem:[#allocation29_spill] sm:$0xff] }
 0x285   : > { %v2928_v11 = vsub.f32 0.0, %v6942_v7  ;;  %v6966_v36 = vadd.f32 %v6428_v23, %v2862_v44  ;;  %4112 = vrcp.f32 %v3012_v41  ;;  %v6969_v15 = vmul.f32 %v4099_v10, %v6817_v5  ;;  %v3141_v5 = vld [vmem:[%s7465_s5 + $0x18] sm:$0xff]  ;;  %3166 = vmatpush.msrb.mxu1 %v3142_v12 }
 0x286   : > { %v6972_v19 = vmul.f32 %v4105_v18, %v6846_v51  ;;  %v3103_v31 = vadd.f32 %v3102_v61, %v6955_v45  ;;  %v2864_v62 = vadd.f32 %v2796_v26, %v2622_v50  ;;  %4114 = vrcp.f32 %v3015_v57  ;;  %v3139_v26 = vld [vmem:[%s7465_s5 + $0x8] sm:$0xff]  ;;  %v7808_v44 = vld [vmem:[#allocation57_spill] sm:$0xff] }
 0x287   : > { %v4107_v55 = vpop.eup %4106  ;;  %v2985_v29 = vmul.f32 1.442695, %v2927_v21  ;;  %v6983_v51 = vadd.f32 %v6428_v23, %v2863_v38  ;;  %v2929_v1 = vsub.f32 0.0, %v6962_v56  ;;  %4116 = vpow2.f32 %v2981_v8  ;;  %3167 = vmatpush.msrb.mxu1 %v3141_v5 }
 0x288   : > { %v4109_v25 = vpop.eup %4108  ;;  %v3104_v63 = vadd.f32 %v3103_v31, %v6969_v15  ;;  %v3017_v53 = vadd.f32 1.0, %v7805_v37  ;;  %4118 = vpow2.f32 %v2983_v59  ;;  %v2987_v42 = vmul.f32 1.442695, %v2928_v11  ;;  %v7811_v59 = vld [vmem:[#allocation32_spill] sm:$0xff]  ;;  %v7814_v37 = vld [vmem:[#allocation17_spill] sm:$0xff] }
 0x289   : > { %v4111_v4 = vpop.eup %4110  ;;  %v2930_v47 = vsub.f32 0.0, %v6966_v36  ;;  %v6989_v22 = vmul.f32 %v4107_v55, %v6832_v30  ;;  %v6996_v28 = vadd.f32 %v6428_v23, %v2864_v62  ;;  %v3018_v46 = vadd.f32 1.0, %v7806_v20  ;;  %v7807_v23 = vld [vmem:[#allocation21_spill] sm:$0xff]  ;;  %3168 = vmatpush.msrb.mxu1 %v3140_v13  ;;  %v7812_v55 = vld [vmem:[#allocation30_spill] sm:$0xff] }
 0x28a   : > { %v3105_v48 = vadd.f32 %v3104_v63, %v6972_v19  ;;  %4120 = vpow2.f32 %v2985_v29  ;;  %v2931_v10 = vsub.f32 0.0, %v6983_v51  ;;  %v2989_v60 = vmul.f32 1.442695, %v2929_v1  ;;  %v7813_v29 = vld [vmem:[#allocation42_spill] sm:$0xff] }
 0x28b   : > { %v4113_v24 = vpop.eup %4112  ;;  %v7009_v17 = vmul.f32 %v7808_v44, %v7807_v23  ;;  %4122 = vrcp.f32 %v3017_v53  ;;  %v3019_v39 = vadd.f32 1.0, %v4109_v25  ;;  %v2932_v50 = vsub.f32 0.0, %v6996_v28  ;;  %3169 = vmatpush.msrb.mxu1 %v3139_v26 }
 0x28c   : > { %v7000_v16 = vmul.f32 %v4113_v24, %v6878_v40  ;;  %v3106_v30 = vadd.f32 %v3105_v48, %v6989_v22  ;;  %v4115_v49 = vpop.eup %4114  ;;  %4124 = vpow2.f32 %v2987_v42  ;;  %v2991_v40 = vmul.f32 1.442695, %v2930_v47  ;;  %v7815_v24 = vld [vmem:[#allocation18_spill] sm:$0xff] }
 0x28d   : > { %v4117_v57 = vpop.eup %4116  ;;  %4126 = vrcp.f32 %v3018_v46  ;;  %v3020_v54 = vadd.f32 1.0, %v4111_v4  ;;  %v7018_v41 = vmul.f32 %v7810_v52, %v7809_v34  ;;  %v2993_v8 = vmul.f32 1.442695, %v2931_v10  ;;  %3170 = vmatpush.msrb.mxu1 %v3138_v3 }
 0x28e   : > { %v3107_v6 = vadd.f32 %v3106_v30, %v7000_v16  ;;  %v4119_v14 = vpop.eup %4118  ;;  %4128 = vpow2.f32 %v2989_v60  ;;  %v3021_v2 = vadd.f32 1.0, %v4117_v57  ;;  %v2995_v18 = vmul.f32 1.442695, %v2932_v50  ;;  %v7816_v60 = vld [vmem:[#allocation45_spill] sm:$0xff] }
 0x28f   : > { %4130 = vrcp.f32 %v3019_v39  ;;  %v7023_v11 = vmul.f32 %v4115_v49, %v7811_v59  ;;  %v3022_v12 = vadd.f32 1.0, %v4119_v14  ;;  %v7027_v25 = vmul.f32 %v7813_v29, %v7812_v55 }
 0x290   : > { %v3108_v21 = vadd.f32 %v3107_v6, %v7009_v17  ;;  %v4121_v61 = vpop.eup %4120  ;;  %4132 = vpow2.f32 %v2991_v40  ;;  %v7817_v40 = vld [vmem:[#allocation46_spill] sm:$0xff] }
 0x291   : > { %v4123_v31 = vpop.eup %4122  ;;  %4134 = vrcp.f32 %v3020_v54  ;;  %v3023_v1 = vadd.f32 1.0, %v4121_v61 }
 0x292   : > { %v3109_v38 = vadd.f32 %v3108_v21, %v7018_v41  ;;  %v4125_v62 = vpop.eup %4124  ;;  %4136 = vpow2.f32 %v2993_v8  ;;  %v7031_v53 = vmul.f32 %v4123_v31, %v7814_v37 }
 0x293   : > { %v4127_v5 = vpop.eup %4126  ;;  %4138 = vrcp.f32 %v3021_v2  ;;  %v3024_v48 = vadd.f32 1.0, %v4125_v62  ;;  %v4342_v2 = vmov 256.0  }
 0x294   : > { %v3110_v63 = vadd.f32 %v3109_v38, %v7023_v11  ;;  %v4129_v4 = vpop.eup %4128  ;;  %4140 = vpow2.f32 %v2995_v18  ;;  %v7035_v20 = vmul.f32 %v4127_v5, %v7815_v24 }
 0x295   : > { %v4131_v47 = vpop.eup %4130  ;;  %4142 = vrcp.f32 %v3022_v12  ;;  %v3025_v26 = vadd.f32 1.0, %v4129_v4 }
 0x296   : > { %v3111_v42 = vadd.f32 %v3110_v63, %v7027_v25  ;;  %v4133_v13 = vpop.eup %4132  ;;  %4144 = vrcp.f32 %v3023_v1  ;;  %v7039_v49 = vmul.f32 %v4131_v47, %v7816_v60 }
 0x297   : > { %v4135_v30 = vpop.eup %4134  ;;  %4146 = vrcp.f32 %v3024_v48  ;;  %v3026_v39 = vadd.f32 1.0, %v4133_v13 }
 0x298   : > { %v3112_v46 = vadd.f32 %v3111_v42, %v7031_v53  ;;  %v4137_v10 = vpop.eup %4136  ;;  %v7043_v6 = vmul.f32 %v4135_v30, %v7817_v40  ;;  %4148 = vrcp.f32 %v3025_v26 }
 0x299   : > { %v4139_v44 = vpop.eup %4138  ;;  %v3027_v14 = vadd.f32 1.0, %v4137_v10  ;;  %4150 = vrcp.f32 %v3026_v39 }
 0x29a   : > { %v3113_v23 = vadd.f32 %v3112_v46, %v7035_v20  ;;  %v4141_v57 = vpop.eup %4140  ;;  %v7047_v54 = vmul.f32 %v4139_v44, %v7796_v58  ;;  %4152 = vrcp.f32 %v4342_v2  ;;  %v458_v44 = vld [vmem:[%s4485_s28 + $0x198] sm:$0xff] }
 0x29b   : > { %v4143_v50 = vpop.eup %4142  ;;  %v3028_v21 = vadd.f32 1.0, %v4141_v57  ;;  %4154 = vrcp.f32 %v3027_v14  ;;  %3728 = vmatmul.msk.f32.gmra.mxu2 %vm469_vm0, %v458_v44  ;;  %v3278_v44 = vld [vmem:[%s7469_s9 + $0x28] sm:$0xff] }
 0x29c   : > { %v3114_v3 = vadd.f32 %v3113_v23, %v7039_v49  ;;  %v4145_v52 = vpop.eup %4144  ;;  %v7051_v8 = vmul.f32 %v4143_v50, %v7799_v27  ;;  %v3154_v23 = vld [vmem:[%s7466_s6] sm:$0x1] }
 0x29d   : > { %v4147_v38 = vpop.eup %4146  ;;  %v7055_v18 = vmul.f32 %v4145_v52, %v6927_v9  ;;  %4156 = vrcp.f32 %v3028_v21 }
 0x29e   : > { %v3115_v34 = vadd.f32 %v3114_v3, %v7043_v6  ;;  %v4149_v59 = vpop.eup %4148  ;;  %v7059_v31 = vmul.f32 %v4147_v38, %v6942_v7  ;;  %v459_v3 = vld [vmem:[%s4485_s28 + $0x1a0] sm:$0xff] }
 0x29f   : > { %v4151_v27 = vpop.eup %4150  ;;  %v7063_v55 = vmul.f32 %v4149_v59, %v6962_v56 }
 0x2a0   : > { %v3116_v61 = vadd.f32 %v3115_v34, %v7047_v54  ;;  %v4153_v62 = vpop.eup %4152  ;;  %v7067_v9 = vmul.f32 %v4151_v27, %v6966_v36  ;;  %v460_v34 = vld [vmem:[%s4485_s28 + $0x1a8] sm:$0xff] }
 0x2a1   : > { %v4155_v63 = vpop.eup %4154  ;;  %v3131_v4 = vmul.f32 256.0, %v4153_v62  ;;  %vm3135_vm5 = vweird.f32 %v4153_v62 }
 0x2a2   : > { %v3117_v58 = vadd.f32 %v3116_v61, %v7051_v8  ;;  %v7071_v7 = vmul.f32 %v4155_v63, %v6983_v51 }
 0x2a3   : > { %v4157_v1 = vpop.eup %4156  ;;  %v3132_v47 = vsub.f32 1.0, %v3131_v4  ;;  %3729 = vmatmul.msk.f32.gmra.mxu2 %vm469_vm0, %v459_v3  ;;  %v3196_v4 = vld [vmem:[%s7468_s8] sm:$0x1]  ;;  %v3276_v3 = vld [vmem:[%s7469_s9 + $0x18] sm:$0xff] }
 0x2a4   : > { %v3118_v12 = vadd.f32 %v3117_v58, %v7055_v18  ;;  %v7075_v42 = vmul.f32 %v4157_v1, %v6996_v28 }
 0x2a5   : > { %v3133_v13 = vmul.f32 %v4153_v62, %v3132_v47 }
 0x2a6   : > { %v3119_v29 = vadd.f32 %v3118_v12, %v7059_v31 }
 0x2a7   : > { %v3134_v30 = vadd.f32 %v4153_v62, %v3133_v13 }
 0x2a8   : > { %v3120_v5 = vadd.f32 %v3119_v29, %v7063_v55 }
 0x2a9   : > { %v3136_v10 = vsel %vm3135_vm5, %v4153_v62, %v3134_v30  ;;  %v3283_v30 = vld [vmem:[%s7469_s9 + $0x50] sm:$0xff] }
 0x2aa   : > { %v3121_v37 = vadd.f32 %v3120_v5, %v7067_v9 }
 0x2ab   : > { %3730 = vmatmul.msk.f32.gmra.mxu2 %vm469_vm0, %v460_v34 }
 0x2ac   : > { %v3122_v56 = vadd.f32 %v3121_v37, %v7071_v7  ;;  %v3288_v37 = vld [vmem:[%s7469_s9 + $0x78] sm:$0xff] }
 0x2ad   : > { %3293 = vmatpush.msra.mxu1 %v3288_v37  ;;  %3754 = vmatpush.msra.mxu3 %v3288_v37  ;;  %v7820_v37 = vld [vmem:[#allocation55_spill] sm:$0xff] }
 0x2ae   : > { %v3123_v48 = vadd.f32 %v3122_v56, %v7075_v42  ;;  %v3287_v56 = vld [vmem:[%s7469_s9 + $0x70] sm:$0xff] }
 0x2af   : > { %3294 = vmatpush.msra.mxu1 %v3287_v56  ;;  %3755 = vmatpush.msra.mxu3 %v3287_v56 }
 0x2b0   : > { %v3124_v36 = vrot.slane %v3123_v48, 4 }
 0x2b2   : > { %v3125_v24 = vadd.f32 %v3124_v36, %v3123_v48  ;;  %v3286_v36 = vld [vmem:[%s7469_s9 + $0x68] sm:$0xff] }
 0x2b3   : > { %3295 = vmatpush.msra.mxu1 %v3286_v36  ;;  %3756 = vmatpush.msra.mxu3 %v3286_v36 }
 0x2b4   : > { %v3126_v46 = vrot.slane %v3125_v24, 2 }
 0x2b6   : > { %v3127_v26 = vadd.f32 %v3126_v46, %v3125_v24  ;;  %v3285_v24 = vld [vmem:[%s7469_s9 + $0x60] sm:$0xff]  ;;  %v3284_v46 = vld [vmem:[%s7469_s9 + $0x58] sm:$0xff] }
 0x2b7   : > { %3296 = vmatpush.msra.mxu1 %v3285_v24  ;;  %3757 = vmatpush.msra.mxu3 %v3285_v24 }
 0x2b8   : > { %v3128_v51 = vrot.slane %v3127_v26, 1 }
 0x2b9   : > { %3297 = vmatpush.msra.mxu1 %v3284_v46  ;;  %3758 = vmatpush.msra.mxu3 %v3284_v46  ;;  %v7823_v46 = vld [vmem:[#allocation69_spill] sm:$0xff] }
 0x2ba   : > { %v3129_v60 = vadd.f32 %v3128_v51, %v3127_v26  ;;  %v3282_v26 = vld [vmem:[%s7469_s9 + $0x48] sm:$0xff] }
 0x2bb   : > { %3298 = vmatpush.msra.mxu1 %v3283_v30  ;;  %3759 = vmatpush.msra.mxu3 %v3283_v30 }
 0x2bc   : > { %v3137_v28 = vmul.f32 %v3136_v10, %v3129_v60  ;;  %v3281_v10 = vld [vmem:[%s7469_s9 + $0x40] sm:$0xff] }
 0x2bd   : > { %3299 = vmatpush.msra.mxu1 %v3282_v26  ;;  %3760 = vmatpush.msra.mxu3 %v3282_v26 }
 0x2be   : > { %3171 = vmatmul.f32.vlgmr.msrb.gmra.mxu1 %v3137_v28  ;;  %v3280_v28 = vld [vmem:[%s7469_s9 + $0x38] sm:$0xff] }
 0x2bf   : > { %3300 = vmatpush.msra.mxu1 %v3281_v10  ;;  %3761 = vmatpush.msra.mxu3 %v3281_v10 }
 0x2c1   : > { %3301 = vmatpush.msra.mxu1 %v3280_v28  ;;  %3762 = vmatpush.msra.mxu3 %v3280_v28 }
 0x31e   : > { %v802_v63 = vpop.f32.mrf.mxu2 }
 0x326   : > { %v805_v5 = vpop.f32.mrf.mxu2 }
 0x327   : > { %v7819_v5 = vld [vmem:[#allocation19_spill] sm:$0xff] }
 0x32e   : > { %v808_v1 = vpop.f32.mrf.mxu2 }
 0x33b   : > { %v3172_v39 = vpop.f32.mrf.mxu1 }
 0x33c   : > { %v3173_v57 = vadd.f32 %v3172_v39, %v3154_v23  ;;  %v3279_v23 = vld [vmem:[%s7469_s9 + $0x30] sm:$0xff]  ;;  %v3277_v39 = vld [vmem:[%s7469_s9 + $0x20] sm:$0xff] }
 0x33d   : > { %3302 = vmatpush.msra.mxu1 %v3279_v23  ;;  %3763 = vmatpush.msra.mxu3 %v3279_v23 }
 0x33e   : > { %v3737_v40 = vmul.f32 -1.442695, %v3173_v57 }
 0x33f   : > { %3303 = vmatpush.msra.mxu1 %v3278_v44  ;;  %3764 = vmatpush.msra.mxu3 %v3278_v44 }
 0x340   : > { %4158 = vpow2.f32 %v3737_v40 }
 0x341   : > { %3304 = vmatpush.msra.mxu1 %v3277_v39  ;;  %3765 = vmatpush.msra.mxu3 %v3277_v39  ;;  %v4197_v39 = vld [vmem:[%s4485_s28 + $0x30] sm:$0xff] }
 0x343   : > { %3305 = vmatpush.msra.mxu1 %v3276_v3  ;;  %3766 = vmatpush.msra.mxu3 %v3276_v3 }
 0x346   : > { %v4159_v50 = vpop.eup %4158 }
 0x347   : > { %v3178_v14 = vadd.f32 1.0, %v4159_v50 }
 0x349   : > { %4160 = vrcp.f32 %v3178_v14  ;;  %v3190_v2 = vand.u32 2147483648, %v3178_v14  ;;  %v3188_v58 = vand.u32 2147483647, %v3178_v14  ;;  %vm3184_vm7 = vweird.f32 %v3178_v14 }
 0x34b   : > { %v3191_v12 = vor.u32 1.1754944e-38, %v3190_v2  ;;  %vm3189_vm9 = vcmp.eq.f32.partialorder %v3188_v58, 8.507059e+37 }
 0x34f   : > { %v4161_v52 = vpop.eup %4160 }
 0x350   : > { %v3180_v21 = vmul.f32 %v4161_v52, %v3178_v14  ;;  %vm3185_vm6 = vweird.f32 %v4161_v52  ;;  %v3275_v14 = vld [vmem:[%s7469_s9 + $0x10] sm:$0xff] }
 0x351   : > { %vm3186_vm8 = vmor %vm3184_vm7, %vm3185_vm6  ;;  %3306 = vmatpush.msra.mxu1 %v3275_v14  ;;  %3767 = vmatpush.msra.mxu3 %v3275_v14 }
 0x352   : > { %v3181_v61 = vsub.f32 1.0, %v3180_v21 }
 0x354   : > { %v3182_v38 = vmul.f32 %v4161_v52, %v3181_v61  ;;  %v3274_v61 = vld [vmem:[%s7469_s9 + $0x8] sm:$0xff] }
 0x355   : > { %3307 = vmatpush.msra.mxu1 %v3274_v61  ;;  %3768 = vmatpush.msra.mxu3 %v3274_v61 }
 0x356   : > { %v3183_v59 = vadd.f32 %v4161_v52, %v3182_v38  ;;  %v3273_v38 = vld [vmem:[%s7469_s9] sm:$0xff] }
 0x357   : > { %3308 = vmatpush.msra.mxu1 %v3273_v38  ;;  %3769 = vmatpush.msra.mxu3 %v3273_v38 }
 0x358   : > { %v3187_v27 = vsel %vm3186_vm8, %v4161_v52, %v3183_v59 }
 0x359   : > { %v3192_v62 = vsel %vm3189_vm9, %v3191_v12, %v3187_v27 }
 0x35a   : > { %v3194_v29 = vmul.f32 %v3192_v62, %v3173_v57  ;;  %v7818_v62 = vld [vmem:[#allocation47_spill] sm:$0xff] }
 0x35c   : > { %3738 = vmatmul.msk.f32.vlgmr.msrb.gmra.mxu2 %vm3197_vm10, %v3194_v29 }
 0x3df   : > { %v3218_v47 = vpop.f32.mrf.mxu2 }
 0x3e0   : > { %v3219_v48 = vadd.f32 %v3218_v47, %v3196_v4 }
 0x3e2   : > { %v3739_v13 = vmul.f32 -1.442695, %v3219_v48  ;;  %v7821_v48 = vld [vmem:[#allocation58_spill] sm:$0xff] }
 0x3e4   : > { %4162 = vpow2.f32 %v3739_v13  ;;  %v7822_v13 = vld [vmem:[#allocation68_spill] sm:$0xff] }
 0x3ea   : > { %v4163_v51 = vpop.eup %4162 }
 0x3eb   : > { %v3224_v60 = vadd.f32 1.0, %v4163_v51 }
 0x3ed   : > { %4164 = vrcp.f32 %v3224_v60  ;;  %v3236_v34 = vand.u32 2147483648, %v3224_v60  ;;  %v3234_v21 = vand.u32 2147483647, %v3224_v60  ;;  %vm3230_vm12 = vweird.f32 %v3224_v60 }
 0x3ef   : > { %v3237_v58 = vor.u32 1.1754944e-38, %v3236_v34  ;;  %vm3235_vm14 = vcmp.eq.f32.partialorder %v3234_v21, 8.507059e+37  ;;  %v4201_v21 = vld [vmem:[%s4485_s28 + $0x40] sm:$0xff] }
 0x3f0   : > { %v3414_v61 = vrot.slane %v4201_v21, 1 }
 0x3f3   : > { %v4165_v57 = vpop.eup %4164 }
 0x3f4   : > { %v3226_v40 = vmul.f32 %v4165_v57, %v3224_v60  ;;  %vm3231_vm11 = vweird.f32 %v4165_v57 }
 0x3f5   : > { %vm3232_vm13 = vmor %vm3230_vm12, %vm3231_vm11 }
 0x3f6   : > { %v3227_v50 = vsub.f32 1.0, %v3226_v40  ;;  %v4198_v40 = vld [vmem:[%s4485_s28 + $0x38] sm:$0xff] }
 0x3f7   : > { %v3412_v3 = vrot.slane %v4198_v40, 1 }
 0x3f8   : > { %v3228_v52 = vmul.f32 %v4165_v57, %v3227_v50  ;;  %v4199_v50 = vld [vmem:[%s4485_s28 + $0xb8] sm:$0xff] }
 0x3f9   : > { %v3439_v14 = vrot.slane %v4199_v50, 1 }
 0x3fa   : > { %v3229_v2 = vadd.f32 %v4165_v57, %v3228_v52 }
 0x3fc   : > { %v3233_v59 = vsel %vm3232_vm13, %v4165_v57, %v3229_v2  ;;  %v3411_v57 = vrot.slane %v4197_v39, 1 }
 0x3fd   : > { %v3238_v12 = vsel %vm3235_vm14, %v3237_v58, %v3233_v59  ;;  %v4203_v59 = vld [vmem:[%s4485_s28 + $0xc8] sm:$0xff] }
 0x3fe   : > { %v7139_v27 = vperm.slane %v3238_v12, 0  ;;  %v7202_v34 = vsel %vm1375_vm2, %v3411_v57, %v3412_v3  ;;  %v3442_v12 = vrot.slane %v4203_v59, 1 }
 0x400   : > { %v3241_v29 = vmul.f32 %v7139_v27, %v7818_v62  ;;  %v3252_v63 = vmul.f32 %v7139_v27, %v6955_v45  ;;  %v3242_v1 = vmul.f32 %v7139_v27, %v7819_v5  ;;  %v3253_v4 = vmul.f32 %v7139_v27, %v6969_v15 }
 0x401   : > { %v3243_v56 = vmul.f32 %v7139_v27, %v7820_v37  ;;  %v3254_v47 = vmul.f32 %v7139_v27, %v6972_v19  ;;  %v3244_v45 = vmul.f32 %v7139_v27, %v7821_v48  ;;  %v3255_v36 = vmul.f32 %v7139_v27, %v6989_v22  ;;  %v7231_v48 = vld [vmem:[%s4485_s28 + $0x98] sm:$0xff] }
 0x402   : > { %3309 = vmatmul.f32.vlgmr.msra.gmra.mxu1 %v3241_v29  ;;  %3342 = vmatmul.f32.vlgmr.msra.gmra.mxu3 %v3252_v63  ;;  %v3245_v15 = vmul.f32 %v7139_v27, %v7822_v13  ;;  %v3256_v24 = vmul.f32 %v7139_v27, %v7000_v16  ;;  %v3246_v19 = vmul.f32 %v7139_v27, %v7823_v46  ;;  %v7219_v29 = vld [vmem:[%s7470_s10] ss:$0 sm:$0xff]  ;;  %v4204_v63 = vld [vmem:[%s4485_s28 + $0x48] sm:$0xff] }
 0x403   : > { %v3257_v30 = vmul.f32 %v7139_v27, %v7009_v17  ;;  %v3247_v22 = vmul.f32 %v7139_v27, %v7789_v33  ;;  %v3258_v26 = vmul.f32 %v7139_v27, %v7018_v41  ;;  %v3248_v16 = vmul.f32 %v7139_v27, %v6895_v43 }
 0x404   : > { %v3259_v51 = vmul.f32 %v7139_v27, %v7023_v11  ;;  %v3249_v17 = vmul.f32 %v7139_v27, %v6910_v32  ;;  %v3260_v33 = vmul.f32 %v7139_v27, %v7027_v25  ;;  %v3250_v41 = vmul.f32 %v7139_v27, %v6920_v35  ;;  %v4194_v35 = vld [vmem:[%s4485_s28 + $0x18] sm:$0xff] }
 0x405   : > { %v3261_v43 = vmul.f32 %v7139_v27, %v7031_v53  ;;  %v3251_v11 = vmul.f32 %v7139_v27, %v6932_v0  ;;  %v3262_v32 = vmul.f32 %v7139_v27, %v7035_v20  ;;  %v3263_v25 = vmul.f32 %v7139_v27, %v7039_v49  ;;  %v4195_v53 = vld [vmem:[%s4485_s28 + $0x20] sm:$0xff]  ;;  %v4196_v20 = vld [vmem:[%s4485_s28 + $0x28] sm:$0xff] }
 0x406   : > { %v3406_v10 = vrot.slane %v4194_v35, 1  ;;  %v3407_v60 = vrot.slane %v4195_v53, 1  ;;  %v3264_v28 = vmul.f32 %v7139_v27, %v7043_v6  ;;  %v3409_v23 = vrot.slane %v4196_v20, 1  ;;  %v4213_v20 = vld [vmem:[%s4485_s28 + $0x60] sm:$0xff] }
 0x407   : > { %v3265_v49 = vmul.f32 %v7139_v27, %v7047_v54  ;;  %v3266_v6 = vmul.f32 %v7139_v27, %v7051_v8  ;;  %v4200_v54 = vld [vmem:[%s4485_s28 + $0xb0] sm:$0xff]  ;;  %v3267_v38 = vmul.f32 %v7139_v27, %v7055_v18  ;;  %v4202_v8 = vld [vmem:[%s4485_s28 + $0xc0] sm:$0xff]  ;;  %v7214_v62 = vsel %vm1375_vm2, %v3412_v3, %v3414_v61 }
 0x408   : > { %v3408_v0 = vsel %vm1375_vm2, %v3406_v10, %v3407_v60  ;;  %v3410_v44 = vsel %vm1375_vm2, %v3407_v60, %v3409_v23  ;;  %v3437_v52 = vrot.slane %v4200_v54, 1  ;;  %v3441_v58 = vrot.slane %v4202_v8, 1  ;;  %v4212_v10 = vld [vmem:[%s4485_s28 + $0xe0] sm:$0xff] }
 0x409   : > { %v3416_v5 = vrot.slane %v4204_v63, 1  ;;  %v3447_v53 = vrot.slane %v4212_v10, 1  ;;  %v3421_v23 = vrot.slane %v4213_v20, 1  ;;  %v3270_v50 = vmul.f32 %v7139_v27, %v7067_v9  ;;  %v4224_v10 = vld [vmem:[%s4485_s28 + $0x110] sm:$0xff] }
 0x40a   : > { %3312 = vmatmul.f32.gmra.mxu1 %v3242_v1  ;;  %3345 = vmatmul.f32.gmra.mxu3 %v3253_v4  ;;  %v7207_v2 = vsel %vm1375_vm2, %v3437_v52, %v3439_v14  ;;  %v4205_v1 = vld [vmem:[%s4485_s28 + $0x50] sm:$0xff]  ;;  %v7225_v4 = vsel %vm1375_vm2, %v3441_v58, %v3442_v12  ;;  %v4215_v14 = vld [vmem:[%s4485_s28 + $0xe8] sm:$0xff]  ;;  %v3271_v63 = vmul.f32 %v7139_v27, %v7071_v7  ;;  %v4220_v7 = vld [vmem:[%s4485_s28 + $0x80] sm:$0xff] }
 0x40b   : > { %v3417_v18 = vrot.slane %v4205_v1, 1  ;;  %v3449_v54 = vrot.slane %v4215_v14, 1 }
 0x40d   : > { %v7286_v58 = vsel %vm1375_vm2, %v3447_v53, %v3449_v54 }
 0x412   : > { %3315 = vmatmul.f32.gmra.mxu1 %v3243_v56  ;;  %3348 = vmatmul.f32.gmra.mxu3 %v3254_v47  ;;  %v3268_v47 = vmul.f32 %v7139_v27, %v7059_v31 }
 0x41a   : > { %3318 = vmatmul.f32.gmra.mxu1 %v3244_v45  ;;  %3351 = vmatmul.f32.gmra.mxu3 %v3255_v36  ;;  %v3432_v45 = vrot.slane %v7231_v48, 1  ;;  %v4207_v36 = vld [vmem:[%s4485_s28 + $0xa0] sm:$0xff] }
 0x41b   : > { %v3434_v13 = vrot.slane %v4207_v36, 1  ;;  %v4219_v36 = vld [vmem:[%s4485_s28 + $0x78] sm:$0xff] }
 0x422   : > { %3321 = vmatmul.f32.gmra.mxu1 %v3245_v15  ;;  %3354 = vmatmul.f32.gmra.mxu3 %v3256_v24  ;;  %v4208_v15 = vld [vmem:[%s4485_s28 + $0xd0] sm:$0xff] }
 0x423   : > { %v3444_v24 = vrot.slane %v4208_v15, 1  ;;  %v3427_v15 = vrot.slane %v4220_v7, 1  ;;  %v4229_v7 = vld [vmem:[%s4485_s28 + $0x138] sm:$0xff] }
 0x42a   : > { %3324 = vmatmul.f32.gmra.mxu1 %v3246_v19  ;;  %3357 = vmatmul.f32.gmra.mxu3 %v3257_v30  ;;  %v7237_v19 = vsel %vm1375_vm2, %v3416_v5, %v3417_v18  ;;  %v3435_v30 = vsel %vm1375_vm2, %v3432_v45, %v3434_v13  ;;  %v4217_v5 = vld [vmem:[%s4485_s28 + $0xf8] sm:$0xff]  ;;  %v3426_v13 = vrot.slane %v4219_v36, 1 }
 0x42b   : > { %v3452_v1 = vrot.slane %v4217_v5, 1  ;;  %v4228_v5 = vld [vmem:[%s4485_s28 + $0x130] sm:$0xff] }
 0x432   : > { %3327 = vmatmul.f32.gmra.mxu1 %v3247_v22  ;;  %3360 = vmatmul.f32.gmra.mxu3 %v3258_v26  ;;  %v4209_v22 = vld [vmem:[%s4485_s28 + $0x58] sm:$0xff] }
 0x433   : > { %v3419_v26 = vrot.slane %v4209_v22, 1  ;;  %v3272_v22 = vmul.f32 %v7139_v27, %v7075_v42 }
 0x43a   : > { %3330 = vmatmul.f32.gmra.mxu1 %v3248_v16  ;;  %3363 = vmatmul.f32.gmra.mxu3 %v3259_v51  ;;  %v7249_v51 = vsel %vm1375_vm2, %v3442_v12, %v3444_v24 }
 0x442   : > { %3333 = vmatmul.f32.gmra.mxu1 %v3249_v17  ;;  %3366 = vmatmul.f32.gmra.mxu3 %v3260_v33 }
 0x44a   : > { %3336 = vmatmul.f32.gmra.mxu1 %v3250_v41  ;;  %3369 = vmatmul.f32.gmra.mxu3 %v3261_v43  ;;  %v3269_v43 = vmul.f32 %v7139_v27, %v7063_v55 }
 0x452   : > { %3339 = vmatmul.f32.gmra.mxu1 %v3251_v11  ;;  %3372 = vmatmul.f32.gmra.mxu3 %v3262_v32  ;;  %v4210_v11 = vld [vmem:[%s4485_s28 + $0xa8] sm:$0xff] }
 0x453   : > { %v3436_v32 = vrot.slane %v4210_v11, 1 }
 0x455   : > { %v3438_v55 = vsel %vm1375_vm2, %v3436_v32, %v3437_v52 }
 0x45a   : > { %3375 = vmatmul.f32.gmra.mxu3 %v3263_v25  ;;  %v4211_v25 = vld [vmem:[%s4485_s28 + $0xd8] sm:$0xff] }
 0x45b   : > { %v3446_v35 = vrot.slane %v4211_v25, 1  ;;  %v4223_v25 = vld [vmem:[%s4485_s28 + $0x108] sm:$0xff] }
 0x462   : > { %3378 = vmatmul.f32.gmra.mxu3 %v3264_v28  ;;  %v7260_v28 = vsel %vm1375_vm2, %v3417_v18, %v3419_v26  ;;  %v4218_v18 = vld [vmem:[%s4485_s28 + $0xf0] sm:$0xff]  ;;  %v4221_v26 = vld [vmem:[%s4485_s28 + $0x100] sm:$0xff] }
 0x46a   : > { %3381 = vmatmul.f32.gmra.mxu3 %v3265_v49  ;;  %v4214_v49 = vld [vmem:[%s4485_s28 + $0x68] sm:$0xff] }
 0x46b   : > { %v3422_v39 = vrot.slane %v4214_v49, 1 }
 0x46d   : > { %v7279_v21 = vsel %vm1375_vm2, %v3421_v23, %v3422_v39 }
 0x472   : > { %3384 = vmatmul.f32.gmra.mxu3 %v3266_v6 }
 0x47a   : > { %3387 = vmatmul.f32.gmra.mxu3 %v3267_v38  ;;  %v4216_v38 = vld [vmem:[%s4485_s28 + $0x70] sm:$0xff] }
 0x47b   : > { %v3424_v8 = vrot.slane %v4216_v38, 1  ;;  %v4227_v38 = vld [vmem:[%s4485_s28 + $0x128] sm:$0xff] }
 0x47f   : > { %v3310_v37 = vpop.f32.mrf.mxu1 }
 0x480   : > { %v3311_v56 = vadd.f32 %v7219_v29, %v3310_v37  ;;  %v3451_v37 = vrot.slane %v4218_v18, 1 }
 0x482   : > { %v3518_v46 = vadd.f32 %v3408_v0, %v3311_v56  ;;  %3390 = vmatmul.f32.gmra.mxu3 %v3268_v47  ;;  %v3425_v47 = vsel %vm1375_vm2, %v3422_v39, %v3424_v8  ;;  %v3462_v8 = vrot.slane %v4227_v38, 1 }
 0x484   : > { %3550 = vst.msk [vmem:[%s7239_s25] sm:$0xff] %vm469_vm0, %v3518_v46  ;;  %v3453_v46 = vsel %vm1375_vm2, %v3451_v37, %v3452_v1 }
 0x485   : > { %v3343_v31 = vpop.f32.mrf.mxu3 }
 0x486   : > { %v3344_v16 = vadd.f32 %v7219_v29, %v3343_v31 }
 0x487   : > { %v3313_v17 = vpop.f32.mrf.mxu1 }
 0x488   : > { %v3529_v33 = vadd.f32 %v3435_v30, %v3344_v16  ;;  %v3314_v41 = vadd.f32 %v7219_v29, %v3313_v17  ;;  %v3454_v16 = vrot.slane %v4221_v26, 1 }
 0x48a   : > { %3561 = vst.msk [vmem:[%s7239_s25 + $0x58] sm:$0xff] %vm469_vm0, %v3529_v33  ;;  %v3519_v60 = vadd.f32 %v3410_v44, %v3314_v41  ;;  %3393 = vmatmul.f32.gmra.mxu3 %v3269_v43  ;;  %v7269_v44 = vsel %vm1375_vm2, %v3446_v35, %v3447_v53  ;;  %v3428_v33 = vsel %vm1375_vm2, %v3426_v13, %v3427_v15  ;;  %v4222_v41 = vld [vmem:[%s4485_s28 + $0x88] sm:$0xff]  ;;  %v3456_v35 = vrot.slane %v4223_v25, 1 }
 0x48b   : > { %v3429_v43 = vrot.slane %v4222_v41, 1  ;;  %v3455_v27 = vsel %vm1375_vm2, %v3452_v1, %v3454_v16  ;;  %v3457_v53 = vrot.slane %v4224_v10, 1  ;;  %v3464_v1 = vrot.slane %v4228_v5, 1 }
 0x48c   : > { %3551 = vst.msk [vmem:[%s7239_s25 + $0x8] sm:$0xff] %vm469_vm0, %v3519_v60 }
 0x48d   : > { %v3346_v0 = vpop.f32.mrf.mxu3  ;;  %v3458_v20 = vsel %vm1375_vm2, %v3456_v35, %v3457_v53  ;;  %v4234_v35 = vld [vmem:[%s4485_s28 + $0x158] sm:$0xff] }
 0x48e   : > { %v3347_v57 = vadd.f32 %v7219_v29, %v3346_v0  ;;  %v3430_v0 = vsel %vm1375_vm2, %v3427_v15, %v3429_v43  ;;  %v3466_v15 = vrot.slane %v4229_v7, 1  ;;  %v4232_v43 = vld [vmem:[%s4485_s28 + $0x148] sm:$0xff]  ;;  %v3472_v10 = vrot.slane %v4234_v35, 1 }
 0x48f   : > { %v3316_v40 = vpop.f32.mrf.mxu1 }
 0x490   : > { %v3530_v3 = vadd.f32 %v3438_v55, %v3347_v57  ;;  %v3317_v6 = vadd.f32 %v7219_v29, %v3316_v40  ;;  %v4225_v57 = vld [vmem:[%s4485_s28 + $0x118] sm:$0xff] }
 0x491   : > { %v3459_v40 = vrot.slane %v4225_v57, 1 }
 0x492   : > { %3562 = vst.msk [vmem:[%s7239_s25 + $0x60] sm:$0xff] %vm469_vm0, %v3530_v3  ;;  %v3520_v52 = vadd.f32 %v7202_v34, %v3317_v6  ;;  %3396 = vmatmul.f32.gmra.mxu3 %v3270_v50 }
 0x493   : > { %v3460_v50 = vsel %vm1375_vm2, %v3457_v53, %v3459_v40  ;;  %v4236_v40 = vld [vmem:[%s4485_s28 + $0x168] sm:$0xff] }
 0x494   : > { %3552 = vst.msk [vmem:[%s7239_s25 + $0x10] sm:$0xff] %vm469_vm0, %v3520_v52  ;;  %v4226_v52 = vld [vmem:[%s4485_s28 + $0x120] sm:$0xff] }
 0x495   : > { %v3349_v61 = vpop.f32.mrf.mxu3 }
 0x496   : > { %v3350_v9 = vadd.f32 %v7219_v29, %v3349_v61  ;;  %v3461_v61 = vrot.slane %v4226_v52, 1  ;;  %v4238_v52 = vld [vmem:[%s4485_s28 + $0x178] sm:$0xff] }
 0x497   : > { %v3319_v59 = vpop.f32.mrf.mxu1 }
 0x498   : > { %v3531_v34 = vadd.f32 %v7207_v2, %v3350_v9  ;;  %v3320_v12 = vadd.f32 %v7219_v29, %v3319_v59 }
 0x49a   : > { %3563 = vst.msk [vmem:[%s7239_s25 + $0x68] sm:$0xff] %vm469_vm0, %v3531_v34  ;;  %v3521_v56 = vadd.f32 %v7214_v62, %v3320_v12  ;;  %3399 = vmatmul.f32.gmra.mxu3 %v3271_v63  ;;  %v3463_v34 = vsel %vm1375_vm2, %v3461_v61, %v3462_v8  ;;  %v3479_v61 = vrot.slane %v4238_v52, 1 }
 0x49c   : > { %3553 = vst.msk [vmem:[%s7239_s25 + $0x18] sm:$0xff] %vm469_vm0, %v3521_v56 }
 0x49d   : > { %v3352_v2 = vpop.f32.mrf.mxu3 }
 0x49e   : > { %v3353_v24 = vadd.f32 %v7219_v29, %v3352_v2 }
 0x49f   : > { %v3322_v31 = vpop.f32.mrf.mxu1 }
 0x4a0   : > { %v3532_v62 = vadd.f32 %v7225_v4, %v3353_v24  ;;  %v3323_v30 = vadd.f32 %v7219_v29, %v3322_v31  ;;  %v4230_v24 = vld [vmem:[%s4485_s28 + $0x140] sm:$0xff] }
 0x4a2   : > { %3564 = vst.msk [vmem:[%s7239_s25 + $0x70] sm:$0xff] %vm469_vm0, %v3532_v62  ;;  %v3522_v17 = vadd.f32 %v7237_v19, %v3323_v30  ;;  %3402 = vmatmul.f32.gmra.mxu3 %v3272_v22  ;;  %v4231_v62 = vld [vmem:[%s4485_s28 + $0x90] sm:$0xff] }
 0x4a3   : > { %v3431_v30 = vrot.slane %v4231_v62, 1 }
 0x4a4   : > { %3554 = vst.msk [vmem:[%s7239_s25 + $0x20] sm:$0xff] %vm469_vm0, %v3522_v17 }
 0x4a5   : > { %v3355_v4 = vpop.f32.mrf.mxu3 }
 0x4a6   : > { %v3356_v42 = vadd.f32 %v7219_v29, %v3355_v4 }
 0x4a7   : > { %v3325_v11 = vpop.f32.mrf.mxu1 }
 0x4a8   : > { %v3533_v32 = vadd.f32 %v7249_v51, %v3356_v42  ;;  %v3326_v19 = vadd.f32 %v7219_v29, %v3325_v11  ;;  %v3469_v42 = vrot.slane %v4232_v43, 1 }
 0x4aa   : > { %3565 = vst.msk [vmem:[%s7239_s25 + $0x78] sm:$0xff] %vm469_vm0, %v3533_v32  ;;  %v3523_v60 = vadd.f32 %v7260_v28, %v3326_v19 }
 0x4ac   : > { %3555 = vst.msk [vmem:[%s7239_s25 + $0x28] sm:$0xff] %vm469_vm0, %v3523_v60 }
 0x4ad   : > { %v3358_v55 = vpop.f32.mrf.mxu3 }
 0x4ae   : > { %v3359_v51 = vadd.f32 %v7219_v29, %v3358_v55 }
 0x4af   : > { %v3328_v23 = vpop.f32.mrf.mxu1 }
 0x4b0   : > { %v3534_v49 = vadd.f32 %v7269_v44, %v3359_v51  ;;  %v3329_v39 = vadd.f32 %v7219_v29, %v3328_v23  ;;  %v4235_v51 = vld [vmem:[%s4485_s28 + $0x160] sm:$0xff] }
 0x4b2   : > { %3566 = vst.msk [vmem:[%s7239_s25 + $0x80] sm:$0xff] %vm469_vm0, %v3534_v49  ;;  %v3524_v28 = vadd.f32 %v7279_v21, %v3329_v39 }
 0x4b4   : > { %3556 = vst.msk [vmem:[%s7239_s25 + $0x30] sm:$0xff] %vm469_vm0, %v3524_v28  ;;  %v3476_v28 = vrot.slane %v4236_v40, 1 }
 0x4b5   : > { %v3361_v3 = vpop.f32.mrf.mxu3 }
 0x4b6   : > { %v3362_v6 = vadd.f32 %v7219_v29, %v3361_v3  ;;  %v4237_v3 = vld [vmem:[%s4485_s28 + $0x170] sm:$0xff] }
 0x4b7   : > { %v3331_v14 = vpop.f32.mrf.mxu1 }
 0x4b8   : > { %v3535_v44 = vadd.f32 %v7286_v58, %v3362_v6  ;;  %v3332_v54 = vadd.f32 %v7219_v29, %v3331_v14  ;;  %v3477_v6 = vrot.slane %v4237_v3, 1 }
 0x4ba   : > { %3567 = vst.msk [vmem:[%s7239_s25 + $0x88] sm:$0xff] %vm469_vm0, %v3535_v44  ;;  %v3525_v21 = vadd.f32 %v3425_v47, %v3332_v54  ;;  %v3465_v47 = vsel %vm1375_vm2, %v3462_v8, %v3464_v1  ;;  %v3478_v44 = vsel %vm1375_vm2, %v3476_v28, %v3477_v6 }
 0x4bc   : > { %3557 = vst.msk [vmem:[%s7239_s25 + $0x38] sm:$0xff] %vm469_vm0, %v3525_v21  ;;  %v3480_v21 = vsel %vm1375_vm2, %v3477_v6, %v3479_v61 }
 0x4bd   : > { %v3364_v9 = vpop.f32.mrf.mxu3 }
 0x4be   : > { %v3365_v59 = vadd.f32 %v7219_v29, %v3364_v9 }
 0x4bf   : > { %v3334_v58 = vpop.f32.mrf.mxu1 }
 0x4c0   : > { %v3536_v12 = vadd.f32 %v3453_v46, %v3365_v59  ;;  %v3335_v63 = vadd.f32 %v7219_v29, %v3334_v58  ;;  %v3467_v46 = vrot.slane %v4230_v24, 1  ;;  %v4239_v59 = vld [vmem:[%s4485_s28 + $0x180] sm:$0xff]  ;;  %v4240_v58 = vld [vmem:[%s4485_s28 + $0x188] sm:$0xff] }
 0x4c2   : > { %3568 = vst.msk [vmem:[%s7239_s25 + $0x90] sm:$0xff] %vm469_vm0, %v3536_v12  ;;  %v3526_v18 = vadd.f32 %v3428_v33, %v3335_v63  ;;  %v3468_v16 = vsel %vm1375_vm2, %v3466_v15, %v3467_v46  ;;  %v3433_v33 = vsel %vm1375_vm2, %v3431_v30, %v3432_v45  ;;  %v3470_v48 = vsel %vm1375_vm2, %v3467_v46, %v3469_v42  ;;  %v4233_v45 = vld [vmem:[%s4485_s28 + $0x150] sm:$0xff] }
 0x4c3   : > { %v3471_v25 = vrot.slane %v4233_v45, 1  ;;  %v3482_v12 = vrot.slane %v4240_v58, 1 }
 0x4c4   : > { %3558 = vst.msk [vmem:[%s7239_s25 + $0x40] sm:$0xff] %vm469_vm0, %v3526_v18 }
 0x4c5   : > { %v3367_v37 = vpop.f32.mrf.mxu3 }
 0x4c6   : > { %v3368_v56 = vadd.f32 %v7219_v29, %v3367_v37  ;;  %v4241_v37 = vld [vmem:[%s4485_s28 + $0x190] sm:$0xff]  ;;  %s3745_s28 = sshll.u32 %s4426_s21, 8 }
 0x4c7   : > { %v3337_v2 = vpop.f32.mrf.mxu1  ;;  %s3594_s15 = scalar_lea.hbm %s7471_s11, %s3745_s28 }
 0x4c8   : > { %v3537_v36 = vadd.f32 %v3455_v27, %v3368_v56  ;;  %v3338_v13 = vadd.f32 %v7219_v29, %v3337_v2  ;;  %v3484_v56 = vrot.slane %v4241_v37, 1  ;;  %s3597_s13 = sshll.u32 %s3594_s15, 4  ;;  %s3598_s13 = int_to_ptr.hbm [resolvable:$true] %s3597_s13 }
 0x4c9   : > { %s4286_s21 = sshra.s32 %s3598_s13, 4  ;;  %s4287_s21 = int_to_ptr.hbm [resolvable:$true] %s4286_s21 }
 0x4ca   : > { %3569 = vst.msk [vmem:[%s7239_s25 + $0x98] sm:$0xff] %vm469_vm0, %v3537_v36  ;;  %v3527_v31 = vadd.f32 %v3430_v0, %v3338_v13  ;;  %v3473_v0 = vsel %vm1375_vm2, %v3471_v25, %v3472_v10  ;;  %v3485_v36 = vsel %vm1375_vm2, %v3482_v12, %v3484_v56  ;;  %s4288_s19 = scalar_lea.hbm %s4287_s21, 256  ;;  %p4293_p3 = scmp.lt.s32.totalorder %s4287_s21, %s7471_s11 }
 0x4cb   : > { %p4289_p6 = scmp.ne.s32.totalorder %s4287_s21, %s4288_s19  ;;  %p4294_p4 = scmp.lt.s32.totalorder %s4292_s29, %s4288_s19 }
 0x4cc   : > { %3559 = vst.msk [vmem:[%s7239_s25 + $0x48] sm:$0xff] %vm469_vm0, %v3527_v31 }
 0x4cd   : > { %v3370_v22 = vpop.f32.mrf.mxu3  ;;  %p4290_p13 = pnand %p4289_p6, %p4451_p11  ;;  %p4295_p5 = por %p4294_p4, %p4293_p3 }
 0x4ce   : > { %v3371_v26 = vadd.f32 %v7219_v29, %v3370_v22 }
 0x4cf   : > { %v3340_v17 = vpop.f32.mrf.mxu1  ;;  %p4291_p2 = pneg %p4290_p13 }
 0x4d0   : > { %v3538_v4 = vadd.f32 %v3458_v20, %v3371_v26  ;;  %v3341_v41 = vadd.f32 %v7219_v29, %v3340_v17  ;;  %v3474_v20 = vrot.slane %v4235_v51, 1 }
 0x4d1   : > { %p4296_p7 = pnand %p4295_p5, %p4291_p2 }
 0x4d2   : > { %3570 = vst.msk [vmem:[%s7239_s25 + $0xa0] sm:$0xff] %vm469_vm0, %v3538_v4  ;;  %v3528_v27 = vadd.f32 %v3433_v33, %v3341_v41  ;;  %v3475_v39 = vsel %vm1375_vm2, %v3472_v10, %v3474_v20 }
 0x4d4   : > { %3560 = vst.msk [vmem:[%s7239_s25 + $0x50] sm:$0xff] %vm469_vm0, %v3528_v27 }
 0x4d5   : > { %v3373_v11 = vpop.f32.mrf.mxu3 }
 0x4d6   : > { %v3374_v32 = vadd.f32 %v7219_v29, %v3373_v11 }
 0x4d8   : > { %v3539_v19 = vadd.f32 %v3460_v50, %v3374_v32 }
 0x4da   : > { %3571 = vst.msk [vmem:[%s7239_s25 + $0xa8] sm:$0xff] %vm469_vm0, %v3539_v19 }
 0x4dd   : > { %v3376_v53 = vpop.f32.mrf.mxu3 }
 0x4de   : > { %v3377_v60 = vadd.f32 %v7219_v29, %v3376_v53 }
 0x4e0   : > { %v3540_v55 = vadd.f32 %v3463_v34, %v3377_v60  ;;  %v3481_v34 = vrot.slane %v4239_v59, 1 }
 0x4e2   : > { %3572 = vst.msk [vmem:[%s7239_s25 + $0xb0] sm:$0xff] %vm469_vm0, %v3540_v55  ;;  %v3483_v1 = vsel %vm1375_vm2, %v3481_v34, %v3482_v12 }
 0x4e5   : > { %v3379_v23 = vpop.f32.mrf.mxu3 }
 0x4e6   : > { %v3380_v49 = vadd.f32 %v7219_v29, %v3379_v23 }
 0x4e8   : > { %v3541_v57 = vadd.f32 %v3465_v47, %v3380_v49 }
 0x4ea   : > { %3573 = vst.msk [vmem:[%s7239_s25 + $0xb8] sm:$0xff] %vm469_vm0, %v3541_v57 }
 0x4ed   : > { %v3382_v50 = vpop.f32.mrf.mxu3 }
 0x4ee   : > { %v3383_v14 = vadd.f32 %v7219_v29, %v3382_v50 }
 0x4f0   : > { %v3542_v54 = vadd.f32 %v3468_v16, %v3383_v14 }
 0x4f2   : > { %3574 = vst.msk [vmem:[%s7239_s25 + $0xc0] sm:$0xff] %vm469_vm0, %v3542_v54 }
 0x4f5   : > { %v3385_v38 = vpop.f32.mrf.mxu3 }
 0x4f6   : > { %v3386_v8 = vadd.f32 %v7219_v29, %v3385_v38 }
 0x4f8   : > { %v3543_v9 = vadd.f32 %v3470_v48, %v3386_v8 }
 0x4fa   : > { %3575 = vst.msk [vmem:[%s7239_s25 + $0xc8] sm:$0xff] %vm469_vm0, %v3543_v9 }
 0x4fd   : > { %v3388_v63 = vpop.f32.mrf.mxu3 }
 0x4fe   : > { %v3389_v5 = vadd.f32 %v7219_v29, %v3388_v63 }
 0x500   : > { %v3544_v18 = vadd.f32 %v3473_v0, %v3389_v5 }
 0x502   : > { %3576 = vst.msk [vmem:[%s7239_s25 + $0xd0] sm:$0xff] %vm469_vm0, %v3544_v18 }
 0x505   : > { %v3391_v47 = vpop.f32.mrf.mxu3 }
 0x506   : > { %v3392_v2 = vadd.f32 %v7219_v29, %v3391_v47 }
 0x508   : > { %v3545_v13 = vadd.f32 %v3475_v39, %v3392_v2 }
 0x50a   : > { %3577 = vst.msk [vmem:[%s7239_s25 + $0xd8] sm:$0xff] %vm469_vm0, %v3545_v13 }
 0x50d   : > { %v3394_v7 = vpop.f32.mrf.mxu3 }
 0x50e   : > { %v3395_v15 = vadd.f32 %v7219_v29, %v3394_v7 }
 0x510   : > { %v3546_v24 = vadd.f32 %v3478_v44, %v3395_v15 }
 0x512   : > { %3578 = vst.msk [vmem:[%s7239_s25 + $0xe0] sm:$0xff] %vm469_vm0, %v3546_v24 }
 0x515   : > { %v3397_v46 = vpop.f32.mrf.mxu3 }
 0x516   : > { %v3398_v31 = vadd.f32 %v7219_v29, %v3397_v46 }
 0x518   : > { %v3547_v62 = vadd.f32 %v3480_v21, %v3398_v31 }
 0x51a   : > { %3579 = vst.msk [vmem:[%s7239_s25 + $0xe8] sm:$0xff] %vm469_vm0, %v3547_v62 }
 0x51d   : > { %v3400_v30 = vpop.f32.mrf.mxu3 }
 0x51e   : > { %v3401_v22 = vadd.f32 %v7219_v29, %v3400_v30 }
 0x520   : > { %v3548_v26 = vadd.f32 %v3483_v1, %v3401_v22 }
 0x522   : > { %3580 = vst.msk [vmem:[%s7239_s25 + $0xf0] sm:$0xff] %vm469_vm0, %v3548_v26 }
 0x525   : > { %v3403_v16 = vpop.f32.mrf.mxu3 }
 0x526   : > { %v3404_v17 = vadd.f32 %v7219_v29, %v3403_v16 }
 0x528   : > { %v3549_v33 = vadd.f32 %v3485_v36, %v3404_v17 }
 0x52a   : > { %3581 = vst.msk [vmem:[%s7239_s25 + $0xf8] sm:$0xff] %vm469_vm0, %v3549_v33 }
 0x52b   : > { %4299 = shalt.err (!%p4296_p7)
}
 0x52c   : > { %s4343_s16 = smov 128   ;;  %s4344_s25 = smov 8  }
 0x52d   : > { %3775 = dma.vmem_to_hbm [thread:$0]  (%p4451_p11), %s3596_s30, 4096, %s3598_s13, %s3583_s17, %s4343_s16, %s4343_s16, %s4344_s25  }
 0x52e PF: > { %s7825_s28 = sld [smem:[#allocation8_spill]]  ;;  %p3782_p8 = pnand %p3673_p9, %p4455_p12 }
 0x530   : > { %p3783_p10 = pneg %p3782_p8 }
 0x534   : > { %s3612_s12 = sand.u32 1, %s7825_s28  }
 0x535   : > { %s3613_s15 = scalar_lea.sflag [#allocation4], %s3612_s12 }
 0x536   : > { %4321 = dma.done.wait (%p3783_p10), %s3613_s15, 4096  }
 0x537   : > { %4323 = vsyncadd (%p3783_p10), %s3613_s15, 4294963200  ;;  %s7827_s20 = sld [smem:[#allocation10_spill]]  ;;  %s7830_s17 = smov %s4330_s18 }
 0x538   : > { %s7828_s21 = sld [smem:[#allocation9_spill]] }
 0x539   : > { %s7829_s19 = sld [smem:[#allocation11_spill]] }
 0x53d   : > { %p24_p0 = scmp.ge.s32.totalorder %s7827_s20, 4  }
 0x53e   : > { %s7831_s18 = smov %s7828_s21 }
 0x53f   :  { %26 = sbr.rel (!%p24_p0) target bundleno = 5 (0x5), region = 111 }
 0x544   :  { %3619 = vsyncpa [#allocation3], 1 }
 0x545   :  { %3621 = vsyncpa [#allocation3 + $0x1], 1 }
 0x546   :  { %3622 = vsyncpa [#allocation4], 1 }
 0x547   :  { %3624 = vsyncpa [#allocation4 + $0x1], 1 }

</bundles_post_ra>
